<compile_context>
chip_gen: v7x
topology: tpu7x:2x2x1
jax: 0.10.0
libtpu: 0.0.40
codegen_flags: <defaults>
</compile_context>

<pallas_src>
import functools  # noqa: F401  (kept for parity with common kernel scaffolding)

import numpy as np

import jax
import jax.numpy as jnp
from jax import lax
from jax.experimental import pallas as pl
from jax.experimental.pallas import tpu as pltpu

# Hyperparameters (config.Hyperparameter) — small synthetic values.
NUM_NOISE = 8
NUM_CLASS = 4
NUM_G_FILTER = 8
NUM_CHANNEL = 1
BN_EPS = 1e-5


# ----------------------------------------------------------------------------
# Fused whole-generator Pallas kernel
# ----------------------------------------------------------------------------
def _generator_kernel(xb_ref, w1_ref, b1_ref,
                      s2_ref, c2_ref, g2_ref, t2_ref, ga2_ref, be2_ref,
                      s3_ref, c3_ref, g3_ref, t3_ref, ga3_ref, be3_ref,
                      s4_ref, c4_ref, g4_ref, t4_ref, ga4_ref, be4_ref,
                      r5_ref, c5_ref,
                      o_ref, tbuf_ref):
    f32 = jnp.float32
    bf16 = jnp.bfloat16

    def tconv(a, s_ref, c_ref):
        # ConvTranspose2d on the (B*H, W*C) layout:
        #   4 independent deep matmuls A @ C[kh] (K = W*Cin = 256), written at
        #   aligned sublane offsets kh*(B*H) into the f32 VMEM scratch, then a
        #   single height-scatter matmul  out = S_cat @ T  with K = 4*B*H.
        k = c_ref.shape[0]
        bh = a.shape[0]
        for kh in range(k):                                    # static unroll
            tbuf_ref[kh * bh:(kh + 1) * bh, :] = jnp.dot(
                a, c_ref[kh], preferred_element_type=f32)
        t = tbuf_ref[0:k * bh, :].astype(bf16)
        return jnp.dot(s_ref[...], t, preferred_element_type=f32)

    def bn_relu(acc, g_ref, gt_ref, gamma_ref, beta_ref):
        # Training-mode BatchNorm2d (biased batch statistics), all in f32.
        # Channel co lives in columns {wo*Cout + co}; G (pre-scaled by 1/n)
        # and G^T gather/scatter between that layout and a (1, Cout) row.
        s = jnp.sum(acc, axis=0, keepdims=True)                # (1, Wo*Cout)
        ss = jnp.sum(acc * acc, axis=0, keepdims=True)         # (1, Wo*Cout)
        mean = jnp.dot(s, g_ref[...], preferred_element_type=f32)   # (1, Cout)
        ex2 = jnp.dot(ss, g_ref[...], preferred_element_type=f32)
        var = jnp.maximum(ex2 - mean * mean, 0.0)              # clamp cancellation
        scale = gamma_ref[...] * lax.rsqrt(var + BN_EPS)       # EUP rsqrt, no divide
        shift = beta_ref[...] - mean * scale
        scale_f = jnp.dot(scale, gt_ref[...], preferred_element_type=f32)
        shift_f = jnp.dot(shift, gt_ref[...], preferred_element_type=f32)
        return jnp.maximum(acc * scale_f + shift_f, 0.0).astype(bf16)

    # deconv1: ConvT(cin, 8*ngf, 4, s1, p0) on 1x1 input == ONE matmul + bias + ReLU.
    a = jnp.dot(xb_ref[...], w1_ref[...], preferred_element_type=f32)
    a = jnp.maximum(a + b1_ref[...], 0.0).astype(bf16)
    # deconv2..4: ConvT(4, s2, p1, bias=False) + BatchNorm + ReLU (fused).
    a = bn_relu(tconv(a, s2_ref, c2_ref), g2_ref, t2_ref, ga2_ref, be2_ref)
    a = bn_relu(tconv(a, s3_ref, c3_ref), g3_ref, t3_ref, ga3_ref, be3_ref)
    a = bn_relu(tconv(a, s4_ref, c4_ref), g4_ref, t4_ref, ga4_ref, be4_ref)
    # deconv5: ConvT(ngf, NUM_CHANNEL, 1, s1, p2)  ==  crop 2 + 1x1 mix, then Tanh.
    t5 = jnp.dot(a, c5_ref[...], preferred_element_type=f32).astype(bf16)
    o_ref[...] = jnp.tanh(jnp.dot(r5_ref[...], t5, preferred_element_type=f32))


# ----------------------------------------------------------------------------
# Constant-matrix construction (weight preprocessing, outside the kernel/jit)
# ----------------------------------------------------------------------------
def _row_mats(B, H, Ho, k, s, p):
    """R[kh][b*Ho + ho, b*H + h] = 1  iff  ho == s*h + kh - p   (numpy)."""
    r = np.zeros((k, B * Ho, B * H), np.float32)
    for kh in range(k):
        for h in range(H):
            ho = s * h + kh - p
            if 0 <= ho < Ho:
                for b in range(B):
                    r[kh, b * Ho + ho, b * H + h] = 1.0
    return r


def _col_mats(w_t, W, Wo, k, s, p):
    """Fuse the width scatter of a ConvTranspose2d with its weights.

    w_t: PyTorch ConvTranspose2d weight [Cin, Cout, kH, kW].
    Returns C of shape [kH, W*Cin, Wo*Cout] with
        C[kh, w*Cin+ci, wo*Cout+co] = w_t[ci, co, kh, wo - s*w + p]  (in range).
    """
    cin, cout = w_t.shape[0], w_t.shape[1]
    sel = np.zeros((W, Wo, k), np.float32)
    for kw in range(k):
        for w in range(W):
            wo = s * w + kw - p
            if 0 <= wo < Wo:
                sel[w, wo, kw] = 1.0
    c = jnp.einsum("woq,ichq->hwioc", jnp.asarray(sel), w_t.astype(jnp.float32))
    return c.reshape(k, W * cin, Wo * cout)


def _group_mats(Wo, cout):
    """G[(wo*cout+c), c'] = [c == c'];  returns (G, G^T) as numpy."""
    g = np.tile(np.eye(cout, dtype=np.float32), (Wo, 1))
    return g, np.ascontiguousarray(g.T)


def prepare_generator(params, batch):
    """Precompute all constant matrices consumed by the fused kernel.

    Call ONCE (outside jit, weights frozen) — addresses the wrapper-overhead
    review item.  Matmul-facing constants are bf16; BN constants stay f32.
    """
    ngf = NUM_G_FILTER
    B = batch
    f32, bf16 = jnp.float32, jnp.bfloat16
    row = lambda v: v.astype(f32).reshape(1, -1)

    # deconv1: 1x1 -> 4x4, k=4, s=1, p=0, folded into one matmul.
    w1 = params["w1"].astype(f32)                          # [Cin, C1, 4, 4]
    cin, c1out = w1.shape[0], w1.shape[1]
    # W1cat[h*Cin+ci, w*C1+co] = w1[ci, co, h, w]
    w1cat = jnp.transpose(w1, (2, 0, 3, 1)).reshape(4 * cin, 4 * c1out).astype(bf16)
    b1 = jnp.tile(params["b1"].astype(f32), 4).reshape(1, 4 * c1out)

    def scatter(H, Ho):
        # S_cat = hconcat_kh R[kh], shape (B*Ho, 4*B*H).  0/1 -> exact in bf16.
        r = _row_mats(B, H, Ho, 4, 2, 1)
        return jnp.asarray(np.concatenate(list(r), axis=1), dtype=bf16)

    def group(Wo, cout, n_pix):
        g, gt = _group_mats(Wo, cout)
        return jnp.asarray(g / n_pix, f32), jnp.asarray(gt, f32)

    # deconv2: 4x4 -> 8x8, k=4, s=2, p=1
    s2 = scatter(4, 8)
    c2 = _col_mats(params["w2"], 4, 8, 4, 2, 1).astype(bf16)
    g2, t2 = group(8, 4 * ngf, B * 8 * 8)
    # deconv3: 8x8 -> 16x16
    s3 = scatter(8, 16)
    c3 = _col_mats(params["w3"], 8, 16, 4, 2, 1).astype(bf16)
    g3, t3 = group(16, 2 * ngf, B * 16 * 16)
    # deconv4: 16x16 -> 32x32
    s4 = scatter(16, 32)
    c4 = _col_mats(params["w4"], 16, 32, 4, 2, 1).astype(bf16)
    g4, t4 = group(32, ngf, B * 32 * 32)
    # deconv5: 32x32 -> 28x28, k=1, s=1, p=2 (= crop 2 then 1x1 channel mix)
    r5 = jnp.asarray(_row_mats(B, 32, 28, 1, 1, 2)[0], dtype=bf16)
    c5 = _col_mats(params["w5"], 32, 28, 1, 1, 2)[0].astype(bf16)

    return (w1cat, b1,
            s2, c2, g2, t2, row(params["g2"]), row(params["be2"]),
            s3, c3, g3, t3, row(params["g3"]), row(params["be3"]),
            s4, c4, g4, t4, row(params["g4"]), row(params["be4"]),
            r5, c5)


# ----------------------------------------------------------------------------
# Generator forward: ONE pallas_call (constants prepared once, outside jit)
# ----------------------------------------------------------------------------
def generator_forward(x, consts):
    B, cin = x.shape
    # deconv1 "im2col" on the 1x1 input: Xb[b*4+h, h'*Cin+ci] = x[b,ci]*[h==h'].
    xb = x[:, None, None, :] * jnp.eye(4, dtype=x.dtype)[None, :, :, None]
    xb = xb.reshape(B * 4, 4 * cin).astype(jnp.bfloat16)
    # No grid: every operand is a whole-array VMEM block (all tiny at these
    # shapes); all intermediates stay resident on-chip.  The f32 scratch holds
    # the per-tap partials T (4*B*16 rows covers the largest layer, lane width
    # Wo*Cout == 256 for every hidden layer).
    out2d = pl.pallas_call(
        _generator_kernel,
        out_shape=jax.ShapeDtypeStruct((B * 28, 28 * NUM_CHANNEL), jnp.float32),
        scratch_shapes=[pltpu.VMEM((4 * B * 16, 32 * NUM_G_FILTER), jnp.float32)],
    )(xb, *consts)
    out = out2d.reshape(B, 28, 28, NUM_CHANNEL)
    return jnp.transpose(out, (0, 3, 1, 2))          # NCHW, matches PyTorch


# ----------------------------------------------------------------------------
# Pure-JAX reference (independent formulation, for correctness checking)
# ----------------------------------------------------------------------------
def _tconv_ref(y_nhwc, w_t, k, s, p):
    B, H, W, C = y_nhwc.shape
    cout = w_t.shape[1]
    pad = k - 1 - p
    up_h = (H - 1) * s + 1 + 2 * pad
    up_w = (W - 1) * s + 1 + 2 * pad
    up = jnp.zeros((B, up_h, up_w, C), y_nhwc.dtype)
    up = up.at[:, pad:pad + (H - 1) * s + 1:s,
               pad:pad + (W - 1) * s + 1:s, :].set(y_nhwc)
    Ho, Wo = up_h - k + 1, up_w - k + 1
    taps = [up[:, di:di + Ho, dj:dj + Wo, :] for di in range(k) for dj in range(k)]
    patches = jnp.stack(taps, axis=3).reshape(B * Ho * Wo, k * k * C)
    wf = w_t[:, :, ::-1, ::-1]
    wmat = jnp.transpose(wf, (2, 3, 0, 1)).reshape(k * k * C, cout)
    return (patches @ wmat).reshape(B, Ho, Wo, cout)


def _bn_relu_ref(y, gamma, beta):
    c = y.shape[-1]
    flat = y.reshape(-1, c)
    mean = flat.mean(0)
    var = flat.var(0)                               # biased, like PyTorch fwd
    out = (y - mean) / jnp.sqrt(var + BN_EPS) * gamma + beta
    return jnp.maximum(out, 0.0)


def reference_forward(x, params):
    y = jnp.einsum("bi,ichw->bhwc", x, params["w1"]) + params["b1"]
    y = jnp.maximum(y, 0.0)
    y = _bn_relu_ref(_tconv_ref(y, params["w2"], 4, 2, 1), params["g2"], params["be2"])
    y = _bn_relu_ref(_tconv_ref(y, params["w3"], 4, 2, 1), params["g3"], params["be3"])
    y = _bn_relu_ref(_tconv_ref(y, params["w4"], 4, 2, 1), params["g4"], params["be4"])
    y = y[:, 2:-2, 2:-2, :]                         # deconv5 pad=2 with k=1 => crop
    y = jnp.tanh(jnp.einsum("bhwc,cd->bhwd", y, params["w5"][:, :, 0, 0]))
    return jnp.transpose(y, (0, 3, 1, 2))


# ----------------------------------------------------------------------------
# Deterministic parameter init (synthetic; no checkpoint loading)
# ----------------------------------------------------------------------------
def init_params(key):
    cin = NUM_NOISE + NUM_CLASS
    ngf = NUM_G_FILTER
    ks = jax.random.split(key, 12)
    n = jax.random.normal
    return {
        "w1": 0.05 * n(ks[0], (cin, ngf * 8, 4, 4), jnp.float32),
        "b1": 0.05 * n(ks[1], (ngf * 8,), jnp.float32),
        "w2": 0.05 * n(ks[2], (ngf * 8, ngf * 4, 4, 4), jnp.float32),
        "g2": 1.0 + 0.1 * n(ks[3], (ngf * 4,), jnp.float32),
        "be2": 0.1 * n(ks[4], (ngf * 4,), jnp.float32),
        "w3": 0.05 * n(ks[5], (ngf * 4, ngf * 2, 4, 4), jnp.float32),
        "g3": 1.0 + 0.1 * n(ks[6], (ngf * 2,), jnp.float32),
        "be3": 0.1 * n(ks[7], (ngf * 2,), jnp.float32),
        "w4": 0.05 * n(ks[8], (ngf * 2, ngf, 4, 4), jnp.float32),
        "g4": 1.0 + 0.1 * n(ks[9], (ngf,), jnp.float32),
        "be4": 0.1 * n(ks[10], (ngf,), jnp.float32),
        "w5": 0.05 * n(ks[11], (ngf, NUM_CHANNEL, 1, 1), jnp.float32),
    }


if __name__ == "__main__":
    key = jax.random.PRNGKey(0)
    pkey, xkey = jax.random.split(key)
    params = init_params(pkey)

    # x: the noise+class vector (module itself does x[:, :, None, None]).
    x = jax.random.normal(xkey, (2, NUM_NOISE + NUM_CLASS), jnp.float32)

    # Constant preprocessing hoisted out of the per-call path (frozen weights).
    consts = prepare_generator(params, x.shape[0])

    fwd = jax.jit(generator_forward)
    out = jax.block_until_ready(fwd(x, consts))
    assert out.shape == (2, NUM_CHANNEL, 28, 28), out.shape
    assert bool(jnp.all(jnp.isfinite(out)))

    # Correctness: compare the single fused Pallas kernel against an
    # independent pure-JAX f32 formulation.  Tolerance covers the bf16
    # matmul-input quantization (accumulation is f32); real layout/index bugs
    # give O(0.1+) errors.
    ref = jax.block_until_ready(jax.jit(reference_forward)(x, params))
    err = float(jnp.max(jnp.abs(out - ref)))
    assert bool(jnp.allclose(out, ref, atol=2e-2, rtol=2e-2)), err

    print("KERNEL_OK")
</pallas_src>

<mosaic_0001>
module attributes {stable_mosaic.version = 11 : i64} {
  func.func @_generator_kernel(%arg0: memref<8x48xbf16, #tpu.memory_space<vmem>>, %arg1: memref<48x256xbf16, #tpu.memory_space<vmem>>, %arg2: memref<1x256xf32, #tpu.memory_space<vmem>>, %arg3: memref<16x32xbf16, #tpu.memory_space<vmem>>, %arg4: memref<4x256x256xbf16, #tpu.memory_space<vmem>>, %arg5: memref<256x32xf32, #tpu.memory_space<vmem>>, %arg6: memref<32x256xf32, #tpu.memory_space<vmem>>, %arg7: memref<1x32xf32, #tpu.memory_space<vmem>>, %arg8: memref<1x32xf32, #tpu.memory_space<vmem>>, %arg9: memref<32x64xbf16, #tpu.memory_space<vmem>>, %arg10: memref<4x256x256xbf16, #tpu.memory_space<vmem>>, %arg11: memref<256x16xf32, #tpu.memory_space<vmem>>, %arg12: memref<16x256xf32, #tpu.memory_space<vmem>>, %arg13: memref<1x16xf32, #tpu.memory_space<vmem>>, %arg14: memref<1x16xf32, #tpu.memory_space<vmem>>, %arg15: memref<64x128xbf16, #tpu.memory_space<vmem>>, %arg16: memref<4x256x256xbf16, #tpu.memory_space<vmem>>, %arg17: memref<256x8xf32, #tpu.memory_space<vmem>>, %arg18: memref<8x256xf32, #tpu.memory_space<vmem>>, %arg19: memref<1x8xf32, #tpu.memory_space<vmem>>, %arg20: memref<1x8xf32, #tpu.memory_space<vmem>>, %arg21: memref<56x64xbf16, #tpu.memory_space<vmem>>, %arg22: memref<256x28xbf16, #tpu.memory_space<vmem>>, %arg23: memref<56x28xf32, #tpu.memory_space<vmem>>, %arg24: memref<128x256xf32, #tpu.memory_space<vmem>>) attributes {dimension_semantics = [], scalar_prefetch = 0 : i64, scratch_operands = 1 : i64, tpu.core_type = #tpu.core_type<tc>} {
    %c0 = arith.constant 0 : index
    %c0_0 = arith.constant 0 : index
    %0 = vector.load %arg0[%c0, %c0_0] : memref<8x48xbf16, #tpu.memory_space<vmem>>, vector<8x48xbf16>
    %c0_1 = arith.constant 0 : index
    %c0_2 = arith.constant 0 : index
    %1 = vector.load %arg1[%c0_1, %c0_2] : memref<48x256xbf16, #tpu.memory_space<vmem>>, vector<48x256xbf16>
    %cst = arith.constant dense<0.000000e+00> : vector<8x256xf32>
    %2 = tpu.matmul %0, %1, %cst {dimension_numbers = #tpu.dot_dimension_numbers<[1], [0], [0], [1], [0, 0, 1, 1], [], []>} : vector<8x48xbf16>, vector<48x256xbf16>, vector<8x256xf32> -> vector<8x256xf32>
    %c0_3 = arith.constant 0 : index
    %c0_4 = arith.constant 0 : index
    %3 = vector.load %arg2[%c0_3, %c0_4] : memref<1x256xf32, #tpu.memory_space<vmem>>, vector<1x256xf32>
    %4 = vector.broadcast %3 : vector<1x256xf32> to vector<8x256xf32>
    %5 = arith.addf %2, %4 : vector<8x256xf32>
    %cst_5 = arith.constant 0.000000e+00 : f32
    %6 = vector.broadcast %cst_5 : f32 to vector<8x256xf32>
    %7 = arith.maximumf %5, %6 : vector<8x256xf32>
    %8 = arith.truncf %7 : vector<8x256xf32> to vector<8x256xbf16>
    %c0_6 = arith.constant 0 : index
    %c0_7 = arith.constant 0 : index
    %c0_8 = arith.constant 0 : index
    %9 = vector.load %arg4[%c0_6, %c0_7, %c0_8] : memref<4x256x256xbf16, #tpu.memory_space<vmem>>, vector<1x256x256xbf16>
    %10 = vector.shape_cast %9 : vector<1x256x256xbf16> to vector<256x256xbf16>
    %cst_9 = arith.constant dense<0.000000e+00> : vector<8x256xf32>
    %11 = tpu.matmul %8, %10, %cst_9 {dimension_numbers = #tpu.dot_dimension_numbers<[1], [0], [0], [1], [0, 0, 1, 1], [], []>} : vector<8x256xbf16>, vector<256x256xbf16>, vector<8x256xf32> -> vector<8x256xf32>
    %c0_10 = arith.constant 0 : index
    %c0_11 = arith.constant 0 : index
    %12 = vector.load %arg24[%c0_10, %c0_11] : memref<128x256xf32, #tpu.memory_space<vmem>>, vector<8x256xf32>
    tpu.vector_store %arg24[%c0_10, %c0_11], %11 {strides = array<i32>} : memref<128x256xf32, #tpu.memory_space<vmem>>, vector<8x256xf32>,
    %c1 = arith.constant 1 : index
    %c0_12 = arith.constant 0 : index
    %c0_13 = arith.constant 0 : index
    %13 = vector.load %arg4[%c1, %c0_12, %c0_13] : memref<4x256x256xbf16, #tpu.memory_space<vmem>>, vector<1x256x256xbf16>
    %14 = vector.shape_cast %13 : vector<1x256x256xbf16> to vector<256x256xbf16>
    %cst_14 = arith.constant dense<0.000000e+00> : vector<8x256xf32>
    %15 = tpu.matmul %8, %14, %cst_14 {dimension_numbers = #tpu.dot_dimension_numbers<[1], [0], [0], [1], [0, 0, 1, 1], [], []>} : vector<8x256xbf16>, vector<256x256xbf16>, vector<8x256xf32> -> vector<8x256xf32>
    %c8 = arith.constant 8 : index
    %c0_15 = arith.constant 0 : index
    %16 = vector.load %arg24[%c8, %c0_15] : memref<128x256xf32, #tpu.memory_space<vmem>>, vector<8x256xf32>
    tpu.vector_store %arg24[%c8, %c0_15], %15 {strides = array<i32>} : memref<128x256xf32, #tpu.memory_space<vmem>>, vector<8x256xf32>,
    %c2 = arith.constant 2 : index
    %c0_16 = arith.constant 0 : index
    %c0_17 = arith.constant 0 : index
    %17 = vector.load %arg4[%c2, %c0_16, %c0_17] : memref<4x256x256xbf16, #tpu.memory_space<vmem>>, vector<1x256x256xbf16>
    %18 = vector.shape_cast %17 : vector<1x256x256xbf16> to vector<256x256xbf16>
    %cst_18 = arith.constant dense<0.000000e+00> : vector<8x256xf32>
    %19 = tpu.matmul %8, %18, %cst_18 {dimension_numbers = #tpu.dot_dimension_numbers<[1], [0], [0], [1], [0, 0, 1, 1], [], []>} : vector<8x256xbf16>, vector<256x256xbf16>, vector<8x256xf32> -> vector<8x256xf32>
    %c16 = arith.constant 16 : index
    %c0_19 = arith.constant 0 : index
    %20 = vector.load %arg24[%c16, %c0_19] : memref<128x256xf32, #tpu.memory_space<vmem>>, vector<8x256xf32>
    tpu.vector_store %arg24[%c16, %c0_19], %19 {strides = array<i32>} : memref<128x256xf32, #tpu.memory_space<vmem>>, vector<8x256xf32>,
    %c3 = arith.constant 3 : index
    %c0_20 = arith.constant 0 : index
    %c0_21 = arith.constant 0 : index
    %21 = vector.load %arg4[%c3, %c0_20, %c0_21] : memref<4x256x256xbf16, #tpu.memory_space<vmem>>, vector<1x256x256xbf16>
    %22 = vector.shape_cast %21 : vector<1x256x256xbf16> to vector<256x256xbf16>
    %cst_22 = arith.constant dense<0.000000e+00> : vector<8x256xf32>
    %23 = tpu.matmul %8, %22, %cst_22 {dimension_numbers = #tpu.dot_dimension_numbers<[1], [0], [0], [1], [0, 0, 1, 1], [], []>} : vector<8x256xbf16>, vector<256x256xbf16>, vector<8x256xf32> -> vector<8x256xf32>
    %c24 = arith.constant 24 : index
    %c0_23 = arith.constant 0 : index
    %24 = vector.load %arg24[%c24, %c0_23] : memref<128x256xf32, #tpu.memory_space<vmem>>, vector<8x256xf32>
    tpu.vector_store %arg24[%c24, %c0_23], %23 {strides = array<i32>} : memref<128x256xf32, #tpu.memory_space<vmem>>, vector<8x256xf32>,
    %c0_24 = arith.constant 0 : index
    %c0_25 = arith.constant 0 : index
    %25 = vector.load %arg24[%c0_24, %c0_25] : memref<128x256xf32, #tpu.memory_space<vmem>>, vector<32x256xf32>
    %26 = arith.truncf %25 : vector<32x256xf32> to vector<32x256xbf16>
    %c0_26 = arith.constant 0 : index
    %c0_27 = arith.constant 0 : index
    %27 = vector.load %arg3[%c0_26, %c0_27] : memref<16x32xbf16, #tpu.memory_space<vmem>>, vector<16x32xbf16>
    %cst_28 = arith.constant dense<0.000000e+00> : vector<16x256xf32>
    %28 = tpu.matmul %27, %26, %cst_28 {dimension_numbers = #tpu.dot_dimension_numbers<[1], [0], [0], [1], [0, 0, 1, 1], [], []>} : vector<16x32xbf16>, vector<32x256xbf16>, vector<16x256xf32> -> vector<16x256xf32>
    %cst_29 = arith.constant dense<0.000000e+00> : vector<256xf32>
    %29 = vector.multi_reduction <add>, %28, %cst_29 [0] : vector<16x256xf32> to vector<256xf32>
    %30 = vector.shape_cast %29 : vector<256xf32> to vector<1x256xf32>
    %31 = arith.mulf %28, %28 : vector<16x256xf32>
    %cst_30 = arith.constant dense<0.000000e+00> : vector<256xf32>
    %32 = vector.multi_reduction <add>, %31, %cst_30 [0] : vector<16x256xf32> to vector<256xf32>
    %33 = vector.shape_cast %32 : vector<256xf32> to vector<1x256xf32>
    %c0_31 = arith.constant 0 : index
    %c0_32 = arith.constant 0 : index
    %34 = vector.load %arg5[%c0_31, %c0_32] : memref<256x32xf32, #tpu.memory_space<vmem>>, vector<256x32xf32>
    %cst_33 = arith.constant dense<0.000000e+00> : vector<1x32xf32>
    %35 = tpu.matmul %30, %34, %cst_33 {dimension_numbers = #tpu.dot_dimension_numbers<[1], [0], [0], [1], [0, 0, 1, 1], [], []>} : vector<1x256xf32>, vector<256x32xf32>, vector<1x32xf32> -> vector<1x32xf32>
    %c0_34 = arith.constant 0 : index
    %c0_35 = arith.constant 0 : index
    %36 = vector.load %arg5[%c0_34, %c0_35] : memref<256x32xf32, #tpu.memory_space<vmem>>, vector<256x32xf32>
    %cst_36 = arith.constant dense<0.000000e+00> : vector<1x32xf32>
    %37 = tpu.matmul %33, %36, %cst_36 {dimension_numbers = #tpu.dot_dimension_numbers<[1], [0], [0], [1], [0, 0, 1, 1], [], []>} : vector<1x256xf32>, vector<256x32xf32>, vector<1x32xf32> -> vector<1x32xf32>
    %38 = arith.mulf %35, %35 : vector<1x32xf32>
    %39 = arith.subf %37, %38 : vector<1x32xf32>
    %cst_37 = arith.constant 0.000000e+00 : f32
    %40 = vector.broadcast %cst_37 : f32 to vector<1x32xf32>
    %41 = arith.maximumf %39, %40 : vector<1x32xf32>
    %c0_38 = arith.constant 0 : index
    %c0_39 = arith.constant 0 : index
    %42 = vector.load %arg7[%c0_38, %c0_39] : memref<1x32xf32, #tpu.memory_space<vmem>>, vector<1x32xf32>
    %cst_40 = arith.constant 9.99999974E-6 : f32
    %43 = vector.broadcast %cst_40 : f32 to vector<1x32xf32>
    %44 = arith.addf %41, %43 : vector<1x32xf32>
    %45 = math.rsqrt %44 : vector<1x32xf32>
    %46 = arith.mulf %42, %45 : vector<1x32xf32>
    %c0_41 = arith.constant 0 : index
    %c0_42 = arith.constant 0 : index
    %47 = vector.load %arg8[%c0_41, %c0_42] : memref<1x32xf32, #tpu.memory_space<vmem>>, vector<1x32xf32>
    %48 = arith.mulf %35, %46 : vector<1x32xf32>
    %49 = arith.subf %47, %48 : vector<1x32xf32>
    %c0_43 = arith.constant 0 : index
    %c0_44 = arith.constant 0 : index
    %50 = vector.load %arg6[%c0_43, %c0_44] : memref<32x256xf32, #tpu.memory_space<vmem>>, vector<32x256xf32>
    %cst_45 = arith.constant dense<0.000000e+00> : vector<1x256xf32>
    %51 = tpu.matmul %46, %50, %cst_45 {dimension_numbers = #tpu.dot_dimension_numbers<[1], [0], [0], [1], [0, 0, 1, 1], [], []>} : vector<1x32xf32>, vector<32x256xf32>, vector<1x256xf32> -> vector<1x256xf32>
    %c0_46 = arith.constant 0 : index
    %c0_47 = arith.constant 0 : index
    %52 = vector.load %arg6[%c0_46, %c0_47] : memref<32x256xf32, #tpu.memory_space<vmem>>, vector<32x256xf32>
    %cst_48 = arith.constant dense<0.000000e+00> : vector<1x256xf32>
    %53 = tpu.matmul %49, %52, %cst_48 {dimension_numbers = #tpu.dot_dimension_numbers<[1], [0], [0], [1], [0, 0, 1, 1], [], []>} : vector<1x32xf32>, vector<32x256xf32>, vector<1x256xf32> -> vector<1x256xf32>
    %54 = vector.broadcast %51 : vector<1x256xf32> to vector<16x256xf32>
    %55 = arith.mulf %28, %54 : vector<16x256xf32>
    %56 = vector.broadcast %53 : vector<1x256xf32> to vector<16x256xf32>
    %57 = arith.addf %55, %56 : vector<16x256xf32>
    %cst_49 = arith.constant 0.000000e+00 : f32
    %58 = vector.broadcast %cst_49 : f32 to vector<16x256xf32>
    %59 = arith.maximumf %57, %58 : vector<16x256xf32>
    %60 = arith.truncf %59 : vector<16x256xf32> to vector<16x256xbf16>
    %c0_50 = arith.constant 0 : index
    %c0_51 = arith.constant 0 : index
    %c0_52 = arith.constant 0 : index
    %61 = vector.load %arg10[%c0_50, %c0_51, %c0_52] : memref<4x256x256xbf16, #tpu.memory_space<vmem>>, vector<1x256x256xbf16>
    %62 = vector.shape_cast %61 : vector<1x256x256xbf16> to vector<256x256xbf16>
    %cst_53 = arith.constant dense<0.000000e+00> : vector<16x256xf32>
    %63 = tpu.matmul %60, %62, %cst_53 {dimension_numbers = #tpu.dot_dimension_numbers<[1], [0], [0], [1], [0, 0, 1, 1], [], []>} : vector<16x256xbf16>, vector<256x256xbf16>, vector<16x256xf32> -> vector<16x256xf32>
    %c0_54 = arith.constant 0 : index
    %c0_55 = arith.constant 0 : index
    %64 = vector.load %arg24[%c0_54, %c0_55] : memref<128x256xf32, #tpu.memory_space<vmem>>, vector<16x256xf32>
    tpu.vector_store %arg24[%c0_54, %c0_55], %63 {strides = array<i32>} : memref<128x256xf32, #tpu.memory_space<vmem>>, vector<16x256xf32>,
    %c1_56 = arith.constant 1 : index
    %c0_57 = arith.constant 0 : index
    %c0_58 = arith.constant 0 : index
    %65 = vector.load %arg10[%c1_56, %c0_57, %c0_58] : memref<4x256x256xbf16, #tpu.memory_space<vmem>>, vector<1x256x256xbf16>
    %66 = vector.shape_cast %65 : vector<1x256x256xbf16> to vector<256x256xbf16>
    %cst_59 = arith.constant dense<0.000000e+00> : vector<16x256xf32>
    %67 = tpu.matmul %60, %66, %cst_59 {dimension_numbers = #tpu.dot_dimension_numbers<[1], [0], [0], [1], [0, 0, 1, 1], [], []>} : vector<16x256xbf16>, vector<256x256xbf16>, vector<16x256xf32> -> vector<16x256xf32>
    %c16_60 = arith.constant 16 : index
    %c0_61 = arith.constant 0 : index
    %68 = vector.load %arg24[%c16_60, %c0_61] : memref<128x256xf32, #tpu.memory_space<vmem>>, vector<16x256xf32>
    tpu.vector_store %arg24[%c16_60, %c0_61], %67 {strides = array<i32>} : memref<128x256xf32, #tpu.memory_space<vmem>>, vector<16x256xf32>,
    %c2_62 = arith.constant 2 : index
    %c0_63 = arith.constant 0 : index
    %c0_64 = arith.constant 0 : index
    %69 = vector.load %arg10[%c2_62, %c0_63, %c0_64] : memref<4x256x256xbf16, #tpu.memory_space<vmem>>, vector<1x256x256xbf16>
    %70 = vector.shape_cast %69 : vector<1x256x256xbf16> to vector<256x256xbf16>
    %cst_65 = arith.constant dense<0.000000e+00> : vector<16x256xf32>
    %71 = tpu.matmul %60, %70, %cst_65 {dimension_numbers = #tpu.dot_dimension_numbers<[1], [0], [0], [1], [0, 0, 1, 1], [], []>} : vector<16x256xbf16>, vector<256x256xbf16>, vector<16x256xf32> -> vector<16x256xf32>
    %c32 = arith.constant 32 : index
    %c0_66 = arith.constant 0 : index
    %72 = vector.load %arg24[%c32, %c0_66] : memref<128x256xf32, #tpu.memory_space<vmem>>, vector<16x256xf32>
    tpu.vector_store %arg24[%c32, %c0_66], %71 {strides = array<i32>} : memref<128x256xf32, #tpu.memory_space<vmem>>, vector<16x256xf32>,
    %c3_67 = arith.constant 3 : index
    %c0_68 = arith.constant 0 : index
    %c0_69 = arith.constant 0 : index
    %73 = vector.load %arg10[%c3_67, %c0_68, %c0_69] : memref<4x256x256xbf16, #tpu.memory_space<vmem>>, vector<1x256x256xbf16>
    %74 = vector.shape_cast %73 : vector<1x256x256xbf16> to vector<256x256xbf16>
    %cst_70 = arith.constant dense<0.000000e+00> : vector<16x256xf32>
    %75 = tpu.matmul %60, %74, %cst_70 {dimension_numbers = #tpu.dot_dimension_numbers<[1], [0], [0], [1], [0, 0, 1, 1], [], []>} : vector<16x256xbf16>, vector<256x256xbf16>, vector<16x256xf32> -> vector<16x256xf32>
    %c48 = arith.constant 48 : index
    %c0_71 = arith.constant 0 : index
    %76 = vector.load %arg24[%c48, %c0_71] : memref<128x256xf32, #tpu.memory_space<vmem>>, vector<16x256xf32>
    tpu.vector_store %arg24[%c48, %c0_71], %75 {strides = array<i32>} : memref<128x256xf32, #tpu.memory_space<vmem>>, vector<16x256xf32>,
    %c0_72 = arith.constant 0 : index
    %c0_73 = arith.constant 0 : index
    %77 = vector.load %arg24[%c0_72, %c0_73] : memref<128x256xf32, #tpu.memory_space<vmem>>, vector<64x256xf32>
    %78 = arith.truncf %77 : vector<64x256xf32> to vector<64x256xbf16>
    %c0_74 = arith.constant 0 : index
    %c0_75 = arith.constant 0 : index
    %79 = vector.load %arg9[%c0_74, %c0_75] : memref<32x64xbf16, #tpu.memory_space<vmem>>, vector<32x64xbf16>
    %cst_76 = arith.constant dense<0.000000e+00> : vector<32x256xf32>
    %80 = tpu.matmul %79, %78, %cst_76 {dimension_numbers = #tpu.dot_dimension_numbers<[1], [0], [0], [1], [0, 0, 1, 1], [], []>} : vector<32x64xbf16>, vector<64x256xbf16>, vector<32x256xf32> -> vector<32x256xf32>
    %cst_77 = arith.constant dense<0.000000e+00> : vector<256xf32>
    %81 = vector.multi_reduction <add>, %80, %cst_77 [0] : vector<32x256xf32> to vector<256xf32>
    %82 = vector.shape_cast %81 : vector<256xf32> to vector<1x256xf32>
    %83 = arith.mulf %80, %80 : vector<32x256xf32>
    %cst_78 = arith.constant dense<0.000000e+00> : vector<256xf32>
    %84 = vector.multi_reduction <add>, %83, %cst_78 [0] : vector<32x256xf32> to vector<256xf32>
    %85 = vector.shape_cast %84 : vector<256xf32> to vector<1x256xf32>
    %c0_79 = arith.constant 0 : index
    %c0_80 = arith.constant 0 : index
    %86 = vector.load %arg11[%c0_79, %c0_80] : memref<256x16xf32, #tpu.memory_space<vmem>>, vector<256x16xf32>
    %cst_81 = arith.constant dense<0.000000e+00> : vector<1x16xf32>
    %87 = tpu.matmul %82, %86, %cst_81 {dimension_numbers = #tpu.dot_dimension_numbers<[1], [0], [0], [1], [0, 0, 1, 1], [], []>} : vector<1x256xf32>, vector<256x16xf32>, vector<1x16xf32> -> vector<1x16xf32>
    %c0_82 = arith.constant 0 : index
    %c0_83 = arith.constant 0 : index
    %88 = vector.load %arg11[%c0_82, %c0_83] : memref<256x16xf32, #tpu.memory_space<vmem>>, vector<256x16xf32>
    %cst_84 = arith.constant dense<0.000000e+00> : vector<1x16xf32>
    %89 = tpu.matmul %85, %88, %cst_84 {dimension_numbers = #tpu.dot_dimension_numbers<[1], [0], [0], [1], [0, 0, 1, 1], [], []>} : vector<1x256xf32>, vector<256x16xf32>, vector<1x16xf32> -> vector<1x16xf32>
    %90 = arith.mulf %87, %87 : vector<1x16xf32>
    %91 = arith.subf %89, %90 : vector<1x16xf32>
    %cst_85 = arith.constant 0.000000e+00 : f32
    %92 = vector.broadcast %cst_85 : f32 to vector<1x16xf32>
    %93 = arith.maximumf %91, %92 : vector<1x16xf32>
    %c0_86 = arith.constant 0 : index
    %c0_87 = arith.constant 0 : index
    %94 = vector.load %arg13[%c0_86, %c0_87] : memref<1x16xf32, #tpu.memory_space<vmem>>, vector<1x16xf32>
    %cst_88 = arith.constant 9.99999974E-6 : f32
    %95 = vector.broadcast %cst_88 : f32 to vector<1x16xf32>
    %96 = arith.addf %93, %95 : vector<1x16xf32>
    %97 = math.rsqrt %96 : vector<1x16xf32>
    %98 = arith.mulf %94, %97 : vector<1x16xf32>
    %c0_89 = arith.constant 0 : index
    %c0_90 = arith.constant 0 : index
    %99 = vector.load %arg14[%c0_89, %c0_90] : memref<1x16xf32, #tpu.memory_space<vmem>>, vector<1x16xf32>
    %100 = arith.mulf %87, %98 : vector<1x16xf32>
    %101 = arith.subf %99, %100 : vector<1x16xf32>
    %c0_91 = arith.constant 0 : index
    %c0_92 = arith.constant 0 : index
    %102 = vector.load %arg12[%c0_91, %c0_92] : memref<16x256xf32, #tpu.memory_space<vmem>>, vector<16x256xf32>
    %cst_93 = arith.constant dense<0.000000e+00> : vector<1x256xf32>
    %103 = tpu.matmul %98, %102, %cst_93 {dimension_numbers = #tpu.dot_dimension_numbers<[1], [0], [0], [1], [0, 0, 1, 1], [], []>} : vector<1x16xf32>, vector<16x256xf32>, vector<1x256xf32> -> vector<1x256xf32>
    %c0_94 = arith.constant 0 : index
    %c0_95 = arith.constant 0 : index
    %104 = vector.load %arg12[%c0_94, %c0_95] : memref<16x256xf32, #tpu.memory_space<vmem>>, vector<16x256xf32>
    %cst_96 = arith.constant dense<0.000000e+00> : vector<1x256xf32>
    %105 = tpu.matmul %101, %104, %cst_96 {dimension_numbers = #tpu.dot_dimension_numbers<[1], [0], [0], [1], [0, 0, 1, 1], [], []>} : vector<1x16xf32>, vector<16x256xf32>, vector<1x256xf32> -> vector<1x256xf32>
    %106 = vector.broadcast %103 : vector<1x256xf32> to vector<32x256xf32>
    %107 = arith.mulf %80, %106 : vector<32x256xf32>
    %108 = vector.broadcast %105 : vector<1x256xf32> to vector<32x256xf32>
    %109 = arith.addf %107, %108 : vector<32x256xf32>
    %cst_97 = arith.constant 0.000000e+00 : f32
    %110 = vector.broadcast %cst_97 : f32 to vector<32x256xf32>
    %111 = arith.maximumf %109, %110 : vector<32x256xf32>
    %112 = arith.truncf %111 : vector<32x256xf32> to vector<32x256xbf16>
    %c0_98 = arith.constant 0 : index
    %c0_99 = arith.constant 0 : index
    %c0_100 = arith.constant 0 : index
    %113 = vector.load %arg16[%c0_98, %c0_99, %c0_100] : memref<4x256x256xbf16, #tpu.memory_space<vmem>>, vector<1x256x256xbf16>
    %114 = vector.shape_cast %113 : vector<1x256x256xbf16> to vector<256x256xbf16>
    %cst_101 = arith.constant dense<0.000000e+00> : vector<32x256xf32>
    %115 = tpu.matmul %112, %114, %cst_101 {dimension_numbers = #tpu.dot_dimension_numbers<[1], [0], [0], [1], [0, 0, 1, 1], [], []>} : vector<32x256xbf16>, vector<256x256xbf16>, vector<32x256xf32> -> vector<32x256xf32>
    %c0_102 = arith.constant 0 : index
    %c0_103 = arith.constant 0 : index
    %116 = vector.load %arg24[%c0_102, %c0_103] : memref<128x256xf32, #tpu.memory_space<vmem>>, vector<32x256xf32>
    tpu.vector_store %arg24[%c0_102, %c0_103], %115 {strides = array<i32>} : memref<128x256xf32, #tpu.memory_space<vmem>>, vector<32x256xf32>,
    %c1_104 = arith.constant 1 : index
    %c0_105 = arith.constant 0 : index
    %c0_106 = arith.constant 0 : index
    %117 = vector.load %arg16[%c1_104, %c0_105, %c0_106] : memref<4x256x256xbf16, #tpu.memory_space<vmem>>, vector<1x256x256xbf16>
    %118 = vector.shape_cast %117 : vector<1x256x256xbf16> to vector<256x256xbf16>
    %cst_107 = arith.constant dense<0.000000e+00> : vector<32x256xf32>
    %119 = tpu.matmul %112, %118, %cst_107 {dimension_numbers = #tpu.dot_dimension_numbers<[1], [0], [0], [1], [0, 0, 1, 1], [], []>} : vector<32x256xbf16>, vector<256x256xbf16>, vector<32x256xf32> -> vector<32x256xf32>
    %c32_108 = arith.constant 32 : index
    %c0_109 = arith.constant 0 : index
    %120 = vector.load %arg24[%c32_108, %c0_109] : memref<128x256xf32, #tpu.memory_space<vmem>>, vector<32x256xf32>
    tpu.vector_store %arg24[%c32_108, %c0_109], %119 {strides = array<i32>} : memref<128x256xf32, #tpu.memory_space<vmem>>, vector<32x256xf32>,
    %c2_110 = arith.constant 2 : index
    %c0_111 = arith.constant 0 : index
    %c0_112 = arith.constant 0 : index
    %121 = vector.load %arg16[%c2_110, %c0_111, %c0_112] : memref<4x256x256xbf16, #tpu.memory_space<vmem>>, vector<1x256x256xbf16>
    %122 = vector.shape_cast %121 : vector<1x256x256xbf16> to vector<256x256xbf16>
    %cst_113 = arith.constant dense<0.000000e+00> : vector<32x256xf32>
    %123 = tpu.matmul %112, %122, %cst_113 {dimension_numbers = #tpu.dot_dimension_numbers<[1], [0], [0], [1], [0, 0, 1, 1], [], []>} : vector<32x256xbf16>, vector<256x256xbf16>, vector<32x256xf32> -> vector<32x256xf32>
    %c64 = arith.constant 64 : index
    %c0_114 = arith.constant 0 : index
    %124 = vector.load %arg24[%c64, %c0_114] : memref<128x256xf32, #tpu.memory_space<vmem>>, vector<32x256xf32>
    tpu.vector_store %arg24[%c64, %c0_114], %123 {strides = array<i32>} : memref<128x256xf32, #tpu.memory_space<vmem>>, vector<32x256xf32>,
    %c3_115 = arith.constant 3 : index
    %c0_116 = arith.constant 0 : index
    %c0_117 = arith.constant 0 : index
    %125 = vector.load %arg16[%c3_115, %c0_116, %c0_117] : memref<4x256x256xbf16, #tpu.memory_space<vmem>>, vector<1x256x256xbf16>
    %126 = vector.shape_cast %125 : vector<1x256x256xbf16> to vector<256x256xbf16>
    %cst_118 = arith.constant dense<0.000000e+00> : vector<32x256xf32>
    %127 = tpu.matmul %112, %126, %cst_118 {dimension_numbers = #tpu.dot_dimension_numbers<[1], [0], [0], [1], [0, 0, 1, 1], [], []>} : vector<32x256xbf16>, vector<256x256xbf16>, vector<32x256xf32> -> vector<32x256xf32>
    %c96 = arith.constant 96 : index
    %c0_119 = arith.constant 0 : index
    %128 = vector.load %arg24[%c96, %c0_119] : memref<128x256xf32, #tpu.memory_space<vmem>>, vector<32x256xf32>
    tpu.vector_store %arg24[%c96, %c0_119], %127 {strides = array<i32>} : memref<128x256xf32, #tpu.memory_space<vmem>>, vector<32x256xf32>,
    %c0_120 = arith.constant 0 : index
    %c0_121 = arith.constant 0 : index
    %129 = vector.load %arg24[%c0_120, %c0_121] : memref<128x256xf32, #tpu.memory_space<vmem>>, vector<128x256xf32>
    %130 = arith.truncf %129 : vector<128x256xf32> to vector<128x256xbf16>
    %c0_122 = arith.constant 0 : index
    %c0_123 = arith.constant 0 : index
    %131 = vector.load %arg15[%c0_122, %c0_123] : memref<64x128xbf16, #tpu.memory_space<vmem>>, vector<64x128xbf16>
    %cst_124 = arith.constant dense<0.000000e+00> : vector<64x256xf32>
    %132 = tpu.matmul %131, %130, %cst_124 {dimension_numbers = #tpu.dot_dimension_numbers<[1], [0], [0], [1], [0, 0, 1, 1], [], []>} : vector<64x128xbf16>, vector<128x256xbf16>, vector<64x256xf32> -> vector<64x256xf32>
    %cst_125 = arith.constant dense<0.000000e+00> : vector<256xf32>
    %133 = vector.multi_reduction <add>, %132, %cst_125 [0] : vector<64x256xf32> to vector<256xf32>
    %134 = vector.shape_cast %133 : vector<256xf32> to vector<1x256xf32>
    %135 = arith.mulf %132, %132 : vector<64x256xf32>
    %cst_126 = arith.constant dense<0.000000e+00> : vector<256xf32>
    %136 = vector.multi_reduction <add>, %135, %cst_126 [0] : vector<64x256xf32> to vector<256xf32>
    %137 = vector.shape_cast %136 : vector<256xf32> to vector<1x256xf32>
    %c0_127 = arith.constant 0 : index
    %c0_128 = arith.constant 0 : index
    %138 = vector.load %arg17[%c0_127, %c0_128] : memref<256x8xf32, #tpu.memory_space<vmem>>, vector<256x8xf32>
    %cst_129 = arith.constant dense<0.000000e+00> : vector<1x8xf32>
    %139 = tpu.matmul %134, %138, %cst_129 {dimension_numbers = #tpu.dot_dimension_numbers<[1], [0], [0], [1], [0, 0, 1, 1], [], []>} : vector<1x256xf32>, vector<256x8xf32>, vector<1x8xf32> -> vector<1x8xf32>
    %c0_130 = arith.constant 0 : index
    %c0_131 = arith.constant 0 : index
    %140 = vector.load %arg17[%c0_130, %c0_131] : memref<256x8xf32, #tpu.memory_space<vmem>>, vector<256x8xf32>
    %cst_132 = arith.constant dense<0.000000e+00> : vector<1x8xf32>
    %141 = tpu.matmul %137, %140, %cst_132 {dimension_numbers = #tpu.dot_dimension_numbers<[1], [0], [0], [1], [0, 0, 1, 1], [], []>} : vector<1x256xf32>, vector<256x8xf32>, vector<1x8xf32> -> vector<1x8xf32>
    %142 = arith.mulf %139, %139 : vector<1x8xf32>
    %143 = arith.subf %141, %142 : vector<1x8xf32>
    %cst_133 = arith.constant 0.000000e+00 : f32
    %144 = vector.broadcast %cst_133 : f32 to vector<1x8xf32>
    %145 = arith.maximumf %143, %144 : vector<1x8xf32>
    %c0_134 = arith.constant 0 : index
    %c0_135 = arith.constant 0 : index
    %146 = vector.load %arg19[%c0_134, %c0_135] : memref<1x8xf32, #tpu.memory_space<vmem>>, vector<1x8xf32>
    %cst_136 = arith.constant 9.99999974E-6 : f32
    %147 = vector.broadcast %cst_136 : f32 to vector<1x8xf32>
    %148 = arith.addf %145, %147 : vector<1x8xf32>
    %149 = math.rsqrt %148 : vector<1x8xf32>
    %150 = arith.mulf %146, %149 : vector<1x8xf32>
    %c0_137 = arith.constant 0 : index
    %c0_138 = arith.constant 0 : index
    %151 = vector.load %arg20[%c0_137, %c0_138] : memref<1x8xf32, #tpu.memory_space<vmem>>, vector<1x8xf32>
    %152 = arith.mulf %139, %150 : vector<1x8xf32>
    %153 = arith.subf %151, %152 : vector<1x8xf32>
    %c0_139 = arith.constant 0 : index
    %c0_140 = arith.constant 0 : index
    %154 = vector.load %arg18[%c0_139, %c0_140] : memref<8x256xf32, #tpu.memory_space<vmem>>, vector<8x256xf32>
    %cst_141 = arith.constant dense<0.000000e+00> : vector<1x256xf32>
    %155 = tpu.matmul %150, %154, %cst_141 {dimension_numbers = #tpu.dot_dimension_numbers<[1], [0], [0], [1], [0, 0, 1, 1], [], []>} : vector<1x8xf32>, vector<8x256xf32>, vector<1x256xf32> -> vector<1x256xf32>
    %c0_142 = arith.constant 0 : index
    %c0_143 = arith.constant 0 : index
    %156 = vector.load %arg18[%c0_142, %c0_143] : memref<8x256xf32, #tpu.memory_space<vmem>>, vector<8x256xf32>
    %cst_144 = arith.constant dense<0.000000e+00> : vector<1x256xf32>
    %157 = tpu.matmul %153, %156, %cst_144 {dimension_numbers = #tpu.dot_dimension_numbers<[1], [0], [0], [1], [0, 0, 1, 1], [], []>} : vector<1x8xf32>, vector<8x256xf32>, vector<1x256xf32> -> vector<1x256xf32>
    %158 = vector.broadcast %155 : vector<1x256xf32> to vector<64x256xf32>
    %159 = arith.mulf %132, %158 : vector<64x256xf32>
    %160 = vector.broadcast %157 : vector<1x256xf32> to vector<64x256xf32>
    %161 = arith.addf %159, %160 : vector<64x256xf32>
    %cst_145 = arith.constant 0.000000e+00 : f32
    %162 = vector.broadcast %cst_145 : f32 to vector<64x256xf32>
    %163 = arith.maximumf %161, %162 : vector<64x256xf32>
    %164 = arith.truncf %163 : vector<64x256xf32> to vector<64x256xbf16>
    %c0_146 = arith.constant 0 : index
    %c0_147 = arith.constant 0 : index
    %165 = vector.load %arg22[%c0_146, %c0_147] : memref<256x28xbf16, #tpu.memory_space<vmem>>, vector<256x28xbf16>
    %cst_148 = arith.constant dense<0.000000e+00> : vector<64x28xf32>
    %166 = tpu.matmul %164, %165, %cst_148 {dimension_numbers = #tpu.dot_dimension_numbers<[1], [0], [0], [1], [0, 0, 1, 1], [], []>} : vector<64x256xbf16>, vector<256x28xbf16>, vector<64x28xf32> -> vector<64x28xf32>
    %167 = arith.truncf %166 : vector<64x28xf32> to vector<64x28xbf16>
    %c0_149 = arith.constant 0 : index
    %c0_150 = arith.constant 0 : index
    %168 = vector.load %arg21[%c0_149, %c0_150] : memref<56x64xbf16, #tpu.memory_space<vmem>>, vector<56x64xbf16>
    %cst_151 = arith.constant dense<0.000000e+00> : vector<56x28xf32>
    %169 = tpu.matmul %168, %167, %cst_151 {dimension_numbers = #tpu.dot_dimension_numbers<[1], [0], [0], [1], [0, 0, 1, 1], [], []>} : vector<56x64xbf16>, vector<64x28xbf16>, vector<56x28xf32> -> vector<56x28xf32>
    %170 = math.tanh %169 : vector<56x28xf32>
    %c0_152 = arith.constant 0 : index
    %c0_153 = arith.constant 0 : index
    %171 = vector.load %arg23[%c0_152, %c0_153] : memref<56x28xf32, #tpu.memory_space<vmem>>, vector<56x28xf32>
    tpu.vector_store %arg23[%c0_152, %c0_153], %170 {strides = array<i32>} : memref<56x28xf32, #tpu.memory_space<vmem>>, vector<56x28xf32>,
    return
  }
}

</mosaic_0001>

<bundles_post_ra>
// kernel: generator_forward.1
= control target key start
LH: loop header
LB: loop body
LE: loop exit
PB: predicated region body
PF: predicated region fallthrough
CT: control target
= control target key end

     0   :  { %s8533_s0 = inlined_call_operand.vmem [shape: bf16[8,48], index: 0, kind: input, shape index: {}]   ;;  %s8534_s1 = inlined_call_operand.hbm [shape: bf16[48,256], index: 1, kind: input, shape index: {}]   ;;  %s8535_s2 = inlined_call_operand.vmem [shape: f32[1,256], index: 2, kind: input, shape index: {}]   ;;  %s8536_s3 = inlined_call_operand.hbm [shape: bf16[16,32], index: 3, kind: input, shape index: {}]   ;;  %s8537_s4 = inlined_call_operand.vmem [shape: bf16[4,256,256], index: 4, kind: input, shape index: {}]   ;;  %s8538_s5 = inlined_call_operand.vmem [shape: f32[256,32], index: 5, kind: input, shape index: {}]   ;;  %s8539_s6 = inlined_call_operand.vmem [shape: f32[32,256], index: 6, kind: input, shape index: {}]   ;;  %s8540_s7 = inlined_call_operand.hbm [shape: f32[1,32], index: 7, kind: input, shape index: {}]   ;;  %s8541_s8 = inlined_call_operand.hbm [shape: f32[1,32], index: 8, kind: input, shape index: {}]   ;;  %s8542_s9 = inlined_call_operand.hbm [shape: bf16[32,64], index: 9, kind: input, shape index: {}]   ;;  %s8543_s10 = inlined_call_operand.hbm [shape: bf16[4,256,256], index: 10, kind: input, shape index: {}]   ;;  %s8544_s11 = inlined_call_operand.vmem [shape: f32[256,16], index: 11, kind: input, shape index: {}]   ;;  %s8545_s12 = inlined_call_operand.vmem [shape: f32[16,256], index: 12, kind: input, shape index: {}]   ;;  %s8546_s13 = inlined_call_operand.hbm [shape: f32[1,16], index: 13, kind: input, shape index: {}]   ;;  %s8547_s14 = inlined_call_operand.hbm [shape: f32[1,16], index: 14, kind: input, shape index: {}]   ;;  %s8548_s15 = inlined_call_operand.hbm [shape: bf16[64,128], index: 15, kind: input, shape index: {}]   ;;  %s8549_s16 = inlined_call_operand.hbm [shape: bf16[4,256,256], index: 16, kind: input, shape index: {}]   ;;  %s8550_s17 = inlined_call_operand.vmem [shape: f32[256,8], index: 17, kind: input, shape index: {}]   ;;  %s8551_s18 = inlined_call_operand.hbm [shape: f32[8,256], index: 18, kind: input, shape index: {}]   ;;  %s8552_s19 = inlined_call_operand.vmem [shape: f32[1,8], index: 19, kind: input, shape index: {}]   ;;  %s8553_s20 = inlined_call_operand.vmem [shape: f32[1,8], index: 20, kind: input, shape index: {}]   ;;  %s8554_s21 = inlined_call_operand.hbm [shape: bf16[56,64], index: 21, kind: input, shape index: {}]   ;;  %s8555_s22 = inlined_call_operand.vmem [shape: bf16[256,28], index: 22, kind: input, shape index: {}]   ;;  %s8556_s23 = inlined_call_operand.hbm [shape: f32[56,28], index: 23, kind: output, shape index: {}]  }
   0x1   :  { %8564 = sst [smem:[#allocation32_spill]] %s8533_s0 }
   0x2   :  { %8565 = sst [smem:[#allocation33_spill]] %s8534_s1 }
   0x3   :  { %8566 = sst [smem:[#allocation34_spill]] %s8535_s2 }
   0x4   :  { %8567 = sst [smem:[#allocation35_spill]] %s8536_s3 }
   0x5   :  { %8568 = sst [smem:[#allocation36_spill]] %s8537_s4 }
   0x6   :  { %8569 = sst [smem:[#allocation37_spill]] %s8538_s5 }
   0x7   :  { %8570 = sst [smem:[#allocation38_spill]] %s8539_s6 }
   0x8   :  { %8571 = sst [smem:[#allocation39_spill]] %s8540_s7 }
   0x9   :  { %8572 = sst [smem:[#allocation40_spill]] %s8556_s23 }
   0xa   :  { %28 = vsyncpa [#allocation4], 0 }
   0xb   :  { %29 = vsyncpa [#allocation7], 0 }
   0xc   :  { %30 = vsyncpa [#allocation10], 0 }
   0xd   :  { %31 = vsyncpa [#allocation13], 0 }
   0xe   :  { %32 = vsyncpa [#allocation16], 0 }
   0xf   :  { %33 = vsyncpa [#allocation19], 0 }
  0x10   :  { %34 = vsyncpa [#allocation22], 0 }
  0x11   :  { %35 = vsyncpa [#allocation5], 0  ;;  %s7163_s4 = smov [#allocation6]   ;;  %s8573_s5 = sld [smem:[#allocation35_spill]] }
  0x12   :  { %s57_s30 = sshll.u32 %s7163_s4, 4  ;;  %s58_s30 = int_to_ptr.vmem [resolvable:$true] %s57_s30 }
  0x17   :  { %s6861_s1 = scalar_lea.hbm %s8573_s5, 128 }
  0x18   :  { %p6862_p0 = scmp.ne.s32.totalorder %s8573_s5, %s6861_s1  ;;  %p6865_p1 = scmp.lt.u32.totalorder %s6861_s1, %s8573_s5 }
  0x1a   :  { %p6867_p2 = pnand %p6865_p1, %p6862_p0 }
  0x1c   :  { %6870 = shalt.err (!%p6867_p2)
}
  0x1d   :  { %s6871_s7 = scalar_lea.vmem %s58_s30, 128  ;;  %p6876_p4 = scmp.lt.s32.totalorder %s58_s30, %s58_s30 }
  0x1e   :  { %p6872_p3 = scmp.ne.s32.totalorder %s58_s30, %s6871_s7  ;;  %p6877_p5 = scmp.lt.s32.totalorder %s6871_s7, %s6871_s7 }
  0x20   :  { %p6878_p6 = por %p6877_p5, %p6876_p4 }
  0x22   :  { %p6879_p7 = pnand %p6878_p6, %p6872_p3 }
  0x24   :  { %6882 = shalt.err (!%p6879_p7)
}
  0x25   :  { %s7164_s28 = smov 64   ;;  %s7165_s29 = smov 4  }
  0x26   :  { %63 = dma.hbm_to_vmem [thread:$0]  %s8573_s5, 128, %s58_s30, [#allocation7], %s7164_s28, %s7164_s28, %s7165_s29  }
  0x27   :  { %s7166_s4 = smov [#allocation9]   ;;  %s6883_s26 = scalar_lea.hbm %s8541_s8, 16 }
  0x28   :  { %s86_s24 = sshll.u32 %s7166_s4, 4  ;;  %p6884_p8 = scmp.ne.s32.totalorder %s8541_s8, %s6883_s26  ;;  %s87_s24 = int_to_ptr.vmem [resolvable:$true] %s86_s24 }
  0x29   :  { %p6887_p9 = scmp.lt.u32.totalorder %s6883_s26, %s8541_s8 }
  0x2b   :  { %p6889_p10 = pnand %p6887_p9, %p6884_p8 }
  0x2d   :  { %6892 = shalt.err (!%p6889_p10)
}
  0x2e   :  { %s6893_s23 = scalar_lea.vmem %s87_s24, 16  ;;  %s6897_s30 = scalar_lea.vmem %s87_s24, 32 }
  0x2f   :  { %p6894_p11 = scmp.ne.s32.totalorder %s87_s24, %s6893_s23  ;;  %p6898_p12 = scmp.lt.s32.totalorder %s87_s24, %s87_s24 }
  0x30   :  { %p6899_p13 = scmp.lt.s32.totalorder %s6897_s30, %s6893_s23 }
  0x32   :  { %p6900_p0 = por %p6899_p13, %p6898_p12 }
  0x34   :  { %p6901_p1 = pnand %p6900_p0, %p6894_p11 }
  0x36   :  { %6904 = shalt.err (!%p6901_p1)
}
  0x37   :  { %89 = dma.hbm_to_vmem [thread:$0]  %s8541_s8, 16, %s87_s24, [#allocation10]  }
  0x38   :  { %s7167_s0 = smov [#allocation12]   ;;  %s7168_s25 = smov [#allocation15]  }
  0x39   :  { %s107_s4 = sshll.u32 %s7167_s0, 4  ;;  %s134_s1 = sshll.u32 %s7168_s25, 4  ;;  %s108_s4 = int_to_ptr.vmem [resolvable:$true] %s107_s4  ;;  %s7329_s1 = int_to_ptr.vmem [resolvable:$true] %s134_s1 }
  0x3a   :  { %s6905_s6 = scalar_lea.hbm %s8543_s10, 16384 }
  0x3b   :  { %p6906_p2 = scmp.ne.s32.totalorder %s8543_s10, %s6905_s6  ;;  %p6909_p3 = scmp.lt.u32.totalorder %s6905_s6, %s8543_s10 }
  0x3d   :  { %p6911_p4 = pnand %p6909_p3, %p6906_p2 }
  0x3f   :  { %6914 = shalt.err (!%p6911_p4)
}
  0x40   :  { %s6915_s8 = scalar_lea.vmem %s108_s4, 16384  ;;  %p6920_p6 = scmp.lt.s32.totalorder %s108_s4, %s108_s4 }
  0x41   :  { %p6916_p5 = scmp.ne.s32.totalorder %s108_s4, %s6915_s8  ;;  %p6921_p7 = scmp.lt.s32.totalorder %s6915_s8, %s6915_s8 }
  0x43   :  { %p6922_p8 = por %p6921_p7, %p6920_p6 }
  0x45   :  { %p6923_p9 = pnand %p6922_p8, %p6916_p5 }
  0x47   :  { %6926 = shalt.err (!%p6923_p9)
}
  0x48   :  { %s7169_s24 = smov 128   ;;  %s7170_s5 = smov 8  }
  0x49   :  { %113 = dma.hbm_to_vmem [thread:$0]  %s8543_s10, 16384, %s108_s4, [#allocation13], %s7169_s24, %s7169_s24, %s7170_s5  }
  0x4a   :  { %s6927_s2 = scalar_lea.hbm %s8547_s14, 16 }
  0x4b   :  { %p6928_p10 = scmp.ne.s32.totalorder %s8547_s14, %s6927_s2  ;;  %p6931_p11 = scmp.lt.u32.totalorder %s6927_s2, %s8547_s14 }
  0x4d   :  { %p6933_p12 = pnand %p6931_p11, %p6928_p10 }
  0x4f   :  { %6936 = shalt.err (!%p6933_p12)
}
  0x50   :  { %s6937_s30 = scalar_lea.vmem %s7329_s1, 16  ;;  %s6941_s10 = scalar_lea.vmem %s7329_s1, 32 }
  0x51   :  { %p6938_p13 = scmp.ne.s32.totalorder %s7329_s1, %s6937_s30  ;;  %p6942_p0 = scmp.lt.s32.totalorder %s7329_s1, %s7329_s1 }
  0x52   :  { %p6943_p1 = scmp.lt.s32.totalorder %s6941_s10, %s6937_s30 }
  0x54   :  { %p6944_p2 = por %p6943_p1, %p6942_p0 }
  0x56   :  { %p6945_p3 = pnand %p6944_p2, %p6938_p13 }
  0x58   :  { %6948 = shalt.err (!%p6945_p3)
}
  0x59   :  { %137 = dma.hbm_to_vmem [thread:$0]  %s8547_s14, 16, %s7329_s1, [#allocation16]  }
  0x5a   :  { %s7171_s3 = smov [#allocation18]   ;;  %s7172_s25 = smov [#allocation3]  }
  0x5b   :  { %s155_s0 = sshll.u32 %s7171_s3, 4  ;;  %s43_s26 = sshll.u32 %s7172_s25, 4  ;;  %s156_s0 = int_to_ptr.vmem [resolvable:$true] %s155_s0  ;;  %s7364_s26 = int_to_ptr.vmem [resolvable:$true] %s43_s26 }
  0x5c   :  { %s6949_s27 = scalar_lea.hbm %s8549_s16, 16384 }
  0x5d   :  { %p6950_p4 = scmp.ne.s32.totalorder %s8549_s16, %s6949_s27  ;;  %p6953_p5 = scmp.lt.u32.totalorder %s6949_s27, %s8549_s16 }
  0x5f   :  { %p6955_p6 = pnand %p6953_p5, %p6950_p4 }
  0x61   :  { %6958 = shalt.err (!%p6955_p6)
}
  0x62   :  { %s6959_s14 = scalar_lea.vmem %s156_s0, 16384  ;;  %p6964_p8 = scmp.lt.s32.totalorder %s156_s0, %s156_s0 }
  0x63   :  { %p6960_p7 = scmp.ne.s32.totalorder %s156_s0, %s6959_s14  ;;  %p6965_p9 = scmp.lt.s32.totalorder %s6959_s14, %s6959_s14 }
  0x65   :  { %p6966_p10 = por %p6965_p9, %p6964_p8 }
  0x67   :  { %p6967_p11 = pnand %p6966_p10, %p6960_p7 }
  0x69   :  { %6970 = shalt.err (!%p6967_p11)
}
  0x6a   :  { %161 = dma.hbm_to_vmem [thread:$0]  %s8549_s16, 16384, %s156_s0, [#allocation19], %s7169_s24, %s7169_s24, %s7170_s5  }
  0x6b   :  { %s8574_s25 = sld [smem:[#allocation33_spill]] }
  0x71   :  { %s6971_s2 = scalar_lea.hbm %s8574_s25, 768 }
  0x72   :  { %p6972_p12 = scmp.ne.s32.totalorder %s8574_s25, %s6971_s2  ;;  %p6975_p13 = scmp.lt.u32.totalorder %s6971_s2, %s8574_s25 }
  0x74   :  { %p6977_p0 = pnand %p6975_p13, %p6972_p12 }
  0x76   :  { %6980 = shalt.err (!%p6977_p0)
}
  0x77   :  { %s6981_s30 = scalar_lea.vmem %s7364_s26, 768  ;;  %p6986_p2 = scmp.lt.s32.totalorder %s7364_s26, %s7364_s26 }
  0x78   :  { %p6982_p1 = scmp.ne.s32.totalorder %s7364_s26, %s6981_s30  ;;  %p6987_p3 = scmp.lt.s32.totalorder %s6981_s30, %s6981_s30 }
  0x7a   :  { %p6988_p4 = por %p6987_p3, %p6986_p2 }
  0x7c   :  { %p6989_p5 = pnand %p6988_p4, %p6982_p1 }
  0x7e   :  { %6992 = shalt.err (!%p6989_p5)
}
  0x7f   :  { %49 = dma.hbm_to_vmem [thread:$0]  %s8574_s25, 768, %s7364_s26, [#allocation4], %s7169_s24, %s7169_s24, %s7170_s5  }
  0x80   :  { %s7173_s10 = smov [#allocation8]   ;;  %s7174_s1 = smov [#allocation11]  }
  0x81   :  { %s76_s14 = sshll.u32 %s7173_s10, 4  ;;  %s95_s4 = sshll.u32 %s7174_s1, 4  ;;  %s77_s14 = int_to_ptr.vmem [resolvable:$true] %s76_s14  ;;  %s7401_s4 = int_to_ptr.vmem [resolvable:$true] %s95_s4 }
  0x82   :  { %s8575_s2 = sld [smem:[#allocation39_spill]] }
  0x88   :  { %s6993_s6 = scalar_lea.hbm %s8575_s2, 16 }
  0x89   :  { %p6994_p6 = scmp.ne.s32.totalorder %s8575_s2, %s6993_s6  ;;  %p6997_p7 = scmp.lt.u32.totalorder %s6993_s6, %s8575_s2 }
  0x8b   :  { %p6999_p8 = pnand %p6997_p7, %p6994_p6 }
  0x8d   :  { %7002 = shalt.err (!%p6999_p8)
}
  0x8e   :  { %s7003_s26 = scalar_lea.vmem %s77_s14, 16  ;;  %s7007_s25 = scalar_lea.vmem %s77_s14, 32 }
  0x8f   :  { %p7004_p9 = scmp.ne.s32.totalorder %s77_s14, %s7003_s26  ;;  %p7008_p10 = scmp.lt.s32.totalorder %s77_s14, %s77_s14 }
  0x90   :  { %p7009_p11 = scmp.lt.s32.totalorder %s7007_s25, %s7003_s26 }
  0x92   :  { %p7010_p12 = por %p7009_p11, %p7008_p10 }
  0x94   :  { %p7011_p13 = pnand %p7010_p12, %p7004_p9 }
  0x96   :  { %7014 = shalt.err (!%p7011_p13)
}
  0x97   :  { %79 = dma.hbm_to_vmem [thread:$0]  %s8575_s2, 16, %s77_s14, [#allocation7]  }
  0x98   :  { %s7015_s8 = scalar_lea.hbm %s8542_s9, 256 }
  0x99   :  { %p7016_p0 = scmp.ne.s32.totalorder %s8542_s9, %s7015_s8  ;;  %p7019_p1 = scmp.lt.u32.totalorder %s7015_s8, %s8542_s9 }
  0x9b   :  { %p7021_p2 = pnand %p7019_p1, %p7016_p0 }
  0x9d   :  { %7024 = shalt.err (!%p7021_p2)
}
  0x9e   :  { %s7025_s7 = scalar_lea.vmem %s7401_s4, 256  ;;  %p7030_p4 = scmp.lt.s32.totalorder %s7401_s4, %s7401_s4 }
  0x9f   :  { %p7026_p3 = scmp.ne.s32.totalorder %s7401_s4, %s7025_s7  ;;  %p7031_p5 = scmp.lt.s32.totalorder %s7025_s7, %s7025_s7 }
  0xa1   :  { %p7032_p6 = por %p7031_p5, %p7030_p4 }
  0xa3   :  { %p7033_p7 = pnand %p7032_p6, %p7026_p3 }
  0xa5   :  { %7036 = shalt.err (!%p7033_p7)
}
  0xa6   :  { %101 = dma.hbm_to_vmem [thread:$0]  %s8542_s9, 256, %s7401_s4, [#allocation10], %s7164_s28, %s7164_s28, %s7165_s29  }
  0xa7   :  { %s7175_s30 = smov [#allocation14]   ;;  %s7176_s25 = smov [#allocation17]  }
  0xa8   :  { %s124_s26 = sshll.u32 %s7175_s30, 4  ;;  %s143_s16 = sshll.u32 %s7176_s25, 4  ;;  %s125_s26 = int_to_ptr.vmem [resolvable:$true] %s124_s26  ;;  %s7435_s16 = int_to_ptr.vmem [resolvable:$true] %s143_s16 }
  0xa9   :  { %s7037_s1 = scalar_lea.hbm %s8546_s13, 16 }
  0xaa   :  { %p7038_p8 = scmp.ne.s32.totalorder %s8546_s13, %s7037_s1  ;;  %p7041_p9 = scmp.lt.u32.totalorder %s7037_s1, %s8546_s13 }
  0xac   :  { %p7043_p10 = pnand %p7041_p9, %p7038_p8 }
  0xae   :  { %7046 = shalt.err (!%p7043_p10)
}
  0xaf   :  { %s7047_s9 = scalar_lea.vmem %s125_s26, 16  ;;  %s7051_s4 = scalar_lea.vmem %s125_s26, 32 }
  0xb0   :  { %p7048_p11 = scmp.ne.s32.totalorder %s125_s26, %s7047_s9  ;;  %p7052_p12 = scmp.lt.s32.totalorder %s125_s26, %s125_s26 }
  0xb1   :  { %p7053_p13 = scmp.lt.s32.totalorder %s7051_s4, %s7047_s9 }
  0xb3   :  { %p7054_p0 = por %p7053_p13, %p7052_p12 }
  0xb5   :  { %p7055_p1 = pnand %p7054_p0, %p7048_p11 }
  0xb7   :  { %7058 = shalt.err (!%p7055_p1)
}
  0xb8   :  { %127 = dma.hbm_to_vmem [thread:$0]  %s8546_s13, 16, %s125_s26, [#allocation13]  }
  0xb9   :  { %s7059_s30 = scalar_lea.hbm %s8548_s15, 512 }
  0xba   :  { %p7060_p2 = scmp.ne.s32.totalorder %s8548_s15, %s7059_s30  ;;  %p7063_p3 = scmp.lt.u32.totalorder %s7059_s30, %s8548_s15 }
  0xbc   :  { %p7065_p4 = pnand %p7063_p3, %p7060_p2 }
  0xbe   :  { %7068 = shalt.err (!%p7065_p4)
}
  0xbf   :  { %s7069_s8 = scalar_lea.vmem %s7435_s16, 512  ;;  %p7074_p6 = scmp.lt.s32.totalorder %s7435_s16, %s7435_s16 }
  0xc0   :  { %p7070_p5 = scmp.ne.s32.totalorder %s7435_s16, %s7069_s8  ;;  %p7075_p7 = scmp.lt.s32.totalorder %s7069_s8, %s7069_s8 }
  0xc2   :  { %p7076_p8 = por %p7075_p7, %p7074_p6 }
  0xc4   :  { %p7077_p9 = pnand %p7076_p8, %p7070_p5 }
  0xc6   :  { %7080 = shalt.err (!%p7077_p9)
}
  0xc7   :  { %149 = dma.hbm_to_vmem [thread:$0]  %s8548_s15, 512, %s7435_s16, [#allocation16], %s7164_s28, %s7164_s28, %s7165_s29  }
  0xc8   :  { %s7177_s3 = smov [#allocation20]   ;;  %s7178_s27 = smov [#allocation21]  }
  0xc9   :  { %s170_s6 = sshll.u32 %s7177_s3, 4  ;;  %s183_s9 = sshll.u32 %s7178_s27, 4  ;;  %s171_s6 = int_to_ptr.vmem [resolvable:$true] %s170_s6  ;;  %s7469_s9 = int_to_ptr.vmem [resolvable:$true] %s183_s9 }
  0xca   :  { %s7081_s7 = scalar_lea.hbm %s8551_s18, 256 }
  0xcb   :  { %p7082_p10 = scmp.ne.s32.totalorder %s8551_s18, %s7081_s7  ;;  %p7085_p11 = scmp.lt.u32.totalorder %s7081_s7, %s8551_s18 }
  0xcd   :  { %p7087_p12 = pnand %p7085_p11, %p7082_p10 }
  0xcf   :  { %7090 = shalt.err (!%p7087_p12)
}
  0xd0   :  { %s7091_s15 = scalar_lea.vmem %s171_s6, 256  ;;  %p7096_p0 = scmp.lt.s32.totalorder %s171_s6, %s171_s6 }
  0xd1   :  { %p7092_p13 = scmp.ne.s32.totalorder %s171_s6, %s7091_s15  ;;  %p7097_p1 = scmp.lt.s32.totalorder %s7091_s15, %s7091_s15 }
  0xd3   :  { %p7098_p2 = por %p7097_p1, %p7096_p0 }
  0xd5   :  { %p7099_p3 = pnand %p7098_p2, %p7092_p13 }
  0xd7   :  { %7102 = shalt.err (!%p7099_p3)
}
  0xd8   :  { %173 = dma.hbm_to_vmem [thread:$0]  %s8551_s18, 256, %s171_s6, [#allocation19]  }
  0xd9   :  { %s7103_s8 = scalar_lea.hbm %s8554_s21, 448 }
  0xda   :  { %p7104_p4 = scmp.ne.s32.totalorder %s8554_s21, %s7103_s8  ;;  %p7107_p5 = scmp.lt.u32.totalorder %s7103_s8, %s8554_s21 }
  0xdc   :  { %p7109_p6 = pnand %p7107_p5, %p7104_p4 }
  0xde   :  { %7112 = shalt.err (!%p7109_p6)
}
  0xdf   :  { %s7113_s4 = scalar_lea.vmem %s7469_s9, 448  ;;  %p7118_p8 = scmp.lt.s32.totalorder %s7469_s9, %s7469_s9 }
  0xe0   :  { %p7114_p7 = scmp.ne.s32.totalorder %s7469_s9, %s7113_s4  ;;  %p7119_p9 = scmp.lt.s32.totalorder %s7113_s4, %s7113_s4 }
  0xe2   :  { %p7120_p10 = por %p7119_p9, %p7118_p8 }
  0xe4   :  { %p7121_p11 = pnand %p7120_p10, %p7114_p7 }
  0xe6   :  { %7124 = shalt.err (!%p7121_p11)
}
  0xe7   :  { %189 = dma.hbm_to_vmem [thread:$0]  %s8554_s21, 448, %s7469_s9, [#allocation22], %s7164_s28, %s7164_s28, %s7165_s29  }
  0xe8   :  { %7147 = dma.done.wait [#allocation4], 768  }
  0xe9   :  { %7148 = vsyncadd [#allocation4], 4294966528 }
  0xea   :  { %7149 = dma.done.wait [#allocation7], 144  }
  0xeb   :  { %7150 = vsyncadd [#allocation7], 4294967152 }
  0xec   :  { %7151 = dma.done.wait [#allocation10], 272  }
  0xed   :  { %7152 = vsyncadd [#allocation10], 4294967024 }
  0xee   :  { %7153 = dma.done.wait [#allocation13], 16400  }
  0xef   :  { %7154 = vsyncadd [#allocation13], 4294950896 }
  0xf0   :  { %7155 = dma.done.wait [#allocation16], 528  }
  0xf1   :  { %7156 = vsyncadd [#allocation16], 4294966768 }
  0xf2   :  { %7157 = dma.done.wait [#allocation19], 16640  }
  0xf3   :  { %7158 = vsyncadd [#allocation19], 4294950656 }
  0xf4   :  { %7159 = dma.done.wait [#allocation22], 448  }
  0xf5   :  { %7160 = vsyncadd [#allocation22], 4294966848  ;;  %v7179_v0 = vmov 0   ;;  %v6229_v1 = vld [vmem:[#allocation3 + $0x4] ss:$8 sps:$4 sm:$0xff]   ;;  %s8576_s29 = sld [smem:[#allocation36_spill]] }
  0xf6   :  { %314 = vmatprep.mubr.bf16.mxu0 %v7179_v0  ;;  %v6231_v2 = vld [vmem:[#allocation3] ss:$8 sps:$4 sm:$0xff]   ;;  %282 = vmatprep.subr.bf16.mxu0 %v6229_v1  ;;  %v6232_v3 = vld [vmem:[#allocation3 + $0x14] ss:$8 sps:$4 sm:$0xff]   ;;  %v6234_v4 = vld [vmem:[#allocation3 + $0x10] ss:$8 sps:$4 sm:$0xff]  }
  0xf7   :  { %283 = vmatpush1.bf16.msra.mxu0 %v6231_v2  ;;  %v6235_v5 = vld [vmem:[#allocation3 + $0x24] ss:$8 sps:$4 sm:$0xff]   ;;  %v6237_v7 = vld [vmem:[#allocation3 + $0x20] ss:$8 sps:$4 sm:$0xff]   ;;  %s8577_s16 = sld [smem:[#allocation32_spill]]  ;;  %vm278_vm0 = vcmask 392192  }
  0xf8   :  { %284 = vmatprep.subr.bf16.mxu0 %v6232_v3  ;;  %s8578_s14 = sld [smem:[#allocation34_spill]]  ;;  %s8579_s21 = sld [smem:[#allocation37_spill]]  ;;  %vm1289_vm1 = vcmask 261120   ;;  %vm2733_vm2 = vcmask 523264   ;;  %vm3023_vm3 = vcmask 130048   ;;  %vm4636_vm4 = vcmask 64512  }
  0xf9   :  { %s8580_s4 = sld [smem:[#allocation38_spill]]  ;;  %vm5162_vm5 = vcmask 228352  }
  0xfb   :  { %v6238_v6 = vld [vmem:[%s8576_s29 + $0x4] ss:$8 sps:$4 sm:$0xff]   ;;  %v6243_v8 = vld [vmem:[%s8576_s29] ss:$8 sps:$4 sm:$0xff]   ;;  %285 = vmatpush1.bf16.msra.mxu0 %v6234_v4  ;;  %v6244_v9 = vld [vmem:[%s8576_s29 + $0x14] ss:$8 sps:$4 sm:$0xff]  }
  0xfc   :  { %519 = vmatprep.subr.bf16.mxu1 %v6238_v6  ;;  %286 = vmatprep.subr.bf16.mxu0 %v6235_v5  ;;  %v6242_v10 = vld [vmem:[%s8576_s29 + $0x104] ss:$8 sps:$4 sm:$0xff]   ;;  %v6249_v12 = vld [vmem:[%s8576_s29 + $0x10] ss:$8 sps:$4 sm:$0xff]   ;;  %v6240_v14 = vld [vmem:[%s8576_s29 + $0x100] ss:$8 sps:$4 sm:$0xff]  }
  0xfd   :  { %520 = vmatpush1.bf16.msra.mxu1 %v6243_v8  ;;  %v229_v11 = vld [vmem:[%s8577_s16] sm:$0xf]  ;;  %v6250_v13 = vld [vmem:[%s8576_s29 + $0x24] ss:$8 sps:$4 sm:$0xff]   ;;  %v6248_v15 = vld [vmem:[%s8576_s29 + $0x114] ss:$8 sps:$4 sm:$0xff]  }
  0xfe   :  { %521 = vmatprep.subr.bf16.mxu1 %v6244_v9  ;;  %v6255_v16 = vld [vmem:[%s8576_s29 + $0x20] ss:$8 sps:$4 sm:$0xff]   ;;  %v6256_v17 = vld [vmem:[%s8576_s29 + $0x34] ss:$8 sps:$4 sm:$0xff]   ;;  %v6246_v18 = vld [vmem:[%s8576_s29 + $0x110] ss:$8 sps:$4 sm:$0xff]  }
  0xff   :  { %287 = vmatpush1.bf16.msra.mxu0 %v6237_v7  ;;  %v6254_v19 = vld [vmem:[%s8576_s29 + $0x124] ss:$8 sps:$4 sm:$0xff]   ;;  %v6261_v20 = vld [vmem:[%s8576_s29 + $0x30] ss:$8 sps:$4 sm:$0xff]   ;;  %v6252_v22 = vld [vmem:[%s8576_s29 + $0x120] ss:$8 sps:$4 sm:$0xff]  }
 0x100   :  { %755 = vmatprep.subr.bf16.mxu0 %v6242_v10  ;;  %v6262_v21 = vld [vmem:[%s8576_s29 + $0x44] ss:$8 sps:$4 sm:$0xff]   ;;  %v6260_v23 = vld [vmem:[%s8576_s29 + $0x134] ss:$8 sps:$4 sm:$0xff]   ;;  %v6267_v24 = vld [vmem:[%s8576_s29 + $0x40] ss:$8 sps:$4 sm:$0xff]  }
 0x101   :  { %522 = vmatpush1.bf16.msra.mxu1 %v6249_v12  ;;  %v6268_v25 = vld [vmem:[%s8576_s29 + $0x54] ss:$8 sps:$4 sm:$0xff]   ;;  %v6258_v26 = vld [vmem:[%s8576_s29 + $0x130] ss:$8 sps:$4 sm:$0xff]   ;;  %v6266_v27 = vld [vmem:[%s8576_s29 + $0x144] ss:$8 sps:$4 sm:$0xff]  }
 0x102   :  { %523 = vmatprep.subr.bf16.mxu1 %v6250_v13  ;;  %5199 = vmatmul.mubr.msk.bf16.vlgmr.msra.gmra.mrb[0].mxu0 %vm278_vm0, %v229_v11  ;;  %v6273_v28 = vld [vmem:[%s8576_s29 + $0x50] ss:$8 sps:$4 sm:$0xff]   ;;  %v6274_v29 = vld [vmem:[%s8576_s29 + $0x64] ss:$8 sps:$4 sm:$0xff]   ;;  %v6264_v30 = vld [vmem:[%s8576_s29 + $0x140] ss:$8 sps:$4 sm:$0xff]   ;;  %v238_v11 = vlaneseq }
 0x103   :  { %756 = vmatpush1.bf16.msra.mxu0 %v6240_v14  ;;  %v6272_v31 = vld [vmem:[%s8576_s29 + $0x154] ss:$8 sps:$4 sm:$0xff]   ;;  %v6279_v32 = vld [vmem:[%s8576_s29 + $0x60] ss:$8 sps:$4 sm:$0xff]   ;;  %v6270_v34 = vld [vmem:[%s8576_s29 + $0x150] ss:$8 sps:$4 sm:$0xff]  }
 0x104   :  { %757 = vmatprep.subr.bf16.mxu0 %v6248_v15  ;;  %v6280_v33 = vld [vmem:[%s8576_s29 + $0x74] ss:$8 sps:$4 sm:$0xff]   ;;  %v6278_v35 = vld [vmem:[%s8576_s29 + $0x164] ss:$8 sps:$4 sm:$0xff]   ;;  %v6285_v36 = vld [vmem:[%s8576_s29 + $0x70] ss:$8 sps:$4 sm:$0xff]  }
 0x105   :  { %524 = vmatpush1.bf16.msra.mxu1 %v6255_v16  ;;  %v6286_v37 = vld [vmem:[%s8576_s29 + $0x84] ss:$8 sps:$4 sm:$0xff]   ;;  %v6276_v38 = vld [vmem:[%s8576_s29 + $0x160] ss:$8 sps:$4 sm:$0xff]   ;;  %v6284_v39 = vld [vmem:[%s8576_s29 + $0x174] ss:$8 sps:$4 sm:$0xff]  }
 0x106   :  { %525 = vmatprep.subr.bf16.mxu1 %v6256_v17  ;;  %v6291_v40 = vld [vmem:[%s8576_s29 + $0x80] ss:$8 sps:$4 sm:$0xff]   ;;  %v6292_v41 = vld [vmem:[%s8576_s29 + $0x94] ss:$8 sps:$4 sm:$0xff]   ;;  %v6282_v42 = vld [vmem:[%s8576_s29 + $0x170] ss:$8 sps:$4 sm:$0xff]  }
 0x107   :  { %758 = vmatpush1.bf16.msra.mxu0 %v6246_v18  ;;  %v6290_v43 = vld [vmem:[%s8576_s29 + $0x184] ss:$8 sps:$4 sm:$0xff]   ;;  %v6297_v44 = vld [vmem:[%s8576_s29 + $0x90] ss:$8 sps:$4 sm:$0xff]   ;;  %v6288_v45 = vld [vmem:[%s8576_s29 + $0x180] ss:$8 sps:$4 sm:$0xff]  }
 0x108   :  { %759 = vmatprep.subr.bf16.mxu0 %v6254_v19  ;;  %v6298_v46 = vld [vmem:[%s8576_s29 + $0xa4] ss:$8 sps:$4 sm:$0xff]   ;;  %v6296_v47 = vld [vmem:[%s8576_s29 + $0x194] ss:$8 sps:$4 sm:$0xff]   ;;  %v6303_v48 = vld [vmem:[%s8576_s29 + $0xa0] ss:$8 sps:$4 sm:$0xff]  }
 0x109   :  { %526 = vmatpush1.bf16.msra.mxu1 %v6261_v20  ;;  %v6304_v49 = vld [vmem:[%s8576_s29 + $0xb4] ss:$8 sps:$4 sm:$0xff]   ;;  %v6294_v50 = vld [vmem:[%s8576_s29 + $0x190] ss:$8 sps:$4 sm:$0xff]   ;;  %v6302_v51 = vld [vmem:[%s8576_s29 + $0x1a4] ss:$8 sps:$4 sm:$0xff]  }
 0x10a   :  { %527 = vmatprep.subr.bf16.mxu1 %v6262_v21  ;;  %v6309_v52 = vld [vmem:[%s8576_s29 + $0xb0] ss:$8 sps:$4 sm:$0xff]   ;;  %v6310_v53 = vld [vmem:[%s8576_s29 + $0xc4] ss:$8 sps:$4 sm:$0xff]   ;;  %v6300_v54 = vld [vmem:[%s8576_s29 + $0x1a0] ss:$8 sps:$4 sm:$0xff]  }
 0x10b   :  { %760 = vmatpush1.bf16.msra.mxu0 %v6252_v22  ;;  %v6308_v55 = vld [vmem:[%s8576_s29 + $0x1b4] ss:$8 sps:$4 sm:$0xff]   ;;  %v6315_v56 = vld [vmem:[%s8576_s29 + $0xc0] ss:$8 sps:$4 sm:$0xff]   ;;  %v6306_v58 = vld [vmem:[%s8576_s29 + $0x1b0] ss:$8 sps:$4 sm:$0xff]  }
 0x10c   :  { %761 = vmatprep.subr.bf16.mxu0 %v6260_v23  ;;  %v6316_v57 = vld [vmem:[%s8576_s29 + $0xd4] ss:$8 sps:$4 sm:$0xff]   ;;  %v6314_v59 = vld [vmem:[%s8576_s29 + $0x1c4] ss:$8 sps:$4 sm:$0xff]   ;;  %v6321_v60 = vld [vmem:[%s8576_s29 + $0xd0] ss:$8 sps:$4 sm:$0xff]  }
 0x10d   :  { %528 = vmatpush1.bf16.msra.mxu1 %v6267_v24  ;;  %v6312_v61 = vld [vmem:[%s8576_s29 + $0x1c0] ss:$8 sps:$4 sm:$0xff]   ;;  %v6320_v62 = vld [vmem:[%s8576_s29 + $0x1d4] ss:$8 sps:$4 sm:$0xff]   ;;  %v6318_v63 = vld [vmem:[%s8576_s29 + $0x1d0] ss:$8 sps:$4 sm:$0xff]  }
 0x10e   :  { %529 = vmatprep.subr.bf16.mxu1 %v6268_v25  ;;  %v6322_v1 = vld [vmem:[%s8576_s29 + $0xe4] ss:$8 sps:$4 sm:$0xff]   ;;  %v6324_v3 = vld [vmem:[%s8576_s29 + $0x1e0] ss:$8 sps:$4 sm:$0xff]   ;;  %v6328_v5 = vld [vmem:[%s8576_s29 + $0xf4] ss:$8 sps:$4 sm:$0xff]  }
 0x10f   :  { %762 = vmatpush1.bf16.msra.mxu0 %v6258_v26  ;;  %v6326_v2 = vld [vmem:[%s8576_s29 + $0x1e4] ss:$8 sps:$4 sm:$0xff]   ;;  %v6327_v4 = vld [vmem:[%s8576_s29 + $0xe0] ss:$8 sps:$4 sm:$0xff]   ;;  %v6332_v6 = vld [vmem:[%s8576_s29 + $0x1f4] ss:$8 sps:$4 sm:$0xff]  }
 0x110   :  { %763 = vmatprep.subr.bf16.mxu0 %v6266_v27  ;;  %v6330_v7 = vld [vmem:[%s8576_s29 + $0x1f0] ss:$8 sps:$4 sm:$0xff]   ;;  %v6336_v9 = vld [vmem:[%s8576_s29 + $0x204] ss:$8 sps:$4 sm:$0xff]   ;;  %v239_v12 = vshrl.u32 %v238_v11, 7 }
 0x111   :  { %530 = vmatpush1.bf16.msra.mxu1 %v6273_v28  ;;  %v6333_v8 = vld [vmem:[%s8576_s29 + $0xf0] ss:$8 sps:$4 sm:$0xff]   ;;  %v6339_v10 = vld [vmem:[%s8576_s29 + $0x304] ss:$8 sps:$4 sm:$0xff]   ;;  %v236_v14 = vld [vmem:[%s8578_s14] sm:$0x3] }
 0x112   :  { %531 = vmatprep.subr.bf16.mxu1 %v6274_v29  ;;  %v7705_v13 = vsub.s32 0, %v239_v12  ;;  %v244_v15 = vsub.s32 1, %v239_v12  ;;  %v6334_v27 = vld [vmem:[%s8576_s29 + $0x200] ss:$8 sps:$4 sm:$0xff]   ;;  %v6408_v11 = vld [vmem:[%s8576_s29 + $0x2c4] ss:$8 sps:$4 sm:$0xff]  }
 0x113   :  { %764 = vmatpush1.bf16.msra.mxu0 %v6264_v30  ;;  %v6337_v28 = vld [vmem:[%s8576_s29 + $0x300] ss:$8 sps:$4 sm:$0xff]   ;;  %v6342_v30 = vld [vmem:[%s8576_s29 + $0x214] ss:$8 sps:$4 sm:$0xff]   ;;  %v6411_v12 = vld [vmem:[%s8576_s29 + $0x3c4] ss:$8 sps:$4 sm:$0xff]  }
 0x114   :  { %765 = vmatprep.subr.bf16.mxu0 %v6272_v31  ;;  %v241_v16 = vrot.slane %v236_v14, %v7705_v13  ;;  %v245_v17 = vrot.slane %v236_v14, %v244_v15  ;;  %v6345_v31 = vld [vmem:[%s8576_s29 + $0x314] ss:$8 sps:$4 sm:$0xff]   ;;  %v6406_v14 = vld [vmem:[%s8576_s29 + $0x2c0] ss:$8 sps:$4 sm:$0xff]  }
 0x115   :  { %532 = vmatpush1.bf16.msra.mxu1 %v6279_v32  ;;  %v6340_v32 = vld [vmem:[%s8576_s29 + $0x210] ss:$8 sps:$4 sm:$0xff]   ;;  %v6409_v15 = vld [vmem:[%s8576_s29 + $0x3c0] ss:$8 sps:$4 sm:$0xff]  }
 0x116   :  { %533 = vmatprep.subr.bf16.mxu1 %v6280_v33  ;;  %v6343_v33 = vld [vmem:[%s8576_s29 + $0x310] ss:$8 sps:$4 sm:$0xff]  }
 0x117   :  { %766 = vmatpush1.bf16.msra.mxu0 %v6270_v34  ;;  %v6348_v34 = vld [vmem:[%s8576_s29 + $0x224] ss:$8 sps:$4 sm:$0xff]  }
 0x118   :  { %767 = vmatprep.subr.bf16.mxu0 %v6278_v35  ;;  %v6351_v35 = vld [vmem:[%s8576_s29 + $0x324] ss:$8 sps:$4 sm:$0xff]  }
 0x119   :  { %534 = vmatpush1.bf16.msra.mxu1 %v6285_v36  ;;  %v6346_v36 = vld [vmem:[%s8576_s29 + $0x220] ss:$8 sps:$4 sm:$0xff]  }
 0x11a   :  { %535 = vmatprep.subr.bf16.mxu1 %v6286_v37  ;;  %v6349_v37 = vld [vmem:[%s8576_s29 + $0x320] ss:$8 sps:$4 sm:$0xff]  }
 0x11b   :  { %768 = vmatpush1.bf16.msra.mxu0 %v6276_v38  ;;  %v6354_v38 = vld [vmem:[%s8576_s29 + $0x234] ss:$8 sps:$4 sm:$0xff]  }
 0x11c   :  { %769 = vmatprep.subr.bf16.mxu0 %v6284_v39  ;;  %v6357_v39 = vld [vmem:[%s8576_s29 + $0x334] ss:$8 sps:$4 sm:$0xff]  }
 0x11d   :  { %536 = vmatpush1.bf16.msra.mxu1 %v6291_v40  ;;  %v6352_v40 = vld [vmem:[%s8576_s29 + $0x230] ss:$8 sps:$4 sm:$0xff]  }
 0x11e   :  { %537 = vmatprep.subr.bf16.mxu1 %v6292_v41  ;;  %v6355_v41 = vld [vmem:[%s8576_s29 + $0x330] ss:$8 sps:$4 sm:$0xff]  }
 0x11f   :  { %770 = vmatpush1.bf16.msra.mxu0 %v6282_v42  ;;  %v6360_v42 = vld [vmem:[%s8576_s29 + $0x244] ss:$8 sps:$4 sm:$0xff]  }
 0x120   :  { %771 = vmatprep.subr.bf16.mxu0 %v6290_v43  ;;  %v6363_v43 = vld [vmem:[%s8576_s29 + $0x344] ss:$8 sps:$4 sm:$0xff]  }
 0x121   :  { %538 = vmatpush1.bf16.msra.mxu1 %v6297_v44  ;;  %v6358_v44 = vld [vmem:[%s8576_s29 + $0x240] ss:$8 sps:$4 sm:$0xff]  }
 0x122   :  { %539 = vmatprep.subr.bf16.mxu1 %v6298_v46  ;;  %v6366_v46 = vld [vmem:[%s8576_s29 + $0x254] ss:$8 sps:$4 sm:$0xff]  }
 0x123   :  { %772 = vmatpush1.bf16.msra.mxu0 %v6288_v45  ;;  %v6361_v45 = vld [vmem:[%s8576_s29 + $0x340] ss:$8 sps:$4 sm:$0xff]  }
 0x124   :  { %773 = vmatprep.subr.bf16.mxu0 %v6296_v47  ;;  %v6369_v47 = vld [vmem:[%s8576_s29 + $0x354] ss:$8 sps:$4 sm:$0xff]  }
 0x125   :  { %540 = vmatpush1.bf16.msra.mxu1 %v6303_v48  ;;  %v6364_v48 = vld [vmem:[%s8576_s29 + $0x250] ss:$8 sps:$4 sm:$0xff]  }
 0x126   :  { %541 = vmatprep.subr.bf16.mxu1 %v6304_v49  ;;  %v6367_v49 = vld [vmem:[%s8576_s29 + $0x350] ss:$8 sps:$4 sm:$0xff]  }
 0x127   :  { %774 = vmatpush1.bf16.msra.mxu0 %v6294_v50  ;;  %v6372_v50 = vld [vmem:[%s8576_s29 + $0x264] ss:$8 sps:$4 sm:$0xff]  }
 0x128   :  { %775 = vmatprep.subr.bf16.mxu0 %v6302_v51  ;;  %v6375_v51 = vld [vmem:[%s8576_s29 + $0x364] ss:$8 sps:$4 sm:$0xff]  }
 0x129   :  { %542 = vmatpush1.bf16.msra.mxu1 %v6309_v52  ;;  %v6370_v52 = vld [vmem:[%s8576_s29 + $0x260] ss:$8 sps:$4 sm:$0xff]  }
 0x12a   :  { %543 = vmatprep.subr.bf16.mxu1 %v6310_v53  ;;  %v6373_v53 = vld [vmem:[%s8576_s29 + $0x360] ss:$8 sps:$4 sm:$0xff]  }
 0x12b   :  { %776 = vmatpush1.bf16.msra.mxu0 %v6300_v54  ;;  %v6378_v54 = vld [vmem:[%s8576_s29 + $0x274] ss:$8 sps:$4 sm:$0xff]  }
 0x12c   :  { %777 = vmatprep.subr.bf16.mxu0 %v6308_v55  ;;  %v6381_v55 = vld [vmem:[%s8576_s29 + $0x374] ss:$8 sps:$4 sm:$0xff]  }
 0x12d   :  { %544 = vmatpush1.bf16.msra.mxu1 %v6315_v56  ;;  %v6376_v56 = vld [vmem:[%s8576_s29 + $0x270] ss:$8 sps:$4 sm:$0xff]  }
 0x12e   :  { %545 = vmatprep.subr.bf16.mxu1 %v6316_v57  ;;  %v6379_v57 = vld [vmem:[%s8576_s29 + $0x370] ss:$8 sps:$4 sm:$0xff]  }
 0x12f   :  { %778 = vmatpush1.bf16.msra.mxu0 %v6306_v58  ;;  %v6384_v58 = vld [vmem:[%s8576_s29 + $0x284] ss:$8 sps:$4 sm:$0xff]  }
 0x130   :  { %779 = vmatprep.subr.bf16.mxu0 %v6314_v59  ;;  %v6387_v59 = vld [vmem:[%s8576_s29 + $0x384] ss:$8 sps:$4 sm:$0xff]  }
 0x131   :  { %546 = vmatpush1.bf16.msra.mxu1 %v6321_v60  ;;  %v6382_v60 = vld [vmem:[%s8576_s29 + $0x280] ss:$8 sps:$4 sm:$0xff]  }
 0x132   :  { %547 = vmatprep.subr.bf16.mxu1 %v6322_v1  ;;  %v6388_v1 = vld [vmem:[%s8576_s29 + $0x290] ss:$8 sps:$4 sm:$0xff]  }
 0x133   :  { %780 = vmatpush1.bf16.msra.mxu0 %v6312_v61  ;;  %v6385_v61 = vld [vmem:[%s8576_s29 + $0x380] ss:$8 sps:$4 sm:$0xff]  }
 0x134   :  { %781 = vmatprep.subr.bf16.mxu0 %v6320_v62  ;;  %v6390_v62 = vld [vmem:[%s8576_s29 + $0x294] ss:$8 sps:$4 sm:$0xff]  }
 0x135   :  { %548 = vmatpush1.bf16.msra.mxu1 %v6327_v4  ;;  %v6399_v4 = vld [vmem:[%s8576_s29 + $0x3a4] ss:$8 sps:$4 sm:$0xff]  }
 0x136   :  { %549 = vmatprep.subr.bf16.mxu1 %v6328_v5  ;;  %v6394_v5 = vld [vmem:[%s8576_s29 + $0x2a0] ss:$8 sps:$4 sm:$0xff]  }
 0x137   :  { %782 = vmatpush1.bf16.msra.mxu0 %v6318_v63  ;;  %v6393_v63 = vld [vmem:[%s8576_s29 + $0x394] ss:$8 sps:$4 sm:$0xff]  }
 0x138   :  { %783 = vmatprep.subr.bf16.mxu0 %v6326_v2  ;;  %v6391_v2 = vld [vmem:[%s8576_s29 + $0x390] ss:$8 sps:$4 sm:$0xff]  }
 0x139   :  { %550 = vmatpush1.bf16.msra.mxu1 %v6333_v8  ;;  %v6405_v8 = vld [vmem:[%s8576_s29 + $0x3b4] ss:$8 sps:$4 sm:$0xff]  }
 0x13a   :  { %991 = vmatprep.subr.bf16.mxu1 %v6336_v9  ;;  %v6400_v9 = vld [vmem:[%s8576_s29 + $0x2b0] ss:$8 sps:$4 sm:$0xff]  }
 0x13b   :  { %784 = vmatpush1.bf16.msra.mxu0 %v6324_v3  ;;  %v6396_v3 = vld [vmem:[%s8576_s29 + $0x2a4] ss:$8 sps:$4 sm:$0xff]  }
 0x13c   :  { %785 = vmatprep.subr.bf16.mxu0 %v6332_v6  ;;  %v6397_v6 = vld [vmem:[%s8576_s29 + $0x3a0] ss:$8 sps:$4 sm:$0xff]  }
 0x13f   :  { %786 = vmatpush1.bf16.msra.mxu0 %v6330_v7  ;;  %v6402_v7 = vld [vmem:[%s8576_s29 + $0x2b4] ss:$8 sps:$4 sm:$0xff]  }
 0x140   :  { %1227 = vmatprep.subr.bf16.mxu0 %v6339_v10  ;;  %v6403_v10 = vld [vmem:[%s8576_s29 + $0x3b0] ss:$8 sps:$4 sm:$0xff]  }
 0x1d5   :  { %v316_v18 = vpop.f32.mrb[0].mxu0 }
 0x1d6   :  { %v317_v19 = vadd.f32 %v316_v18, %v241_v16  ;;  %v318_v20 = vpop.f32.mrb[1].mxu0  ;;  %v6414_v16 = vld [vmem:[%s8576_s29 + $0x2d4] ss:$8 sps:$4 sm:$0xff]   ;;  %v6412_v18 = vld [vmem:[%s8576_s29 + $0x2d0] ss:$8 sps:$4 sm:$0xff]  }
 0x1d7   :  { %v319_v21 = vadd.f32 %v318_v20, %v245_v17  ;;  %v320_v22 = vpop.f32.mrb[2].mxu0  ;;  %v6417_v17 = vld [vmem:[%s8576_s29 + $0x3d4] ss:$8 sps:$4 sm:$0xff]   ;;  %v6420_v20 = vld [vmem:[%s8576_s29 + $0x2e4] ss:$8 sps:$4 sm:$0xff]  }
 0x1d8   :  { %v323_v23 = vmax.f32 %v317_v19, 0.0  ;;  %v321_v24 = vpop.f32.mrb[3].mxu0  ;;  %v6415_v19 = vld [vmem:[%s8576_s29 + $0x3d0] ss:$8 sps:$4 sm:$0xff]   ;;  %v6418_v22 = vld [vmem:[%s8576_s29 + $0x2e0] ss:$8 sps:$4 sm:$0xff]  }
 0x1d9   :  { %v324_v25 = vmax.f32 %v319_v21, 0.0  ;;  %v6423_v21 = vld [vmem:[%s8576_s29 + $0x3e4] ss:$8 sps:$4 sm:$0xff]   ;;  %v6426_v24 = vld [vmem:[%s8576_s29 + $0x2f4] ss:$8 sps:$4 sm:$0xff]  }
 0x1da   :  { %v7717_v29 = vpack.c.bf16 %v323_v23, %v323_v23  ;;  %v6421_v23 = vld [vmem:[%s8576_s29 + $0x3e0] ss:$8 sps:$4 sm:$0xff]  }
 0x1db   :  { %v326_v26 = vpack.c.bf16 %v324_v25, %v324_v25  ;;  %v6429_v25 = vld [vmem:[%s8576_s29 + $0x3f4] ss:$8 sps:$4 sm:$0xff]  }
 0x1dd   :  { %551 = vmatprep.mubr.bf16.mxu1 %v326_v26  ;;  %787 = vmatprep.mubr.bf16.mxu0 %v326_v26 }
 0x1de   :  { %552 = vmatmul.mubr.bf16.vlgmr.msra.gmra.mrb[0].mxu1 %v7717_v29  ;;  %788 = vmatmul.mubr.bf16.vlgmr.msra.gmra.mrb[4].mxu0 %v7717_v29 }
 0x1df   :  { %992 = vmatpush1.bf16.msra.mxu1 %v6334_v27  ;;  %1228 = vmatpush1.bf16.msra.mxu0 %v6337_v28  ;;  %v6427_v27 = vld [vmem:[%s8576_s29 + $0x3f0] ss:$8 sps:$4 sm:$0xff]   ;;  %v1384_v28 = vld [vmem:[%s8579_s21 + $0x80] sm:$0xff] }
 0x1e0   :  { %1023 = vmatprep.mubr.bf16.mxu1 %v326_v26  ;;  %1259 = vmatprep.mubr.bf16.mxu0 %v326_v26  ;;  %v6424_v26 = vld [vmem:[%s8576_s29 + $0x2f0] ss:$8 sps:$4 sm:$0xff]  }
 0x1e1   :  { %993 = vmatprep.subr.bf16.mxu1 %v6342_v30  ;;  %1229 = vmatprep.subr.bf16.mxu0 %v6345_v31  ;;  %v1385_v30 = vld [vmem:[%s8579_s21 + $0x88] sm:$0xff]  ;;  %v1368_v31 = vld [vmem:[%s8579_s21] sm:$0xff] }
 0x1e3   :  { %994 = vmatpush1.bf16.msra.mxu1 %v6340_v32  ;;  %1230 = vmatpush1.bf16.msra.mxu0 %v6343_v33  ;;  %v5994_v32 = vpack.c.bf16 %v1385_v30, %v1384_v28  ;;  %v1369_v33 = vld [vmem:[%s8579_s21 + $0x8] sm:$0xff]  ;;  %v1398_v30 = vld [vmem:[%s8579_s21 + $0xf0] sm:$0xff] }
 0x1e4   :  { %995 = vmatprep.subr.bf16.mxu1 %v6348_v34  ;;  %1231 = vmatprep.subr.bf16.mxu0 %v6351_v35  ;;  %v1387_v34 = vld [vmem:[%s8579_s21 + $0x98] sm:$0xff]  ;;  %v5996_v35 = vpack.c.bf16 %v1369_v33, %v1368_v31 }
 0x1e5   :  { %v1399_v31 = vld [vmem:[%s8579_s21 + $0xf8] sm:$0xff] }
 0x1e6   :  { %v6022_v33 = vpack.c.bf16 %v1399_v31, %v1398_v30 }
 0x1e7   :  { %996 = vmatpush1.bf16.msra.mxu1 %v6346_v36  ;;  %1232 = vmatpush1.bf16.msra.mxu0 %v6349_v37  ;;  %v1370_v37 = vld [vmem:[%s8579_s21 + $0x10] sm:$0xff] }
 0x1e8   :  { %997 = vmatprep.subr.bf16.mxu1 %v6354_v38  ;;  %1233 = vmatprep.subr.bf16.mxu0 %v6357_v39  ;;  %v1371_v38 = vld [vmem:[%s8579_s21 + $0x18] sm:$0xff] }
 0x1e9   :  { %v6000_v39 = vpack.c.bf16 %v1371_v38, %v1370_v37 }
 0x1eb   :  { %998 = vmatpush1.bf16.msra.mxu1 %v6352_v40  ;;  %1234 = vmatpush1.bf16.msra.mxu0 %v6355_v41  ;;  %v1388_v40 = vld [vmem:[%s8579_s21 + $0xa0] sm:$0xff]  ;;  %v1389_v41 = vld [vmem:[%s8579_s21 + $0xa8] sm:$0xff] }
 0x1ec   :  { %999 = vmatprep.subr.bf16.mxu1 %v6360_v42  ;;  %1235 = vmatprep.subr.bf16.mxu0 %v6363_v43  ;;  %v1372_v42 = vld [vmem:[%s8579_s21 + $0x20] sm:$0xff]  ;;  %v6002_v43 = vpack.c.bf16 %v1389_v41, %v1388_v40 }
 0x1ef   :  { %1000 = vmatpush1.bf16.msra.mxu1 %v6358_v44  ;;  %1236 = vmatpush1.bf16.msra.mxu0 %v6361_v45  ;;  %v1373_v44 = vld [vmem:[%s8579_s21 + $0x28] sm:$0xff] }
 0x1f0   :  { %1001 = vmatprep.subr.bf16.mxu1 %v6366_v46  ;;  %1237 = vmatprep.subr.bf16.mxu0 %v6369_v47  ;;  %v6004_v45 = vpack.c.bf16 %v1373_v44, %v1372_v42  ;;  %v1390_v46 = vld [vmem:[%s8579_s21 + $0xb0] sm:$0xff]  ;;  %v1391_v47 = vld [vmem:[%s8579_s21 + $0xb8] sm:$0xff] }
 0x1f3   :  { %1002 = vmatpush1.bf16.msra.mxu1 %v6364_v48  ;;  %1238 = vmatpush1.bf16.msra.mxu0 %v6367_v49  ;;  %v6006_v48 = vpack.c.bf16 %v1391_v47, %v1390_v46 }
 0x1f4   :  { %1003 = vmatprep.subr.bf16.mxu1 %v6372_v50  ;;  %1239 = vmatprep.subr.bf16.mxu0 %v6375_v51 }
 0x1f7   :  { %1004 = vmatpush1.bf16.msra.mxu1 %v6370_v52  ;;  %1240 = vmatpush1.bf16.msra.mxu0 %v6373_v53 }
 0x1f8   :  { %1005 = vmatprep.subr.bf16.mxu1 %v6378_v54  ;;  %1241 = vmatprep.subr.bf16.mxu0 %v6381_v55 }
 0x1fb   :  { %1006 = vmatpush1.bf16.msra.mxu1 %v6376_v56  ;;  %1242 = vmatpush1.bf16.msra.mxu0 %v6379_v57 }
 0x1fc   :  { %1007 = vmatprep.subr.bf16.mxu1 %v6384_v58  ;;  %1243 = vmatprep.subr.bf16.mxu0 %v6387_v59 }
 0x1ff   :  { %1008 = vmatpush1.bf16.msra.mxu1 %v6382_v60  ;;  %1244 = vmatpush1.bf16.msra.mxu0 %v6385_v61 }
 0x200   :  { %1009 = vmatprep.subr.bf16.mxu1 %v6390_v62  ;;  %1245 = vmatprep.subr.bf16.mxu0 %v6393_v63 }
 0x203   :  { %1010 = vmatpush1.bf16.msra.mxu1 %v6388_v1  ;;  %1246 = vmatpush1.bf16.msra.mxu0 %v6391_v2 }
 0x204   :  { %1011 = vmatprep.subr.bf16.mxu1 %v6396_v3  ;;  %1247 = vmatprep.subr.bf16.mxu0 %v6399_v4 }
 0x207   :  { %1012 = vmatpush1.bf16.msra.mxu1 %v6394_v5  ;;  %1248 = vmatpush1.bf16.msra.mxu0 %v6397_v6  ;;  %v6430_v6 = vld [vmem:[#allocation6] sm:$0xff]  }
 0x208   :  { %1013 = vmatprep.subr.bf16.mxu1 %v6402_v7  ;;  %1249 = vmatprep.subr.bf16.mxu0 %v6405_v8  ;;  %v1374_v7 = vld [vmem:[%s8579_s21 + $0x30] sm:$0xff]  ;;  %v1375_v8 = vld [vmem:[%s8579_s21 + $0x38] sm:$0xff] }
 0x20b   :  { %1014 = vmatpush1.bf16.msra.mxu1 %v6400_v9  ;;  %1250 = vmatpush1.bf16.msra.mxu0 %v6403_v10  ;;  %v6008_v9 = vpack.c.bf16 %v1375_v8, %v1374_v7  ;;  %v1392_v10 = vld [vmem:[%s8579_s21 + $0xc0] sm:$0xff]  ;;  %v1551_v8 = vld [vmem:[%s8580_s4 + $0x8] sm:$0xff] }
 0x20c   :  { %1015 = vmatprep.subr.bf16.mxu1 %v6408_v11  ;;  %1251 = vmatprep.subr.bf16.mxu0 %v6411_v12  ;;  %v1393_v11 = vld [vmem:[%s8579_s21 + $0xc8] sm:$0xff] }
 0x20d   :  { %v6010_v12 = vpack.c.bf16 %v1393_v11, %v1392_v10  ;;  %v1550_v10 = vld [vmem:[%s8580_s4] sm:$0xff] }
 0x20f   :  { %1016 = vmatpush1.bf16.msra.mxu1 %v6406_v14  ;;  %1252 = vmatpush1.bf16.msra.mxu0 %v6409_v15  ;;  %v1376_v14 = vld [vmem:[%s8579_s21 + $0x40] sm:$0xff]  ;;  %v1377_v15 = vld [vmem:[%s8579_s21 + $0x48] sm:$0xff] }
 0x210   :  { %1017 = vmatprep.subr.bf16.mxu1 %v6414_v16  ;;  %1253 = vmatprep.subr.bf16.mxu0 %v6417_v17  ;;  %v6012_v16 = vpack.c.bf16 %v1377_v15, %v1376_v14  ;;  %v1394_v17 = vld [vmem:[%s8579_s21 + $0xd0] sm:$0xff]  ;;  %v1555_v14 = vld [vmem:[%s8580_s4 + $0x28] sm:$0xff]  ;;  %v1557_v15 = vld [vmem:[%s8580_s4 + $0x38] sm:$0xff] }
 0x213   :  { %1018 = vmatpush1.bf16.msra.mxu1 %v6412_v18  ;;  %1254 = vmatpush1.bf16.msra.mxu0 %v6415_v19  ;;  %v1395_v18 = vld [vmem:[%s8579_s21 + $0xd8] sm:$0xff] }
 0x214   :  { %1019 = vmatprep.subr.bf16.mxu1 %v6420_v20  ;;  %1255 = vmatprep.subr.bf16.mxu0 %v6423_v21  ;;  %v6014_v19 = vpack.c.bf16 %v1395_v18, %v1394_v17  ;;  %v1378_v20 = vld [vmem:[%s8579_s21 + $0x50] sm:$0xff]  ;;  %v1379_v21 = vld [vmem:[%s8579_s21 + $0x58] sm:$0xff]  ;;  %v6062_v18 = vpack.c.bf16 %v1557_v15, %v1555_v14  ;;  %v6487_v15 = vld [vmem:[#allocation12 + $0x94] ss:$8 sps:$4 sm:$0xff]  }
 0x215   :  { %v6484_v14 = vld [vmem:[#allocation12 + $0x184] ss:$8 sps:$4 sm:$0xff]  }
 0x217   :  { %1020 = vmatpush1.bf16.msra.mxu1 %v6418_v22  ;;  %1256 = vmatpush1.bf16.msra.mxu0 %v6421_v23  ;;  %v6016_v22 = vpack.c.bf16 %v1379_v21, %v1378_v20  ;;  %v1396_v23 = vld [vmem:[%s8579_s21 + $0xe0] sm:$0xff]  ;;  %v1556_v20 = vld [vmem:[%s8580_s4 + $0x30] sm:$0xff] }
 0x218   :  { %1021 = vmatprep.subr.bf16.mxu1 %v6426_v24  ;;  %1257 = vmatprep.subr.bf16.mxu0 %v6429_v25  ;;  %v1397_v24 = vld [vmem:[%s8579_s21 + $0xe8] sm:$0xff] }
 0x219   :  { %v6018_v25 = vpack.c.bf16 %v1397_v24, %v1396_v23  ;;  %v6436_v23 = vld [vmem:[#allocation12 + $0x104] ss:$8 sps:$4 sm:$0xff]  }
 0x21b   :  { %1022 = vmatpush1.bf16.msra.mxu1 %v6424_v26  ;;  %1258 = vmatpush1.bf16.msra.mxu0 %v6427_v27  ;;  %v1380_v26 = vld [vmem:[%s8579_s21 + $0x60] sm:$0xff]  ;;  %v1381_v27 = vld [vmem:[%s8579_s21 + $0x68] sm:$0xff] }
 0x21c   :  { %5995 = vmatprep.subr.bf16.mxu1 %v5994_v32  ;;  %v6020_v28 = vpack.c.bf16 %v1381_v27, %v1380_v26 }
 0x21e   :  { %1024 = vmatmul.mubr.bf16.vlgmr.msra.gmra.mrb[4].mxu1 %v7717_v29  ;;  %1260 = vmatmul.mubr.bf16.vlgmr.msra.gmra.mrb[8].mxu0 %v7717_v29  ;;  %v1386_v29 = vld [vmem:[%s8579_s21 + $0x90] sm:$0xff] }
 0x21f   :  { %1325 = vmatprep.mubr.bf16.mxu0 %v7179_v0  ;;  %v5998_v36 = vpack.c.bf16 %v1387_v34, %v1386_v29  ;;  %5997 = vmatpush3.bf16.msra.mxu1 %v5996_v35  ;;  %v1383_v29 = vld [vmem:[%s8579_s21 + $0x78] sm:$0xff] }
 0x221   :  { %5999 = vmatprep.subr.bf16.mxu1 %v5998_v36 }
 0x223   :  { %6001 = vmatpush3.bf16.msra.mxu1 %v6000_v39 }
 0x224   :  { %6003 = vmatprep.subr.bf16.mxu1 %v6002_v43 }
 0x227   :  { %6005 = vmatpush3.bf16.msra.mxu1 %v6004_v45 }
 0x228   :  { %6007 = vmatprep.subr.bf16.mxu1 %v6006_v48 }
 0x22b   :  { %6009 = vmatpush3.bf16.msra.mxu1 %v6008_v9 }
 0x22c   :  { %6011 = vmatprep.subr.bf16.mxu1 %v6010_v12 }
 0x22f   :  { %6013 = vmatpush3.bf16.msra.mxu1 %v6012_v16 }
 0x230   :  { %6015 = vmatprep.subr.bf16.mxu1 %v6014_v19 }
 0x233   :  { %6017 = vmatpush3.bf16.msra.mxu1 %v6016_v22 }
 0x234   :  { %6019 = vmatprep.subr.bf16.mxu1 %v6018_v25 }
 0x237   :  { %6021 = vmatpush3.bf16.msra.mxu1 %v6020_v28 }
 0x238   :  { %6023 = vmatprep.subr.bf16.mxu1 %v6022_v33 }
 0x2b1   :  { %v553_v49 = vpop.f32.mrb[0].mxu1  ;;  %v789_v50 = vpop.f32.mrb[4].mxu0 }
 0x2b2   :  { %v1278_v51 = vpack.c.bf16 %v789_v50, %v553_v49  ;;  %v555_v52 = vpop.f32.mrb[1].mxu1  ;;  %v791_v53 = vpop.f32.mrb[5].mxu0 }
 0x2b3   :  { %v1279_v54 = vpack.c.bf16 %v791_v53, %v555_v52  ;;  %v557_v55 = vpop.f32.mrb[2].mxu1  ;;  %v793_v56 = vpop.f32.mrb[6].mxu0 }
 0x2b4   :  { %v558_v57 = vpop.f32.mrb[3].mxu1  ;;  %v794_v58 = vpop.f32.mrb[7].mxu0 }
 0x2b5   :  { %1293 = vmatprep.subr.bf16.mxu0 %v1279_v54 }
 0x2b6   :  { %1294 = vmatpush1.bf16.msra.mxu0 %v1278_v51 }
 0x2f1   :  { %v1025_v59 = vpop.f32.mrb[4].mxu1  ;;  %v1261_v60 = vpop.f32.mrb[8].mxu0 }
 0x2f2   :  { %v1280_v61 = vpack.c.bf16 %v1261_v60, %v1025_v59  ;;  %v1027_v62 = vpop.f32.mrb[5].mxu1  ;;  %v1263_v63 = vpop.f32.mrb[9].mxu0 }
 0x2f3   :  { %v1281_v1 = vpack.c.bf16 %v1263_v63, %v1027_v62  ;;  %v1029_v2 = vpop.f32.mrb[6].mxu1  ;;  %v1265_v3 = vpop.f32.mrb[10].mxu0 }
 0x2f4   :  { %v1030_v4 = vpop.f32.mrb[7].mxu1  ;;  %v1266_v5 = vpop.f32.mrb[11].mxu0 }
 0x2f5   :  { %1295 = vmatprep.subr.bf16.mxu0 %v1281_v1 }
 0x2f6   :  { %1296 = vmatpush1.bf16.msra.mxu0 %v1280_v61 }
 0x2f7   :  { %6027 = vmatprep.subr.bf16.mxu0 %v5994_v32  ;;  %v1382_v32 = vld [vmem:[%s8579_s21 + $0x70] sm:$0xff] }
 0x2f8   :  { %v6024_v34 = vpack.c.bf16 %v1383_v29, %v1382_v32 }
 0x2f9   :  { %5425 = vmatmul.mubr.msk.bf16.vlgmr.msra.gmra.mrb[12].mxu0 %vm1289_vm1, %v6430_v6 }
 0x2fa   :  { %6029 = vmatpush3.bf16.msra.mxu0 %v5996_v35  ;;  %6025 = vmatpush3.bf16.msra.mxu1 %v6024_v34 }
 0x2fb   :  { %6031 = vmatprep.subr.bf16.mxu0 %v5998_v36 }
 0x2fe   :  { %6033 = vmatpush3.bf16.msra.mxu0 %v6000_v39 }
 0x2ff   :  { %6035 = vmatprep.subr.bf16.mxu0 %v6002_v43 }
 0x302   :  { %6037 = vmatpush3.bf16.msra.mxu0 %v6004_v45 }
 0x303   :  { %6039 = vmatprep.subr.bf16.mxu0 %v6006_v48 }
 0x306   :  { %6041 = vmatpush3.bf16.msra.mxu0 %v6008_v9  ;;  %v1553_v9 = vld [vmem:[%s8580_s4 + $0x18] sm:$0xff] }
 0x307   :  { %6043 = vmatprep.subr.bf16.mxu0 %v6010_v12  ;;  %v6058_v11 = vpack.c.bf16 %v1553_v9, %v1551_v8  ;;  %v1552_v12 = vld [vmem:[%s8580_s4 + $0x10] sm:$0xff]  ;;  %v6473_v8 = vld [vmem:[#allocation12 + $0x70] ss:$8 sps:$4 sm:$0xff]   ;;  %v6478_v9 = vld [vmem:[#allocation12 + $0x174] ss:$8 sps:$4 sm:$0xff]  }
 0x308   :  { %v6060_v17 = vpack.c.bf16 %v1552_v12, %v1550_v10  ;;  %v6481_v10 = vld [vmem:[#allocation12 + $0x84] ss:$8 sps:$4 sm:$0xff]   ;;  %v6479_v12 = vld [vmem:[#allocation12 + $0x80] ss:$8 sps:$4 sm:$0xff]  }
 0x309   :  { %6059 = vmatprep.subr.bf16.mxu1 %v6058_v11 }
 0x30a   :  { %6045 = vmatpush3.bf16.msra.mxu0 %v6012_v16  ;;  %v7180_v16 = vmov 0.0  }
 0x30b   :  { %6047 = vmatprep.subr.bf16.mxu0 %v6014_v19  ;;  %v1554_v19 = vld [vmem:[%s8580_s4 + $0x20] sm:$0xff] }
 0x30c   :  { %v6064_v21 = vpack.c.bf16 %v1556_v20, %v1554_v19  ;;  %v6490_v19 = vld [vmem:[#allocation12 + $0x194] ss:$8 sps:$4 sm:$0xff]   ;;  %v6493_v20 = vld [vmem:[#allocation12 + $0xa4] ss:$8 sps:$4 sm:$0xff]  }
 0x30e   :  { %6049 = vmatpush3.bf16.msra.mxu0 %v6016_v22  ;;  %v6433_v22 = vld [vmem:[#allocation12 + $0x4] ss:$8 sps:$4 sm:$0xff]  }
 0x30f   :  { %6051 = vmatprep.subr.bf16.mxu0 %v6018_v25 }
 0x312   :  { %6053 = vmatpush3.bf16.msra.mxu0 %v6020_v28 }
 0x313   :  { %6055 = vmatprep.subr.bf16.mxu0 %v6022_v33 }
 0x316   :  { %6057 = vmatpush3.bf16.msra.mxu0 %v6024_v34  ;;  %v1543_v34 = vld [vmem:[#allocation8] sm:$0x1] }
 0x317   :  { %6067 = vmatprep.subr.bf16.mxu0 %v6058_v11  ;;  %v6476_v11 = vld [vmem:[#allocation12 + $0x170] ss:$8 sps:$4 sm:$0xff]  }
 0x3cc   :  { %v8001_v35 = vpop.f32.mrb[12].mxu0 }
 0x3cd   :  { %v8003_v36 = vpop.f32.mrb[13].mxu0  ;;  %v1350_v38 = vmul.f32 %v8001_v35, %v8001_v35 }
 0x3ce   :  { %v8005_v37 = vpop.f32.mrb[14].mxu0  ;;  %v1351_v42 = vmul.f32 %v8003_v36, %v8003_v36 }
 0x3cf   :  { %v1336_v39 = vadd.f32 %v8005_v37, %v8001_v35  ;;  %v1352_v40 = vmul.f32 %v8005_v37, %v8005_v37  ;;  %v8013_v41 = vpop.f32.mrb[15].mxu0 }
 0x3d0   :  { %v1343_v43 = vadd.f32 %v8013_v41, %v8003_v36  ;;  %v1353_v44 = vmul.f32 %v8013_v41, %v8013_v41 }
 0x3d1   :  { %v1337_v45 = vrot.slane %v1336_v39, 4  ;;  %v1354_v46 = vadd.f32 %v1352_v40, %v1350_v38 }
 0x3d2   :  { %v1344_v47 = vrot.slane %v1343_v43, 4  ;;  %v1361_v48 = vadd.f32 %v1353_v44, %v1351_v42  ;;  %v6439_v42 = vld [vmem:[#allocation12 + $0x14] ss:$8 sps:$4 sm:$0xff]  }
 0x3d3   :  { %v1338_v49 = vadd.f32 %v1337_v45, %v1336_v39  ;;  %v1355_v50 = vrot.slane %v1354_v46, 4  ;;  %v6431_v39 = vld [vmem:[#allocation12] ss:$8 sps:$4 sm:$0xff]  }
 0x3d4   :  { %v1345_v51 = vadd.f32 %v1344_v47, %v1343_v43  ;;  %v1362_v52 = vrot.slane %v1361_v48, 4  ;;  %v1547_v43 = vld [vmem:[#allocation9] sm:$0x1]  ;;  %v6434_v45 = vld [vmem:[#allocation12 + $0x100] ss:$8 sps:$4 sm:$0xff]  }
 0x3d5   :  { %v1339_v53 = vrot.slane %v1338_v49, 2  ;;  %v1356_v54 = vadd.f32 %v1355_v50, %v1354_v46  ;;  %v6437_v46 = vld [vmem:[#allocation12 + $0x10] ss:$8 sps:$4 sm:$0xff]  }
 0x3d6   :  { %v1346_v55 = vrot.slane %v1345_v51, 2  ;;  %v1363_v56 = vadd.f32 %v1362_v52, %v1361_v48  ;;  %v6442_v48 = vld [vmem:[#allocation12 + $0x114] ss:$8 sps:$4 sm:$0xff]   ;;  %v6440_v50 = vld [vmem:[#allocation12 + $0x110] ss:$8 sps:$4 sm:$0xff]  }
 0x3d7   :  { %v1340_v57 = vadd.f32 %v1339_v53, %v1338_v49  ;;  %v1357_v58 = vrot.slane %v1356_v54, 2  ;;  %v6445_v49 = vld [vmem:[#allocation12 + $0x24] ss:$8 sps:$4 sm:$0xff]   ;;  %v6451_v53 = vld [vmem:[#allocation12 + $0x34] ss:$8 sps:$4 sm:$0xff]  }
 0x3d8   :  { %v1347_v59 = vadd.f32 %v1346_v55, %v1345_v51  ;;  %v1364_v60 = vrot.slane %v1363_v56, 2  ;;  %v6443_v51 = vld [vmem:[#allocation12 + $0x20] ss:$8 sps:$4 sm:$0xff]   ;;  %v6448_v52 = vld [vmem:[#allocation12 + $0x124] ss:$8 sps:$4 sm:$0xff]  }
 0x3d9   :  { %v1341_v61 = vrot.slane %v1340_v57, 1  ;;  %v1358_v62 = vadd.f32 %v1357_v58, %v1356_v54  ;;  %v6446_v54 = vld [vmem:[#allocation12 + $0x120] ss:$8 sps:$4 sm:$0xff]   ;;  %v6449_v55 = vld [vmem:[#allocation12 + $0x30] ss:$8 sps:$4 sm:$0xff]  }
 0x3da   :  { %v1348_v63 = vrot.slane %v1347_v59, 1  ;;  %v1365_v1 = vadd.f32 %v1364_v60, %v1363_v56  ;;  %v6454_v56 = vld [vmem:[#allocation12 + $0x134] ss:$8 sps:$4 sm:$0xff]   ;;  %v6452_v58 = vld [vmem:[#allocation12 + $0x130] ss:$8 sps:$4 sm:$0xff]  }
 0x3db   :  { %v1359_v2 = vrot.slane %v1358_v62, 1  ;;  %v1342_v5 = vadd.f32 %v1341_v61, %v1340_v57  ;;  %v6457_v57 = vld [vmem:[#allocation12 + $0x44] ss:$8 sps:$4 sm:$0xff]   ;;  %v6463_v61 = vld [vmem:[#allocation12 + $0x54] ss:$8 sps:$4 sm:$0xff]  }
 0x3dc   :  { %v1349_v3 = vadd.f32 %v1348_v63, %v1347_v59  ;;  %v1366_v4 = vrot.slane %v1365_v1, 1  ;;  %v6455_v59 = vld [vmem:[#allocation12 + $0x40] ss:$8 sps:$4 sm:$0xff]   ;;  %v6460_v60 = vld [vmem:[#allocation12 + $0x144] ss:$8 sps:$4 sm:$0xff]  }
 0x3dd   :  { %v1360_v7 = vadd.f32 %v1359_v2, %v1358_v62  ;;  %v6458_v62 = vld [vmem:[#allocation12 + $0x140] ss:$8 sps:$4 sm:$0xff]   ;;  %v6461_v63 = vld [vmem:[#allocation12 + $0x50] ss:$8 sps:$4 sm:$0xff]   ;;  %v6469_v2 = vld [vmem:[#allocation12 + $0x64] ss:$8 sps:$4 sm:$0xff]  }
 0x3de   :  { %1464 = vmatprep.mubr.f32.mxu1 %v1349_v3  ;;  %v1367_v6 = vadd.f32 %v1366_v4, %v1365_v1  ;;  %v6466_v1 = vld [vmem:[#allocation12 + $0x154] ss:$8 sps:$4 sm:$0xff]   ;;  %v6464_v3 = vld [vmem:[#allocation12 + $0x150] ss:$8 sps:$4 sm:$0xff]   ;;  %v6467_v4 = vld [vmem:[#allocation12 + $0x60] ss:$8 sps:$4 sm:$0xff]  }
 0x3df   :  { %1465 = vmatmul.mubr.f32.vlgmr.msra.gmra.mrb[8].mxu1 %v1342_v5  ;;  %v6472_v5 = vld [vmem:[#allocation12 + $0x164] ss:$8 sps:$4 sm:$0xff]  }
 0x3e0   :  { %1534 = vmatprep.mubr.f32.mxu0 %v1367_v6  ;;  %1625 = vmatprep.mubr.f32.mxu1 %v7180_v16  ;;  %v6475_v6 = vld [vmem:[#allocation12 + $0x74] ss:$8 sps:$4 sm:$0xff]  }
 0x3e1   :  { %1535 = vmatmul.mubr.f32.vlgmr.msra.gmra.mrb[16].mxu0 %v1360_v7  ;;  %6061 = vmatpush1.bf16.msra.mxu1 %v6060_v17  ;;  %v6470_v7 = vld [vmem:[#allocation12 + $0x160] ss:$8 sps:$4 sm:$0xff]  }
 0x3e2   :  { %1699 = vmatprep.mubr.f32.mxu0 %v7180_v16  ;;  %6069 = vmatpush1.bf16.msra.mxu0 %v6060_v17  ;;  %v6482_v17 = vld [vmem:[#allocation12 + $0x180] ss:$8 sps:$4 sm:$0xff]  }
 0x3e3   :  { %6063 = vmatprep.subr.bf16.mxu1 %v6062_v18  ;;  %6071 = vmatprep.subr.bf16.mxu0 %v6062_v18  ;;  %v6485_v18 = vld [vmem:[#allocation12 + $0x90] ss:$8 sps:$4 sm:$0xff]  }
 0x3e5   :  { %6065 = vmatpush1.bf16.msra.mxu1 %v6064_v21 }
 0x3e6   :  { %6073 = vmatpush1.bf16.msra.mxu0 %v6064_v21  ;;  %1928 = vmatprep.subr.bf16.mxu1 %v6433_v22  ;;  %v6488_v21 = vld [vmem:[#allocation12 + $0x190] ss:$8 sps:$4 sm:$0xff]   ;;  %v6491_v22 = vld [vmem:[#allocation12 + $0xa0] ss:$8 sps:$4 sm:$0xff]  }
 0x3e7   :  { %2168 = vmatprep.subr.bf16.mxu0 %v6436_v23  ;;  %v6496_v23 = vld [vmem:[#allocation12 + $0x1a4] ss:$8 sps:$4 sm:$0xff]  }
 0x4b2   :  { %v5752_v24 = vpop.f32.mrb[8].mxu1 }
 0x4b3   :  { %v5753_v25 = vpop.f32.mrb[9].mxu1 }
 0x4b4   :  { %v5754_v26 = vadd.f32 %v5753_v25, %v5752_v24  ;;  %v5787_v27 = vpop.f32.mrb[16].mxu0  ;;  %v6499_v24 = vld [vmem:[#allocation12 + $0xb4] ss:$8 sps:$4 sm:$0xff]   ;;  %v6494_v25 = vld [vmem:[#allocation12 + $0x1a0] ss:$8 sps:$4 sm:$0xff]  }
 0x4b5   :  { %v5788_v28 = vpop.f32.mrb[17].mxu0 }
 0x4b6   :  { %v1540_v30 = vmul.f32 %v5754_v26, %v5754_v26  ;;  %v5789_v31 = vadd.f32 %v5788_v28, %v5787_v27  ;;  %v6502_v27 = vld [vmem:[#allocation12 + $0x1b4] ss:$8 sps:$4 sm:$0xff]   ;;  %v6505_v28 = vld [vmem:[#allocation12 + $0xc4] ss:$8 sps:$4 sm:$0xff]  }
 0x4b8   :  { %v1541_v32 = vsub.f32 %v5789_v31, %v1540_v30  ;;  %v6500_v30 = vld [vmem:[#allocation12 + $0x1b0] ss:$8 sps:$4 sm:$0xff]   ;;  %v6503_v31 = vld [vmem:[#allocation12 + $0xc0] ss:$8 sps:$4 sm:$0xff]  }
 0x4ba   :  { %v1542_v33 = vmax.f32 %v1541_v32, 0.0  ;;  %v6508_v32 = vld [vmem:[#allocation12 + $0x1c4] ss:$8 sps:$4 sm:$0xff]  }
 0x4bc   :  { %v1544_v29 = vadd.f32 1e-05, %v1542_v33  ;;  %v6506_v33 = vld [vmem:[#allocation12 + $0x1c0] ss:$8 sps:$4 sm:$0xff]  }
 0x4be   :  { %6841 = vrsqrt.f32 %v1544_v29  ;;  %v6511_v29 = vld [vmem:[#allocation12 + $0xd4] ss:$8 sps:$4 sm:$0xff]  }
 0x4c8   :  { %v6842_v38 = vpop.eup %6841 }
 0x4c9   :  { %v1546_v40 = vmul.f32 %v6842_v38, %v1543_v34  ;;  %v6514_v34 = vld [vmem:[#allocation12 + $0x1d4] ss:$8 sps:$4 sm:$0xff]   ;;  %v6509_v38 = vld [vmem:[#allocation12 + $0xd0] ss:$8 sps:$4 sm:$0xff]  }
 0x4cb   :  { %5426 = vmatmul.mubr.msk.f32.vlgmr.msra.gmra.mrb[10].mxu1 %vm1289_vm1, %v1546_v40  ;;  %v1548_v44 = vmul.f32 %v5754_v26, %v1546_v40  ;;  %v6497_v26 = vld [vmem:[#allocation12 + $0xb0] ss:$8 sps:$4 sm:$0xff]   ;;  %v6517_v40 = vld [vmem:[#allocation12 + $0xe4] ss:$8 sps:$4 sm:$0xff]  }
 0x4cc   :  { %1929 = vmatpush1.bf16.msra.mxu1 %v6431_v39  ;;  %v6512_v39 = vld [vmem:[#allocation12 + $0x1d0] ss:$8 sps:$4 sm:$0xff]  }
 0x4cd   :  { %v1549_v47 = vsub.f32 %v1547_v43, %v1548_v44  ;;  %1930 = vmatprep.subr.bf16.mxu1 %v6439_v42  ;;  %v6520_v42 = vld [vmem:[#allocation12 + $0x1e4] ss:$8 sps:$4 sm:$0xff]   ;;  %v6515_v43 = vld [vmem:[#allocation12 + $0xe0] ss:$8 sps:$4 sm:$0xff]  }
 0x4ce   :  { %v6518_v44 = vld [vmem:[#allocation12 + $0x1e0] ss:$8 sps:$4 sm:$0xff]  }
 0x4cf   :  { %5427 = vmatmul.mubr.msk.f32.vlgmr.msra.gmra.mrb[18].mxu0 %vm1289_vm1, %v1549_v47  ;;  %v6521_v47 = vld [vmem:[#allocation12 + $0xf0] ss:$8 sps:$4 sm:$0xff]  }
 0x4d0   :  { %2169 = vmatpush1.bf16.msra.mxu0 %v6434_v45  ;;  %1931 = vmatpush1.bf16.msra.mxu1 %v6437_v46  ;;  %v6523_v45 = vld [vmem:[#allocation12 + $0xf4] ss:$8 sps:$4 sm:$0xff]  }
 0x4d1   :  { %2170 = vmatprep.subr.bf16.mxu0 %v6442_v48  ;;  %1932 = vmatprep.subr.bf16.mxu1 %v6445_v49  ;;  %v6526_v46 = vld [vmem:[#allocation12 + $0x1f4] ss:$8 sps:$4 sm:$0xff]   ;;  %v6524_v48 = vld [vmem:[#allocation12 + $0x1f0] ss:$8 sps:$4 sm:$0xff]   ;;  %v6529_v49 = vld [vmem:[#allocation12 + $0x204] ss:$8 sps:$4 sm:$0xff]  }
 0x4d4   :  { %2171 = vmatpush1.bf16.msra.mxu0 %v6440_v50  ;;  %1933 = vmatpush1.bf16.msra.mxu1 %v6443_v51  ;;  %v6532_v50 = vld [vmem:[#allocation12 + $0x304] ss:$8 sps:$4 sm:$0xff]  }
 0x4d5   :  { %2172 = vmatprep.subr.bf16.mxu0 %v6448_v52  ;;  %1934 = vmatprep.subr.bf16.mxu1 %v6451_v53 }
 0x4d8   :  { %2173 = vmatpush1.bf16.msra.mxu0 %v6446_v54  ;;  %1935 = vmatpush1.bf16.msra.mxu1 %v6449_v55 }
 0x4d9   :  { %2174 = vmatprep.subr.bf16.mxu0 %v6454_v56  ;;  %1936 = vmatprep.subr.bf16.mxu1 %v6457_v57 }
 0x4dc   :  { %2175 = vmatpush1.bf16.msra.mxu0 %v6452_v58  ;;  %1937 = vmatpush1.bf16.msra.mxu1 %v6455_v59 }
 0x4dd   :  { %2176 = vmatprep.subr.bf16.mxu0 %v6460_v60  ;;  %1938 = vmatprep.subr.bf16.mxu1 %v6463_v61 }
 0x4e0   :  { %2177 = vmatpush1.bf16.msra.mxu0 %v6458_v62  ;;  %1939 = vmatpush1.bf16.msra.mxu1 %v6461_v63 }
 0x4e1   :  { %2178 = vmatprep.subr.bf16.mxu0 %v6466_v1  ;;  %1940 = vmatprep.subr.bf16.mxu1 %v6469_v2 }
 0x4e4   :  { %2179 = vmatpush1.bf16.msra.mxu0 %v6464_v3  ;;  %1941 = vmatpush1.bf16.msra.mxu1 %v6467_v4 }
 0x4e5   :  { %2180 = vmatprep.subr.bf16.mxu0 %v6472_v5  ;;  %1942 = vmatprep.subr.bf16.mxu1 %v6475_v6 }
 0x4e8   :  { %2181 = vmatpush1.bf16.msra.mxu0 %v6470_v7  ;;  %1943 = vmatpush1.bf16.msra.mxu1 %v6473_v8  ;;  %v6530_v8 = vld [vmem:[#allocation12 + $0x300] ss:$8 sps:$4 sm:$0xff]  }
 0x4e9   :  { %2182 = vmatprep.subr.bf16.mxu0 %v6478_v9  ;;  %1944 = vmatprep.subr.bf16.mxu1 %v6481_v10  ;;  %v6538_v9 = vld [vmem:[#allocation12 + $0x314] ss:$8 sps:$4 sm:$0xff]   ;;  %v6533_v10 = vld [vmem:[#allocation12 + $0x210] ss:$8 sps:$4 sm:$0xff]  }
 0x4ec   :  { %2183 = vmatpush1.bf16.msra.mxu0 %v6476_v11  ;;  %1945 = vmatpush1.bf16.msra.mxu1 %v6479_v12  ;;  %v6536_v11 = vld [vmem:[#allocation12 + $0x310] ss:$8 sps:$4 sm:$0xff]   ;;  %v6541_v12 = vld [vmem:[#allocation12 + $0x224] ss:$8 sps:$4 sm:$0xff]  }
 0x4ed   :  { %2184 = vmatprep.subr.bf16.mxu0 %v6484_v14  ;;  %1946 = vmatprep.subr.bf16.mxu1 %v6487_v15  ;;  %v6544_v14 = vld [vmem:[#allocation12 + $0x324] ss:$8 sps:$4 sm:$0xff]   ;;  %v6539_v15 = vld [vmem:[#allocation12 + $0x220] ss:$8 sps:$4 sm:$0xff]  }
 0x4f0   :  { %2185 = vmatpush1.bf16.msra.mxu0 %v6482_v17  ;;  %1947 = vmatpush1.bf16.msra.mxu1 %v6485_v18  ;;  %v6542_v17 = vld [vmem:[#allocation12 + $0x320] ss:$8 sps:$4 sm:$0xff]   ;;  %v6547_v18 = vld [vmem:[#allocation12 + $0x234] ss:$8 sps:$4 sm:$0xff]  }
 0x4f1   :  { %2186 = vmatprep.subr.bf16.mxu0 %v6490_v19  ;;  %1948 = vmatprep.subr.bf16.mxu1 %v6493_v20  ;;  %v6550_v19 = vld [vmem:[#allocation12 + $0x334] ss:$8 sps:$4 sm:$0xff]   ;;  %v6545_v20 = vld [vmem:[#allocation12 + $0x230] ss:$8 sps:$4 sm:$0xff]  }
 0x4f4   :  { %2187 = vmatpush1.bf16.msra.mxu0 %v6488_v21  ;;  %1949 = vmatpush1.bf16.msra.mxu1 %v6491_v22  ;;  %v6548_v21 = vld [vmem:[#allocation12 + $0x330] ss:$8 sps:$4 sm:$0xff]   ;;  %v6553_v22 = vld [vmem:[#allocation12 + $0x244] ss:$8 sps:$4 sm:$0xff]  }
 0x4f5   :  { %2188 = vmatprep.subr.bf16.mxu0 %v6496_v23  ;;  %1950 = vmatprep.subr.bf16.mxu1 %v6499_v24  ;;  %v6556_v23 = vld [vmem:[#allocation12 + $0x344] ss:$8 sps:$4 sm:$0xff]   ;;  %v6551_v24 = vld [vmem:[#allocation12 + $0x240] ss:$8 sps:$4 sm:$0xff]  }
 0x4f8   :  { %2189 = vmatpush1.bf16.msra.mxu0 %v6494_v25  ;;  %1951 = vmatpush1.bf16.msra.mxu1 %v6497_v26  ;;  %v6554_v25 = vld [vmem:[#allocation12 + $0x340] ss:$8 sps:$4 sm:$0xff]   ;;  %v6559_v26 = vld [vmem:[#allocation12 + $0x254] ss:$8 sps:$4 sm:$0xff]  }
 0x4f9   :  { %2190 = vmatprep.subr.bf16.mxu0 %v6502_v27  ;;  %1952 = vmatprep.subr.bf16.mxu1 %v6505_v28  ;;  %v6562_v27 = vld [vmem:[#allocation12 + $0x354] ss:$8 sps:$4 sm:$0xff]   ;;  %v6557_v28 = vld [vmem:[#allocation12 + $0x250] ss:$8 sps:$4 sm:$0xff]  }
 0x4fc   :  { %2191 = vmatpush1.bf16.msra.mxu0 %v6500_v30  ;;  %1953 = vmatpush1.bf16.msra.mxu1 %v6503_v31  ;;  %v6560_v30 = vld [vmem:[#allocation12 + $0x350] ss:$8 sps:$4 sm:$0xff]   ;;  %v6565_v31 = vld [vmem:[#allocation12 + $0x264] ss:$8 sps:$4 sm:$0xff]  }
 0x4fd   :  { %2192 = vmatprep.subr.bf16.mxu0 %v6508_v32  ;;  %1954 = vmatprep.subr.bf16.mxu1 %v6511_v29  ;;  %v6568_v32 = vld [vmem:[#allocation12 + $0x364] ss:$8 sps:$4 sm:$0xff]   ;;  %v6566_v29 = vld [vmem:[#allocation12 + $0x360] ss:$8 sps:$4 sm:$0xff]  }
 0x500   :  { %2193 = vmatpush1.bf16.msra.mxu0 %v6506_v33  ;;  %1955 = vmatpush1.bf16.msra.mxu1 %v6509_v38  ;;  %v6563_v33 = vld [vmem:[#allocation12 + $0x260] ss:$8 sps:$4 sm:$0xff]   ;;  %v6574_v38 = vld [vmem:[#allocation12 + $0x374] ss:$8 sps:$4 sm:$0xff]  }
 0x501   :  { %2194 = vmatprep.subr.bf16.mxu0 %v6514_v34  ;;  %1956 = vmatprep.subr.bf16.mxu1 %v6517_v40  ;;  %v6571_v34 = vld [vmem:[#allocation12 + $0x274] ss:$8 sps:$4 sm:$0xff]   ;;  %v6572_v40 = vld [vmem:[#allocation12 + $0x370] ss:$8 sps:$4 sm:$0xff]  }
 0x504   :  { %2195 = vmatpush1.bf16.msra.mxu0 %v6512_v39  ;;  %1957 = vmatpush1.bf16.msra.mxu1 %v6515_v43  ;;  %v6569_v39 = vld [vmem:[#allocation12 + $0x270] ss:$8 sps:$4 sm:$0xff]   ;;  %v6580_v43 = vld [vmem:[#allocation12 + $0x384] ss:$8 sps:$4 sm:$0xff]  }
 0x505   :  { %2196 = vmatprep.subr.bf16.mxu0 %v6520_v42  ;;  %1958 = vmatprep.subr.bf16.mxu1 %v6523_v45  ;;  %v6577_v42 = vld [vmem:[#allocation12 + $0x284] ss:$8 sps:$4 sm:$0xff]   ;;  %v6578_v45 = vld [vmem:[#allocation12 + $0x380] ss:$8 sps:$4 sm:$0xff]  }
 0x508   :  { %2197 = vmatpush1.bf16.msra.mxu0 %v6518_v44  ;;  %1959 = vmatpush1.bf16.msra.mxu1 %v6521_v47  ;;  %v6575_v44 = vld [vmem:[#allocation12 + $0x280] ss:$8 sps:$4 sm:$0xff]   ;;  %v6586_v47 = vld [vmem:[#allocation12 + $0x394] ss:$8 sps:$4 sm:$0xff]  }
 0x509   :  { %2198 = vmatprep.subr.bf16.mxu0 %v6526_v46  ;;  %2408 = vmatprep.subr.bf16.mxu1 %v6529_v49  ;;  %v6583_v46 = vld [vmem:[#allocation12 + $0x294] ss:$8 sps:$4 sm:$0xff]   ;;  %v6584_v49 = vld [vmem:[#allocation12 + $0x390] ss:$8 sps:$4 sm:$0xff]  }
 0x50c   :  { %2199 = vmatpush1.bf16.msra.mxu0 %v6524_v48  ;;  %v6581_v48 = vld [vmem:[#allocation12 + $0x290] ss:$8 sps:$4 sm:$0xff]  }
 0x50d   :  { %2648 = vmatprep.subr.bf16.mxu0 %v6532_v50  ;;  %v6589_v50 = vld [vmem:[#allocation12 + $0x2a4] ss:$8 sps:$4 sm:$0xff]  }
 0x59e   :  { %v1627_v51 = vpop.f32.mrb[10].mxu1 }
 0x59f   :  { %v1709_v52 = vrot.slane %v1627_v51, %v7705_v13  ;;  %v1629_v53 = vpop.f32.mrb[11].mxu1  ;;  %v6592_v51 = vld [vmem:[#allocation12 + $0x3a4] ss:$8 sps:$4 sm:$0xff]  }
 0x5a0   :  { %v1713_v54 = vrot.slane %v1629_v53, %v7705_v13  ;;  %v6590_v53 = vld [vmem:[#allocation12 + $0x3a0] ss:$8 sps:$4 sm:$0xff]  }
 0x5a1   :  { %v1714_v55 = vmul.f32 %v1709_v52, %v8001_v35  ;;  %v1716_v56 = vmul.f32 %v1709_v52, %v8005_v37  ;;  %v6587_v52 = vld [vmem:[#allocation12 + $0x2a0] ss:$8 sps:$4 sm:$0xff]  }
 0x5a2   :  { %v1715_v57 = vmul.f32 %v1713_v54, %v8003_v36  ;;  %v1717_v58 = vmul.f32 %v1713_v54, %v8013_v41  ;;  %v1701_v59 = vpop.f32.mrb[18].mxu0  ;;  %v6527_v36 = vld [vmem:[#allocation12 + $0x200] ss:$8 sps:$4 sm:$0xff]   ;;  %v6535_v41 = vld [vmem:[#allocation12 + $0x214] ss:$8 sps:$4 sm:$0xff]  }
 0x5a3   :  { %v1721_v60 = vrot.slane %v1701_v59, %v7705_v13  ;;  %v1703_v61 = vpop.f32.mrb[19].mxu0  ;;  %v6595_v54 = vld [vmem:[#allocation12 + $0x2b4] ss:$8 sps:$4 sm:$0xff]   ;;  %v6604_v59 = vld [vmem:[#allocation12 + $0x3c4] ss:$8 sps:$4 sm:$0xff]  }
 0x5a4   :  { %v1725_v62 = vrot.slane %v1703_v61, %v7705_v13  ;;  %v6602_v61 = vld [vmem:[#allocation12 + $0x3c0] ss:$8 sps:$4 sm:$0xff]  }
 0x5a5   :  { %v1726_v63 = vadd.f32 %v1721_v60, %v1714_v55  ;;  %v1728_v1 = vadd.f32 %v1721_v60, %v1716_v56  ;;  %v6598_v55 = vld [vmem:[#allocation12 + $0x3b4] ss:$8 sps:$4 sm:$0xff]   ;;  %v6593_v56 = vld [vmem:[#allocation12 + $0x2b0] ss:$8 sps:$4 sm:$0xff]   ;;  %v6599_v60 = vld [vmem:[#allocation12 + $0x2c0] ss:$8 sps:$4 sm:$0xff]  }
 0x5a6   :  { %v1727_v2 = vadd.f32 %v1725_v62, %v1715_v57  ;;  %v1729_v3 = vadd.f32 %v1725_v62, %v1717_v58  ;;  %v6596_v57 = vld [vmem:[#allocation12 + $0x3b0] ss:$8 sps:$4 sm:$0xff]   ;;  %v6601_v58 = vld [vmem:[#allocation12 + $0x2c4] ss:$8 sps:$4 sm:$0xff]   ;;  %v6607_v62 = vld [vmem:[#allocation12 + $0x2d4] ss:$8 sps:$4 sm:$0xff]  }
 0x5a7   :  { %v1730_v4 = vmax.f32 %v1726_v63, 0.0  ;;  %v1732_v5 = vmax.f32 %v1728_v1, 0.0  ;;  %v6610_v63 = vld [vmem:[#allocation12 + $0x3d4] ss:$8 sps:$4 sm:$0xff]   ;;  %v6605_v1 = vld [vmem:[#allocation12 + $0x2d0] ss:$8 sps:$4 sm:$0xff]  }
 0x5a8   :  { %v1731_v6 = vmax.f32 %v1727_v2, 0.0  ;;  %v1733_v35 = vmax.f32 %v1729_v3, 0.0  ;;  %v6608_v2 = vld [vmem:[#allocation12 + $0x3d0] ss:$8 sps:$4 sm:$0xff]   ;;  %v6613_v3 = vld [vmem:[#allocation12 + $0x2e4] ss:$8 sps:$4 sm:$0xff]  }
 0x5a9   :  { %v8057_v7 = vpack.c.bf16 %v1732_v5, %v1730_v4  ;;  %v6616_v4 = vld [vmem:[#allocation12 + $0x3e4] ss:$8 sps:$4 sm:$0xff]   ;;  %v6611_v5 = vld [vmem:[#allocation12 + $0x2e0] ss:$8 sps:$4 sm:$0xff]  }
 0x5aa   :  { %v1735_v37 = vpack.c.bf16 %v1733_v35, %v1731_v6  ;;  %v6614_v6 = vld [vmem:[#allocation12 + $0x3e0] ss:$8 sps:$4 sm:$0xff]   ;;  %v6619_v35 = vld [vmem:[#allocation12 + $0x2f4] ss:$8 sps:$4 sm:$0xff]  }
 0x5ac   :  { %1960 = vmatprep.mubr.bf16.mxu1 %v1735_v37  ;;  %2200 = vmatprep.mubr.bf16.mxu0 %v1735_v37 }
 0x5ad   :  { %1961 = vmatmul.mubr.bf16.vlgmr.msra.gmra.mrb[12].mxu1 %v8057_v7  ;;  %2201 = vmatmul.mubr.bf16.vlgmr.msra.gmra.mrb[20].mxu0 %v8057_v7 }
 0x5ae   :  { %2409 = vmatpush1.bf16.msra.mxu1 %v6527_v36  ;;  %2649 = vmatpush1.bf16.msra.mxu0 %v6530_v8  ;;  %v6617_v36 = vld [vmem:[#allocation12 + $0x2f0] ss:$8 sps:$4 sm:$0xff]  }
 0x5af   :  { %2440 = vmatprep.mubr.bf16.mxu1 %v1735_v37  ;;  %2680 = vmatprep.mubr.bf16.mxu0 %v1735_v37  ;;  %v6622_v37 = vld [vmem:[#allocation12 + $0x3f4] ss:$8 sps:$4 sm:$0xff]   ;;  %v6620_v8 = vld [vmem:[#allocation12 + $0x3f0] ss:$8 sps:$4 sm:$0xff]  }
 0x5b0   :  { %2410 = vmatprep.subr.bf16.mxu1 %v6535_v41  ;;  %2650 = vmatprep.subr.bf16.mxu0 %v6538_v9  ;;  %v2853_v41 = vld [vmem:[%s8544_s11 + $0x80] sm:$0xff]  ;;  %v2854_v9 = vld [vmem:[%s8544_s11 + $0x88] sm:$0xff] }
 0x5b2   :  { %2411 = vmatpush1.bf16.msra.mxu1 %v6533_v10  ;;  %2651 = vmatpush1.bf16.msra.mxu0 %v6536_v11  ;;  %v2837_v10 = vld [vmem:[%s8544_s11] sm:$0xff]  ;;  %v6074_v11 = vpack.c.bf16 %v2854_v9, %v2853_v41 }
 0x5b3   :  { %2412 = vmatprep.subr.bf16.mxu1 %v6541_v12  ;;  %2652 = vmatprep.subr.bf16.mxu0 %v6544_v14  ;;  %v2838_v12 = vld [vmem:[%s8544_s11 + $0x8] sm:$0xff]  ;;  %v2856_v14 = vld [vmem:[%s8544_s11 + $0x98] sm:$0xff]  ;;  %v2865_v9 = vld [vmem:[%s8544_s11 + $0xe0] sm:$0xff] }
 0x5b6   :  { %2413 = vmatpush1.bf16.msra.mxu1 %v6539_v15  ;;  %2653 = vmatpush1.bf16.msra.mxu0 %v6542_v17  ;;  %v6076_v15 = vpack.c.bf16 %v2838_v12, %v2837_v10  ;;  %v2866_v10 = vld [vmem:[%s8544_s11 + $0xe8] sm:$0xff]  ;;  %v2849_v12 = vld [vmem:[%s8544_s11 + $0x60] sm:$0xff] }
 0x5b7   :  { %2414 = vmatprep.subr.bf16.mxu1 %v6547_v18  ;;  %2654 = vmatprep.subr.bf16.mxu0 %v6550_v19 }
 0x5ba   :  { %2415 = vmatpush1.bf16.msra.mxu1 %v6545_v20  ;;  %2655 = vmatpush1.bf16.msra.mxu0 %v6548_v21 }
 0x5bb   :  { %2416 = vmatprep.subr.bf16.mxu1 %v6553_v22  ;;  %2656 = vmatprep.subr.bf16.mxu0 %v6556_v23 }
 0x5be   :  { %2417 = vmatpush1.bf16.msra.mxu1 %v6551_v24  ;;  %2657 = vmatpush1.bf16.msra.mxu0 %v6554_v25 }
 0x5bf   :  { %2418 = vmatprep.subr.bf16.mxu1 %v6559_v26  ;;  %2658 = vmatprep.subr.bf16.mxu0 %v6562_v27 }
 0x5c2   :  { %2419 = vmatpush1.bf16.msra.mxu1 %v6557_v28  ;;  %2659 = vmatpush1.bf16.msra.mxu0 %v6560_v30 }
 0x5c3   :  { %2420 = vmatprep.subr.bf16.mxu1 %v6565_v31  ;;  %2660 = vmatprep.subr.bf16.mxu0 %v6568_v32 }
 0x5c6   :  { %2421 = vmatpush1.bf16.msra.mxu1 %v6563_v33  ;;  %2661 = vmatpush1.bf16.msra.mxu0 %v6566_v29 }
 0x5c7   :  { %2422 = vmatprep.subr.bf16.mxu1 %v6571_v34  ;;  %2662 = vmatprep.subr.bf16.mxu0 %v6574_v38 }
 0x5ca   :  { %2423 = vmatpush1.bf16.msra.mxu1 %v6569_v39  ;;  %2663 = vmatpush1.bf16.msra.mxu0 %v6572_v40 }
 0x5cb   :  { %2424 = vmatprep.subr.bf16.mxu1 %v6577_v42  ;;  %2664 = vmatprep.subr.bf16.mxu0 %v6580_v43 }
 0x5ce   :  { %2425 = vmatpush1.bf16.msra.mxu1 %v6575_v44  ;;  %2665 = vmatpush1.bf16.msra.mxu0 %v6578_v45 }
 0x5cf   :  { %2426 = vmatprep.subr.bf16.mxu1 %v6583_v46  ;;  %2666 = vmatprep.subr.bf16.mxu0 %v6586_v47  ;;  %v6623_v46 = vld [vmem:[#allocation11] sm:$0xff]   ;;  %v6624_v47 = vld [vmem:[#allocation11 + $0x8] sm:$0xff]  }
 0x5d2   :  { %2427 = vmatpush1.bf16.msra.mxu1 %v6581_v48  ;;  %2667 = vmatpush1.bf16.msra.mxu0 %v6584_v49  ;;  %v2839_v48 = vld [vmem:[%s8544_s11 + $0x10] sm:$0xff]  ;;  %v2840_v49 = vld [vmem:[%s8544_s11 + $0x18] sm:$0xff] }
 0x5d3   :  { %2428 = vmatprep.subr.bf16.mxu1 %v6589_v50  ;;  %2668 = vmatprep.subr.bf16.mxu0 %v6592_v51  ;;  %v6080_v50 = vpack.c.bf16 %v2840_v49, %v2839_v48  ;;  %v2857_v51 = vld [vmem:[%s8544_s11 + $0xa0] sm:$0xff] }
 0x5d6   :  { %2429 = vmatpush1.bf16.msra.mxu1 %v6587_v52  ;;  %2669 = vmatpush1.bf16.msra.mxu0 %v6590_v53  ;;  %v2858_v52 = vld [vmem:[%s8544_s11 + $0xa8] sm:$0xff] }
 0x5d7   :  { %2430 = vmatprep.subr.bf16.mxu1 %v6595_v54  ;;  %2670 = vmatprep.subr.bf16.mxu0 %v6598_v55  ;;  %v6082_v53 = vpack.c.bf16 %v2858_v52, %v2857_v51  ;;  %v2841_v54 = vld [vmem:[%s8544_s11 + $0x20] sm:$0xff]  ;;  %v2842_v55 = vld [vmem:[%s8544_s11 + $0x28] sm:$0xff] }
 0x5da   :  { %2431 = vmatpush1.bf16.msra.mxu1 %v6593_v56  ;;  %2671 = vmatpush1.bf16.msra.mxu0 %v6596_v57  ;;  %v6084_v56 = vpack.c.bf16 %v2842_v55, %v2841_v54  ;;  %v2859_v57 = vld [vmem:[%s8544_s11 + $0xb0] sm:$0xff] }
 0x5db   :  { %2432 = vmatprep.subr.bf16.mxu1 %v6601_v58  ;;  %2672 = vmatprep.subr.bf16.mxu0 %v6604_v59  ;;  %v2860_v58 = vld [vmem:[%s8544_s11 + $0xb8] sm:$0xff] }
 0x5dc   :  { %v6086_v59 = vpack.c.bf16 %v2860_v58, %v2859_v57 }
 0x5de   :  { %2433 = vmatpush1.bf16.msra.mxu1 %v6599_v60  ;;  %2673 = vmatpush1.bf16.msra.mxu0 %v6602_v61  ;;  %v2843_v60 = vld [vmem:[%s8544_s11 + $0x30] sm:$0xff]  ;;  %v2844_v61 = vld [vmem:[%s8544_s11 + $0x38] sm:$0xff] }
 0x5df   :  { %2434 = vmatprep.subr.bf16.mxu1 %v6607_v62  ;;  %2674 = vmatprep.subr.bf16.mxu0 %v6610_v63  ;;  %v6088_v62 = vpack.c.bf16 %v2844_v61, %v2843_v60  ;;  %v2861_v63 = vld [vmem:[%s8544_s11 + $0xc0] sm:$0xff] }
 0x5e2   :  { %2435 = vmatpush1.bf16.msra.mxu1 %v6605_v1  ;;  %2675 = vmatpush1.bf16.msra.mxu0 %v6608_v2  ;;  %v2862_v1 = vld [vmem:[%s8544_s11 + $0xc8] sm:$0xff] }
 0x5e3   :  { %2436 = vmatprep.subr.bf16.mxu1 %v6613_v3  ;;  %2676 = vmatprep.subr.bf16.mxu0 %v6616_v4  ;;  %v6090_v2 = vpack.c.bf16 %v2862_v1, %v2861_v63  ;;  %v2845_v3 = vld [vmem:[%s8544_s11 + $0x40] sm:$0xff]  ;;  %v2846_v4 = vld [vmem:[%s8544_s11 + $0x48] sm:$0xff] }
 0x5e6   :  { %2437 = vmatpush1.bf16.msra.mxu1 %v6611_v5  ;;  %2677 = vmatpush1.bf16.msra.mxu0 %v6614_v6  ;;  %v6092_v5 = vpack.c.bf16 %v2846_v4, %v2845_v3  ;;  %v2863_v6 = vld [vmem:[%s8544_s11 + $0xd0] sm:$0xff] }
 0x5e7   :  { %2438 = vmatprep.subr.bf16.mxu1 %v6619_v35  ;;  %2678 = vmatprep.subr.bf16.mxu0 %v6622_v37  ;;  %v2864_v35 = vld [vmem:[%s8544_s11 + $0xd8] sm:$0xff] }
 0x5e8   :  { %v6094_v37 = vpack.c.bf16 %v2864_v35, %v2863_v6 }
 0x5ea   :  { %2439 = vmatpush1.bf16.msra.mxu1 %v6617_v36  ;;  %2679 = vmatpush1.bf16.msra.mxu0 %v6620_v8  ;;  %v2847_v36 = vld [vmem:[%s8544_s11 + $0x50] sm:$0xff]  ;;  %v2848_v8 = vld [vmem:[%s8544_s11 + $0x58] sm:$0xff] }
 0x5eb   :  { %6075 = vmatprep.subr.bf16.mxu0 %v6074_v11  ;;  %v6096_v41 = vpack.c.bf16 %v2848_v8, %v2847_v36 }
 0x5ed   :  { %2441 = vmatmul.mubr.bf16.vlgmr.msra.gmra.mrb[16].mxu1 %v8057_v7  ;;  %2681 = vmatmul.mubr.bf16.vlgmr.msra.gmra.mrb[24].mxu0 %v8057_v7  ;;  %v2855_v7 = vld [vmem:[%s8544_s11 + $0x90] sm:$0xff] }
 0x5ee   :  { %2772 = vmatprep.mubr.bf16.mxu1 %v7179_v0  ;;  %v6078_v17 = vpack.c.bf16 %v2856_v14, %v2855_v7  ;;  %6077 = vmatpush3.bf16.msra.mxu0 %v6076_v15  ;;  %v2850_v7 = vld [vmem:[%s8544_s11 + $0x68] sm:$0xff] }
 0x5ef   :  { %v6100_v14 = vpack.c.bf16 %v2850_v7, %v2849_v12  ;;  %v3020_v12 = vld [vmem:[%s8545_s12 + $0x8] sm:$0xff]  ;;  %v3022_v7 = vld [vmem:[%s8545_s12 + $0x18] sm:$0xff] }
 0x5f0   :  { %6079 = vmatprep.subr.bf16.mxu0 %v6078_v17 }
 0x5f2   :  { %6081 = vmatpush3.bf16.msra.mxu0 %v6080_v50 }
 0x5f3   :  { %6083 = vmatprep.subr.bf16.mxu0 %v6082_v53 }
 0x5f6   :  { %6085 = vmatpush3.bf16.msra.mxu0 %v6084_v56 }
 0x5f7   :  { %6087 = vmatprep.subr.bf16.mxu0 %v6086_v59 }
 0x5fa   :  { %6089 = vmatpush3.bf16.msra.mxu0 %v6088_v62 }
 0x5fb   :  { %6091 = vmatprep.subr.bf16.mxu0 %v6090_v2 }
 0x5fe   :  { %6093 = vmatpush3.bf16.msra.mxu0 %v6092_v5 }
 0x5ff   :  { %6095 = vmatprep.subr.bf16.mxu0 %v6094_v37 }
 0x602   :  { %6097 = vmatpush3.bf16.msra.mxu0 %v6096_v41 }
 0x680   :  { %v1962_v18 = vpop.f32.mrb[12].mxu1  ;;  %v2202_v19 = vpop.f32.mrb[20].mxu0 }
 0x681   :  { %v1964_v20 = vpop.f32.mrb[13].mxu1  ;;  %v2204_v21 = vpop.f32.mrb[21].mxu0 }
 0x682   :  { %v1966_v22 = vpop.f32.mrb[14].mxu1  ;;  %v2206_v23 = vpop.f32.mrb[22].mxu0 }
 0x683   :  { %v2711_v24 = vpack.c.bf16 %v1966_v22, %v1962_v18  ;;  %v2713_v25 = vpack.c.bf16 %v2206_v23, %v2202_v19  ;;  %v1968_v26 = vpop.f32.mrb[15].mxu1  ;;  %v2208_v27 = vpop.f32.mrb[23].mxu0  ;;  %v2851_v19 = vld [vmem:[%s8544_s11 + $0x70] sm:$0xff] }
 0x684   :  { %v2712_v28 = vpack.c.bf16 %v1968_v26, %v1964_v20  ;;  %v2714_v30 = vpack.c.bf16 %v2208_v27, %v2204_v21  ;;  %v2852_v20 = vld [vmem:[%s8544_s11 + $0x78] sm:$0xff] }
 0x685   :  { %v6104_v21 = vpack.c.bf16 %v2852_v20, %v2851_v19  ;;  %v6628_v19 = vld [vmem:[#allocation18 + $0x100] ss:$8 sps:$4 sm:$0xff]   ;;  %v6630_v20 = vld [vmem:[#allocation18 + $0x104] ss:$8 sps:$4 sm:$0xff]  }
 0x686   :  { %2740 = vmatprep.subr.bf16.mxu1 %v2712_v28 }
 0x687   :  { %2741 = vmatpush1.bf16.msra.mxu1 %v2711_v24 }
 0x688   :  { %2742 = vmatprep.subr.bf16.mxu1 %v2714_v30 }
 0x68b   :  { %2743 = vmatpush1.bf16.msra.mxu1 %v2713_v25 }
 0x6c0   :  { %v2442_v31 = vpop.f32.mrb[16].mxu1  ;;  %v2682_v32 = vpop.f32.mrb[24].mxu0 }
 0x6c1   :  { %v2444_v33 = vpop.f32.mrb[17].mxu1  ;;  %v2684_v29 = vpop.f32.mrb[25].mxu0 }
 0x6c2   :  { %v2446_v34 = vpop.f32.mrb[18].mxu1  ;;  %v2686_v38 = vpop.f32.mrb[26].mxu0 }
 0x6c3   :  { %v2715_v39 = vpack.c.bf16 %v2446_v34, %v2442_v31  ;;  %v2717_v40 = vpack.c.bf16 %v2686_v38, %v2682_v32  ;;  %v2448_v42 = vpop.f32.mrb[19].mxu1  ;;  %v2688_v43 = vpop.f32.mrb[27].mxu0 }
 0x6c4   :  { %v2716_v44 = vpack.c.bf16 %v2448_v42, %v2444_v33  ;;  %v2718_v45 = vpack.c.bf16 %v2688_v43, %v2684_v29 }
 0x6c6   :  { %2744 = vmatprep.subr.bf16.mxu1 %v2716_v44 }
 0x6c7   :  { %2745 = vmatpush1.bf16.msra.mxu1 %v2715_v39 }
 0x6c8   :  { %2746 = vmatprep.subr.bf16.mxu1 %v2718_v45 }
 0x6cb   :  { %2747 = vmatpush1.bf16.msra.mxu1 %v2717_v40 }
 0x6cc   :  { %6107 = vmatprep.subr.bf16.mxu1 %v6074_v11  ;;  %v6098_v11 = vpack.c.bf16 %v2866_v10, %v2865_v9 }
 0x6ce   :  { %5558 = vmatmul.mubr.msk.bf16.vlgmr.msra.gmra.mrb[20].mxu1 %vm2733_vm2, %v6623_v46  ;;  %6099 = vmatprep.subr.bf16.mxu0 %v6098_v11 }
 0x6cf   :  { %2782 = vmatprep.mubr.bf16.mxu1 %v7179_v0  ;;  %6109 = vmatpush3.bf16.msra.mxu1 %v6076_v15  ;;  %v2867_v15 = vld [vmem:[%s8544_s11 + $0xf0] sm:$0xff] }
 0x6d0   :  { %6111 = vmatprep.subr.bf16.mxu1 %v6078_v17  ;;  %6101 = vmatpush3.bf16.msra.mxu0 %v6100_v14  ;;  %v2868_v17 = vld [vmem:[%s8544_s11 + $0xf8] sm:$0xff] }
 0x6d1   :  { %v6102_v18 = vpack.c.bf16 %v2868_v17, %v2867_v15  ;;  %v6138_v15 = vpack.c.bf16 %v3022_v7, %v3020_v12  ;;  %v3021_v17 = vld [vmem:[%s8545_s12 + $0x10] sm:$0xff]  ;;  %v6645_v7 = vld [vmem:[#allocation18 + $0x34] ss:$8 sps:$4 sm:$0xff]  }
 0x6d2   :  { %v6637_v12 = vld [vmem:[#allocation18 + $0x20] ss:$8 sps:$4 sm:$0xff]  }
 0x6d3   :  { %6113 = vmatpush3.bf16.msra.mxu1 %v6080_v50  ;;  %6103 = vmatprep.subr.bf16.mxu0 %v6102_v18 }
 0x6d4   :  { %6115 = vmatprep.subr.bf16.mxu1 %v6082_v53  ;;  %6105 = vmatpush3.bf16.msra.mxu0 %v6104_v21 }
 0x6d5   :  { %6139 = vmatprep.subr.bf16.mxu0 %v6138_v15 }
 0x6d6   :  { %5559 = vmatmul.mubr.msk.bf16.gmra.mrb[24].mxu1 %vm2733_vm2, %v6624_v47 }
 0x6d7   :  { %6117 = vmatpush3.bf16.msra.mxu1 %v6084_v56 }
 0x6d8   :  { %6119 = vmatprep.subr.bf16.mxu1 %v6086_v59 }
 0x6db   :  { %6121 = vmatpush3.bf16.msra.mxu1 %v6088_v62 }
 0x6dc   :  { %6123 = vmatprep.subr.bf16.mxu1 %v6090_v2 }
 0x6df   :  { %6125 = vmatpush3.bf16.msra.mxu1 %v6092_v5 }
 0x6e0   :  { %6127 = vmatprep.subr.bf16.mxu1 %v6094_v37 }
 0x6e3   :  { %6129 = vmatpush3.bf16.msra.mxu1 %v6096_v41 }
 0x6e4   :  { %6131 = vmatprep.subr.bf16.mxu1 %v6098_v11 }
 0x6e7   :  { %6133 = vmatpush3.bf16.msra.mxu1 %v6100_v14  ;;  %v3019_v14 = vld [vmem:[%s8545_s12] sm:$0xff] }
 0x6e8   :  { %6135 = vmatprep.subr.bf16.mxu1 %v6102_v18  ;;  %v8216_v18 = vpack.c.bf16 %v3021_v17, %v3019_v14  ;;  %v6643_v14 = vld [vmem:[#allocation18 + $0x30] ss:$8 sps:$4 sm:$0xff]   ;;  %v6649_v17 = vld [vmem:[#allocation18 + $0x40] ss:$8 sps:$4 sm:$0xff]  }
 0x6eb   :  { %6137 = vmatpush3.bf16.msra.mxu1 %v6104_v21  ;;  %v6636_v21 = vld [vmem:[#allocation18 + $0x114] ss:$8 sps:$4 sm:$0xff]  }
 0x6ec   :  { %3662 = vmatprep.subr.bf16.mxu1 %v6630_v20  ;;  %v6663_v20 = vld [vmem:[#allocation18 + $0x64] ss:$8 sps:$4 sm:$0xff]  }
 0x7a1   :  { %v8163_v22 = vpop.f32.mrb[20].mxu1 }
 0x7a2   :  { %v8165_v23 = vpop.f32.mrb[21].mxu1  ;;  %v2811_v25 = vmul.f32 %v8163_v22, %v8163_v22 }
 0x7a3   :  { %v8167_v24 = vpop.f32.mrb[22].mxu1  ;;  %v2812_v30 = vmul.f32 %v8165_v23, %v8165_v23 }
 0x7a4   :  { %v2793_v26 = vadd.f32 %v8167_v24, %v8163_v22  ;;  %v2813_v27 = vmul.f32 %v8167_v24, %v8167_v24  ;;  %v8175_v28 = vpop.f32.mrb[23].mxu1 }
 0x7a5   :  { %v2802_v31 = vadd.f32 %v8175_v28, %v8165_v23  ;;  %v2814_v32 = vmul.f32 %v8175_v28, %v8175_v28 }
 0x7a6   :  { %v2819_v33 = vadd.f32 %v2813_v27, %v2811_v25  ;;  %v6634_v25 = vld [vmem:[#allocation18 + $0x110] ss:$8 sps:$4 sm:$0xff]   ;;  %v6640_v27 = vld [vmem:[#allocation18 + $0x120] ss:$8 sps:$4 sm:$0xff]  }
 0x7a7   :  { %v2828_v29 = vadd.f32 %v2814_v32, %v2812_v30  ;;  %v6648_v30 = vld [vmem:[#allocation18 + $0x134] ss:$8 sps:$4 sm:$0xff]   ;;  %v6654_v32 = vld [vmem:[#allocation18 + $0x144] ss:$8 sps:$4 sm:$0xff]  }
 0x7a9   :  { %v8183_v34 = vpop.f32.mrb[24].mxu1 }
 0x7aa   :  { %v2794_v38 = vadd.f32 %v2793_v26, %v8183_v34  ;;  %v2815_v39 = vmul.f32 %v8183_v34, %v8183_v34  ;;  %v8188_v40 = vpop.f32.mrb[25].mxu1  ;;  %v6642_v26 = vld [vmem:[#allocation18 + $0x124] ss:$8 sps:$4 sm:$0xff]  }
 0x7ab   :  { %v2803_v42 = vadd.f32 %v2802_v31, %v8188_v40  ;;  %v2816_v43 = vmul.f32 %v8188_v40, %v8188_v40  ;;  %v8193_v44 = vpop.f32.mrb[26].mxu1  ;;  %v6646_v31 = vld [vmem:[#allocation18 + $0x130] ss:$8 sps:$4 sm:$0xff]  }
 0x7ac   :  { %v2820_v45 = vadd.f32 %v2819_v33, %v2815_v39  ;;  %v2795_v46 = vadd.f32 %v2794_v38, %v8193_v44  ;;  %v2817_v47 = vmul.f32 %v8193_v44, %v8193_v44  ;;  %v8198_v48 = vpop.f32.mrb[27].mxu1  ;;  %v6652_v33 = vld [vmem:[#allocation18 + $0x140] ss:$8 sps:$4 sm:$0xff]   ;;  %v6658_v38 = vld [vmem:[#allocation18 + $0x150] ss:$8 sps:$4 sm:$0xff]  }
 0x7ad   :  { %v2829_v49 = vadd.f32 %v2828_v29, %v2816_v43  ;;  %v2804_v50 = vadd.f32 %v2803_v42, %v8198_v48  ;;  %v2818_v51 = vmul.f32 %v8198_v48, %v8198_v48  ;;  %v6660_v29 = vld [vmem:[#allocation18 + $0x154] ss:$8 sps:$4 sm:$0xff]   ;;  %v6666_v39 = vld [vmem:[#allocation18 + $0x164] ss:$8 sps:$4 sm:$0xff]   ;;  %v6664_v42 = vld [vmem:[#allocation18 + $0x160] ss:$8 sps:$4 sm:$0xff]  }
 0x7ae   :  { %v2796_v52 = vrot.slane %v2795_v46, 4  ;;  %v2821_v53 = vadd.f32 %v2820_v45, %v2817_v47  ;;  %v6672_v43 = vld [vmem:[#allocation18 + $0x174] ss:$8 sps:$4 sm:$0xff]   ;;  %v6670_v45 = vld [vmem:[#allocation18 + $0x170] ss:$8 sps:$4 sm:$0xff]  }
 0x7af   :  { %v2805_v54 = vrot.slane %v2804_v50, 4  ;;  %v2830_v55 = vadd.f32 %v2829_v49, %v2818_v51  ;;  %v6676_v47 = vld [vmem:[#allocation18 + $0x180] ss:$8 sps:$4 sm:$0xff]   ;;  %v6684_v49 = vld [vmem:[#allocation18 + $0x194] ss:$8 sps:$4 sm:$0xff]  }
 0x7b0   :  { %v2797_v56 = vadd.f32 %v2796_v52, %v2795_v46  ;;  %v2822_v57 = vrot.slane %v2821_v53, 4  ;;  %v6678_v46 = vld [vmem:[#allocation18 + $0x184] ss:$8 sps:$4 sm:$0xff]   ;;  %v6688_v52 = vld [vmem:[#allocation18 + $0x1a0] ss:$8 sps:$4 sm:$0xff]  }
 0x7b1   :  { %v2806_v58 = vadd.f32 %v2805_v54, %v2804_v50  ;;  %v2831_v59 = vrot.slane %v2830_v55, 4  ;;  %v6682_v50 = vld [vmem:[#allocation18 + $0x190] ss:$8 sps:$4 sm:$0xff]   ;;  %v6690_v51 = vld [vmem:[#allocation18 + $0x1a4] ss:$8 sps:$4 sm:$0xff]  }
 0x7b2   :  { %v2798_v60 = vrot.slane %v2797_v56, 2  ;;  %v2823_v61 = vadd.f32 %v2822_v57, %v2821_v53  ;;  %v6696_v53 = vld [vmem:[#allocation18 + $0x1b4] ss:$8 sps:$4 sm:$0xff]   ;;  %v6694_v54 = vld [vmem:[#allocation18 + $0x1b0] ss:$8 sps:$4 sm:$0xff]  }
 0x7b3   :  { %v2807_v62 = vrot.slane %v2806_v58, 2  ;;  %v2832_v63 = vadd.f32 %v2831_v59, %v2830_v55  ;;  %v6702_v55 = vld [vmem:[#allocation18 + $0x1c4] ss:$8 sps:$4 sm:$0xff]  }
 0x7b4   :  { %v2799_v1 = vadd.f32 %v2798_v60, %v2797_v56  ;;  %v2824_v2 = vrot.slane %v2823_v61, 2  ;;  %v6700_v56 = vld [vmem:[#allocation18 + $0x1c0] ss:$8 sps:$4 sm:$0xff]  }
 0x7b5   :  { %v2808_v3 = vadd.f32 %v2807_v62, %v2806_v58  ;;  %v2833_v4 = vrot.slane %v2832_v63, 2 }
 0x7b6   :  { %v2825_v5 = vadd.f32 %v2824_v2, %v2823_v61  ;;  %v2800_v6 = vrot.slane %v2799_v1, 1 }
 0x7b7   :  { %v2809_v35 = vrot.slane %v2808_v3, 1  ;;  %v2834_v37 = vadd.f32 %v2833_v4, %v2832_v63  ;;  %v3012_v4 = vld [vmem:[#allocation14] sm:$0x1] }
 0x7b8   :  { %v2826_v36 = vrot.slane %v2825_v5, 1  ;;  %v2801_v9 = vadd.f32 %v2800_v6, %v2799_v1 }
 0x7b9   :  { %v2810_v8 = vadd.f32 %v2809_v35, %v2808_v3  ;;  %v2835_v41 = vrot.slane %v2834_v37, 1  ;;  %v6627_v35 = vld [vmem:[#allocation18 + $0x4] ss:$8 sps:$4 sm:$0xff]  }
 0x7ba   :  { %v2827_v11 = vadd.f32 %v2826_v36, %v2825_v5 }
 0x7bb   :  { %2933 = vmatprep.mubr.f32.mxu0 %v2810_v8  ;;  %v2836_v10 = vadd.f32 %v2835_v41, %v2834_v37  ;;  %v3016_v37 = vld [vmem:[#allocation15] sm:$0x1]  ;;  %v6625_v8 = vld [vmem:[#allocation18] ss:$8 sps:$4 sm:$0xff]  }
 0x7bc   :  { %2934 = vmatmul.mubr.f32.vlgmr.msra.gmra.mrb[28].mxu0 %v2801_v9  ;;  %v6633_v9 = vld [vmem:[#allocation18 + $0x14] ss:$8 sps:$4 sm:$0xff]  }
 0x7bd   :  { %3003 = vmatprep.mubr.f32.mxu1 %v2836_v10  ;;  %3091 = vmatprep.mubr.f32.mxu0 %v7180_v16  ;;  %v6631_v10 = vld [vmem:[#allocation18 + $0x10] ss:$8 sps:$4 sm:$0xff]  }
 0x7be   :  { %3004 = vmatmul.mubr.f32.vlgmr.msra.gmra.mrb[28].mxu1 %v2827_v11  ;;  %6141 = vmatpush1.bf16.msra.mxu0 %v8216_v18  ;;  %v6639_v11 = vld [vmem:[#allocation18 + $0x24] ss:$8 sps:$4 sm:$0xff]  }
 0x7bf   :  { %6143 = vmatprep.subr.bf16.mxu0 %v6138_v15  ;;  %3663 = vmatpush1.bf16.msra.mxu1 %v6628_v19  ;;  %v6651_v15 = vld [vmem:[#allocation18 + $0x44] ss:$8 sps:$4 sm:$0xff]   ;;  %v6655_v19 = vld [vmem:[#allocation18 + $0x50] ss:$8 sps:$4 sm:$0xff]  }
 0x7c0   :  { %3664 = vmatprep.subr.bf16.mxu1 %v6636_v21  ;;  %v6661_v21 = vld [vmem:[#allocation18 + $0x60] ss:$8 sps:$4 sm:$0xff]  }
 0x7c3   :  { %3665 = vmatpush1.bf16.msra.mxu1 %v6634_v25  ;;  %v6669_v25 = vld [vmem:[#allocation18 + $0x74] ss:$8 sps:$4 sm:$0xff]  }
 0x7c4   :  { %3666 = vmatprep.subr.bf16.mxu1 %v6642_v26  ;;  %v6667_v26 = vld [vmem:[#allocation18 + $0x70] ss:$8 sps:$4 sm:$0xff]  }
 0x7c7   :  { %3667 = vmatpush1.bf16.msra.mxu1 %v6640_v27  ;;  %v6675_v27 = vld [vmem:[#allocation18 + $0x84] ss:$8 sps:$4 sm:$0xff]  }
 0x7c8   :  { %3668 = vmatprep.subr.bf16.mxu1 %v6648_v30  ;;  %v6673_v30 = vld [vmem:[#allocation18 + $0x80] ss:$8 sps:$4 sm:$0xff]  }
 0x7cb   :  { %3669 = vmatpush1.bf16.msra.mxu1 %v6646_v31  ;;  %v6681_v31 = vld [vmem:[#allocation18 + $0x94] ss:$8 sps:$4 sm:$0xff]  }
 0x7cc   :  { %3670 = vmatprep.subr.bf16.mxu1 %v6654_v32  ;;  %v6679_v32 = vld [vmem:[#allocation18 + $0x90] ss:$8 sps:$4 sm:$0xff]  }
 0x7cf   :  { %3671 = vmatpush1.bf16.msra.mxu1 %v6652_v33  ;;  %v6687_v33 = vld [vmem:[#allocation18 + $0xa4] ss:$8 sps:$4 sm:$0xff]  }
 0x7d0   :  { %3672 = vmatprep.subr.bf16.mxu1 %v6660_v29  ;;  %v6685_v29 = vld [vmem:[#allocation18 + $0xa0] ss:$8 sps:$4 sm:$0xff]  }
 0x7d3   :  { %3673 = vmatpush1.bf16.msra.mxu1 %v6658_v38  ;;  %v6693_v38 = vld [vmem:[#allocation18 + $0xb4] ss:$8 sps:$4 sm:$0xff]  }
 0x7d4   :  { %3674 = vmatprep.subr.bf16.mxu1 %v6666_v39  ;;  %v6691_v39 = vld [vmem:[#allocation18 + $0xb0] ss:$8 sps:$4 sm:$0xff]  }
 0x7d7   :  { %3675 = vmatpush1.bf16.msra.mxu1 %v6664_v42  ;;  %v6699_v42 = vld [vmem:[#allocation18 + $0xc4] ss:$8 sps:$4 sm:$0xff]  }
 0x7d8   :  { %3676 = vmatprep.subr.bf16.mxu1 %v6672_v43  ;;  %v6697_v43 = vld [vmem:[#allocation18 + $0xc0] ss:$8 sps:$4 sm:$0xff]  }
 0x7db   :  { %3677 = vmatpush1.bf16.msra.mxu1 %v6670_v45  ;;  %v6705_v45 = vld [vmem:[#allocation18 + $0xd4] ss:$8 sps:$4 sm:$0xff]  }
 0x7dc   :  { %3678 = vmatprep.subr.bf16.mxu1 %v6678_v46  ;;  %v6708_v46 = vld [vmem:[#allocation18 + $0x1d4] ss:$8 sps:$4 sm:$0xff]  }
 0x7df   :  { %3679 = vmatpush1.bf16.msra.mxu1 %v6676_v47  ;;  %v6703_v47 = vld [vmem:[#allocation18 + $0xd0] ss:$8 sps:$4 sm:$0xff]  }
 0x7e0   :  { %3680 = vmatprep.subr.bf16.mxu1 %v6684_v49  ;;  %v6706_v49 = vld [vmem:[#allocation18 + $0x1d0] ss:$8 sps:$4 sm:$0xff]  }
 0x7e3   :  { %3681 = vmatpush1.bf16.msra.mxu1 %v6682_v50  ;;  %v6711_v50 = vld [vmem:[#allocation18 + $0xe4] ss:$8 sps:$4 sm:$0xff]  }
 0x7e4   :  { %3682 = vmatprep.subr.bf16.mxu1 %v6690_v51  ;;  %v6714_v51 = vld [vmem:[#allocation18 + $0x1e4] ss:$8 sps:$4 sm:$0xff]  }
 0x7e7   :  { %3683 = vmatpush1.bf16.msra.mxu1 %v6688_v52  ;;  %v6709_v52 = vld [vmem:[#allocation18 + $0xe0] ss:$8 sps:$4 sm:$0xff]  }
 0x7e8   :  { %3684 = vmatprep.subr.bf16.mxu1 %v6696_v53  ;;  %v6712_v53 = vld [vmem:[#allocation18 + $0x1e0] ss:$8 sps:$4 sm:$0xff]  }
 0x7eb   :  { %3685 = vmatpush1.bf16.msra.mxu1 %v6694_v54  ;;  %v6717_v54 = vld [vmem:[#allocation18 + $0xf4] ss:$8 sps:$4 sm:$0xff]  }
 0x7ec   :  { %3686 = vmatprep.subr.bf16.mxu1 %v6702_v55  ;;  %v6720_v55 = vld [vmem:[#allocation18 + $0x1f4] ss:$8 sps:$4 sm:$0xff]  }
 0x7ef   :  { %3687 = vmatpush1.bf16.msra.mxu1 %v6700_v56  ;;  %v6715_v56 = vld [vmem:[#allocation18 + $0xf0] ss:$8 sps:$4 sm:$0xff]  }
 0x7f0   :  { %3688 = vmatprep.subr.bf16.mxu1 %v6708_v46  ;;  %v6739_v46 = vld [vmem:[#allocation18 + $0x230] ss:$8 sps:$4 sm:$0xff]  }
 0x7f3   :  { %3689 = vmatpush1.bf16.msra.mxu1 %v6706_v49  ;;  %v6747_v49 = vld [vmem:[#allocation18 + $0x244] ss:$8 sps:$4 sm:$0xff]  }
 0x7f4   :  { %3690 = vmatprep.subr.bf16.mxu1 %v6714_v51  ;;  %v6745_v51 = vld [vmem:[#allocation18 + $0x240] ss:$8 sps:$4 sm:$0xff]  }
 0x7f7   :  { %3691 = vmatpush1.bf16.msra.mxu1 %v6712_v53  ;;  %v6753_v53 = vld [vmem:[#allocation18 + $0x254] ss:$8 sps:$4 sm:$0xff]  }
 0x7f8   :  { %3692 = vmatprep.subr.bf16.mxu1 %v6720_v55  ;;  %v6751_v55 = vld [vmem:[#allocation18 + $0x250] ss:$8 sps:$4 sm:$0xff]  }
 0x88f   :  { %v5822_v57 = vpop.f32.mrb[28].mxu0 }
 0x890   :  { %v5823_v58 = vpop.f32.mrb[29].mxu0 }
 0x891   :  { %v5824_v59 = vadd.f32 %v5823_v58, %v5822_v57  ;;  %v5857_v60 = vpop.f32.mrb[28].mxu1  ;;  %v6718_v57 = vld [vmem:[#allocation18 + $0x1f0] ss:$8 sps:$4 sm:$0xff]   ;;  %v6723_v58 = vld [vmem:[#allocation18 + $0x204] ss:$8 sps:$4 sm:$0xff]  }
 0x892   :  { %v5858_v61 = vpop.f32.mrb[29].mxu1  ;;  %3693 = vmatpush1.bf16.msra.mxu1 %v6718_v57  ;;  %v6759_v57 = vld [vmem:[#allocation18 + $0x264] ss:$8 sps:$4 sm:$0xff]  }
 0x893   :  { %v3009_v62 = vmul.f32 %v5824_v59, %v5824_v59  ;;  %v5859_v63 = vadd.f32 %v5858_v61, %v5857_v60 }
 0x895   :  { %v3010_v1 = vsub.f32 %v5859_v63, %v3009_v62 }
 0x897   :  { %v3011_v2 = vmax.f32 %v3010_v1, 0.0 }
 0x899   :  { %v3013_v3 = vadd.f32 1e-05, %v3011_v2 }
 0x89b   :  { %6843 = vrsqrt.f32 %v3013_v3 }
 0x8a5   :  { %v6844_v5 = vpop.eup %6843 }
 0x8a6   :  { %v3015_v6 = vmul.f32 %v6844_v5, %v3012_v4 }
 0x8a8   :  { %5560 = vmatmul.mubr.msk.f32.vlgmr.msra.gmra.mrb[30].mxu0 %vm3023_vm3, %v3015_v6  ;;  %v3017_v36 = vmul.f32 %v5824_v59, %v3015_v6  ;;  %v6726_v59 = vld [vmem:[#allocation18 + $0x304] ss:$8 sps:$4 sm:$0xff]  }
 0x8a9   :  { %6145 = vmatpush1.bf16.msra.mxu0 %v8216_v18  ;;  %3165 = vmatprep.mubr.f32.mxu0 %v7180_v16  ;;  %v6657_v18 = vld [vmem:[#allocation18 + $0x54] ss:$8 sps:$4 sm:$0xff]  }
 0x8aa   :  { %v3018_v41 = vsub.f32 %v3016_v37, %v3017_v36  ;;  %3408 = vmatprep.subr.bf16.mxu0 %v6627_v35  ;;  %4170 = vmatprep.subr.bf16.mxu1 %v6726_v59  ;;  %v6757_v59 = vld [vmem:[#allocation18 + $0x260] ss:$8 sps:$4 sm:$0xff]  }
 0x8ac   :  { %5561 = vmatmul.mubr.msk.f32.vlgmr.msra.gmra.mrb[32].mxu0 %vm3023_vm3, %v3018_v41 }
 0x8ad   :  { %3409 = vmatpush1.bf16.msra.mxu0 %v6625_v8 }
 0x8ae   :  { %3410 = vmatprep.subr.bf16.mxu0 %v6633_v9 }
 0x8b1   :  { %3411 = vmatpush1.bf16.msra.mxu0 %v6631_v10 }
 0x8b2   :  { %3412 = vmatprep.subr.bf16.mxu0 %v6639_v11 }
 0x8b5   :  { %3413 = vmatpush1.bf16.msra.mxu0 %v6637_v12 }
 0x8b6   :  { %3414 = vmatprep.subr.bf16.mxu0 %v6645_v7 }
 0x8b9   :  { %3415 = vmatpush1.bf16.msra.mxu0 %v6643_v14 }
 0x8ba   :  { %3416 = vmatprep.subr.bf16.mxu0 %v6651_v15 }
 0x8bd   :  { %3417 = vmatpush1.bf16.msra.mxu0 %v6649_v17 }
 0x8be   :  { %3418 = vmatprep.subr.bf16.mxu0 %v6657_v18 }
 0x8c1   :  { %3419 = vmatpush1.bf16.msra.mxu0 %v6655_v19 }
 0x8c2   :  { %3420 = vmatprep.subr.bf16.mxu0 %v6663_v20 }
 0x8c5   :  { %3421 = vmatpush1.bf16.msra.mxu0 %v6661_v21 }
 0x8c6   :  { %3422 = vmatprep.subr.bf16.mxu0 %v6669_v25  ;;  %v6721_v25 = vld [vmem:[#allocation18 + $0x200] ss:$8 sps:$4 sm:$0xff]  }
 0x8c9   :  { %3423 = vmatpush1.bf16.msra.mxu0 %v6667_v26  ;;  %v6724_v26 = vld [vmem:[#allocation18 + $0x300] ss:$8 sps:$4 sm:$0xff]  }
 0x8ca   :  { %3424 = vmatprep.subr.bf16.mxu0 %v6675_v27 }
 0x8cd   :  { %3425 = vmatpush1.bf16.msra.mxu0 %v6673_v30  ;;  %v6729_v30 = vld [vmem:[#allocation18 + $0x214] ss:$8 sps:$4 sm:$0xff]  }
 0x8ce   :  { %3426 = vmatprep.subr.bf16.mxu0 %v6681_v31  ;;  %v6732_v31 = vld [vmem:[#allocation18 + $0x314] ss:$8 sps:$4 sm:$0xff]  }
 0x8d1   :  { %3427 = vmatpush1.bf16.msra.mxu0 %v6679_v32  ;;  %v6727_v32 = vld [vmem:[#allocation18 + $0x210] ss:$8 sps:$4 sm:$0xff]  }
 0x8d2   :  { %3428 = vmatprep.subr.bf16.mxu0 %v6687_v33  ;;  %v6730_v33 = vld [vmem:[#allocation18 + $0x310] ss:$8 sps:$4 sm:$0xff]  }
 0x8d5   :  { %3429 = vmatpush1.bf16.msra.mxu0 %v6685_v29  ;;  %v6735_v29 = vld [vmem:[#allocation18 + $0x224] ss:$8 sps:$4 sm:$0xff]  }
 0x8d6   :  { %3430 = vmatprep.subr.bf16.mxu0 %v6693_v38  ;;  %v6738_v38 = vld [vmem:[#allocation18 + $0x324] ss:$8 sps:$4 sm:$0xff]  }
 0x8d9   :  { %3431 = vmatpush1.bf16.msra.mxu0 %v6691_v39  ;;  %v6733_v39 = vld [vmem:[#allocation18 + $0x220] ss:$8 sps:$4 sm:$0xff]  }
 0x8da   :  { %3432 = vmatprep.subr.bf16.mxu0 %v6699_v42  ;;  %v6736_v42 = vld [vmem:[#allocation18 + $0x320] ss:$8 sps:$4 sm:$0xff]  }
 0x8dd   :  { %3433 = vmatpush1.bf16.msra.mxu0 %v6697_v43  ;;  %v6741_v43 = vld [vmem:[#allocation18 + $0x234] ss:$8 sps:$4 sm:$0xff]  }
 0x8de   :  { %3434 = vmatprep.subr.bf16.mxu0 %v6705_v45  ;;  %v6744_v45 = vld [vmem:[#allocation18 + $0x334] ss:$8 sps:$4 sm:$0xff]  }
 0x8e1   :  { %3435 = vmatpush1.bf16.msra.mxu0 %v6703_v47  ;;  %v6742_v47 = vld [vmem:[#allocation18 + $0x330] ss:$8 sps:$4 sm:$0xff]  }
 0x8e2   :  { %3436 = vmatprep.subr.bf16.mxu0 %v6711_v50  ;;  %v6750_v50 = vld [vmem:[#allocation18 + $0x344] ss:$8 sps:$4 sm:$0xff]  }
 0x8e5   :  { %3437 = vmatpush1.bf16.msra.mxu0 %v6709_v52  ;;  %v6748_v52 = vld [vmem:[#allocation18 + $0x340] ss:$8 sps:$4 sm:$0xff]  }
 0x8e6   :  { %3438 = vmatprep.subr.bf16.mxu0 %v6717_v54  ;;  %v6756_v54 = vld [vmem:[#allocation18 + $0x354] ss:$8 sps:$4 sm:$0xff]  }
 0x8e9   :  { %3439 = vmatpush1.bf16.msra.mxu0 %v6715_v56  ;;  %v6754_v56 = vld [vmem:[#allocation18 + $0x350] ss:$8 sps:$4 sm:$0xff]  }
 0x8ea   :  { %3916 = vmatprep.subr.bf16.mxu0 %v6723_v58  ;;  %v6762_v58 = vld [vmem:[#allocation18 + $0x364] ss:$8 sps:$4 sm:$0xff]  }
 0x97b   :  { %v3093_v60 = vpop.f32.mrb[30].mxu0 }
 0x97c   :  { %v3175_v61 = vrot.slane %v3093_v60, %v7705_v13  ;;  %v3095_v62 = vpop.f32.mrb[31].mxu0  ;;  %v6760_v60 = vld [vmem:[#allocation18 + $0x360] ss:$8 sps:$4 sm:$0xff]  }
 0x97d   :  { %v3179_v63 = vrot.slane %v3095_v62, %v7705_v13  ;;  %v6768_v62 = vld [vmem:[#allocation18 + $0x374] ss:$8 sps:$4 sm:$0xff]  }
 0x97e   :  { %v3180_v1 = vmul.f32 %v3175_v61, %v8163_v22  ;;  %v3182_v2 = vmul.f32 %v3175_v61, %v8167_v24  ;;  %v3184_v3 = vmul.f32 %v3175_v61, %v8183_v34  ;;  %v3186_v4 = vmul.f32 %v3175_v61, %v8193_v44  ;;  %v6765_v61 = vld [vmem:[#allocation18 + $0x274] ss:$8 sps:$4 sm:$0xff]  }
 0x97f   :  { %v3181_v5 = vmul.f32 %v3179_v63, %v8165_v23  ;;  %v3183_v6 = vmul.f32 %v3179_v63, %v8175_v28  ;;  %v3185_v35 = vmul.f32 %v3179_v63, %v8188_v40  ;;  %v3187_v37 = vmul.f32 %v3179_v63, %v8198_v48  ;;  %v3167_v36 = vpop.f32.mrb[32].mxu0  ;;  %v6763_v63 = vld [vmem:[#allocation18 + $0x270] ss:$8 sps:$4 sm:$0xff]  }
 0x980   :  { %v3191_v8 = vrot.slane %v3167_v36, %v7705_v13  ;;  %v3169_v41 = vpop.f32.mrb[33].mxu0  ;;  %v6778_v36 = vld [vmem:[#allocation18 + $0x390] ss:$8 sps:$4 sm:$0xff]  }
 0x981   :  { %v3195_v22 = vrot.slane %v3169_v41, %v7705_v13  ;;  %v6786_v41 = vld [vmem:[#allocation18 + $0x3a4] ss:$8 sps:$4 sm:$0xff]  }
 0x982   :  { %v3196_v9 = vadd.f32 %v3191_v8, %v3180_v1  ;;  %v3198_v24 = vadd.f32 %v3191_v8, %v3182_v2  ;;  %v3200_v10 = vadd.f32 %v3191_v8, %v3184_v3  ;;  %v3202_v34 = vadd.f32 %v3191_v8, %v3186_v4  ;;  %v6766_v1 = vld [vmem:[#allocation18 + $0x370] ss:$8 sps:$4 sm:$0xff]   ;;  %v6771_v2 = vld [vmem:[#allocation18 + $0x284] ss:$8 sps:$4 sm:$0xff]   ;;  %v6769_v4 = vld [vmem:[#allocation18 + $0x280] ss:$8 sps:$4 sm:$0xff]  }
 0x983   :  { %v3197_v11 = vadd.f32 %v3195_v22, %v3181_v5  ;;  %v3199_v44 = vadd.f32 %v3195_v22, %v3183_v6  ;;  %v3201_v12 = vadd.f32 %v3195_v22, %v3185_v35  ;;  %v3203_v23 = vadd.f32 %v3195_v22, %v3187_v37  ;;  %v6774_v3 = vld [vmem:[#allocation18 + $0x384] ss:$8 sps:$4 sm:$0xff]   ;;  %v6772_v5 = vld [vmem:[#allocation18 + $0x380] ss:$8 sps:$4 sm:$0xff]   ;;  %v6777_v6 = vld [vmem:[#allocation18 + $0x294] ss:$8 sps:$4 sm:$0xff]  }
 0x984   :  { %v3204_v7 = vmax.f32 %v3196_v9, 0.0  ;;  %v3206_v28 = vmax.f32 %v3198_v24, 0.0  ;;  %v3208_v14 = vmax.f32 %v3200_v10, 0.0  ;;  %v3210_v40 = vmax.f32 %v3202_v34, 0.0  ;;  %v6780_v35 = vld [vmem:[#allocation18 + $0x394] ss:$8 sps:$4 sm:$0xff]  }
 0x985   :  { %v3205_v15 = vmax.f32 %v3197_v11, 0.0  ;;  %v3207_v48 = vmax.f32 %v3199_v44, 0.0  ;;  %v3209_v17 = vmax.f32 %v3201_v12, 0.0  ;;  %v3211_v18 = vmax.f32 %v3203_v23, 0.0  ;;  %v6775_v37 = vld [vmem:[#allocation18 + $0x290] ss:$8 sps:$4 sm:$0xff]  }
 0x986   :  { %v8233_v19 = vpack.c.bf16 %v3206_v28, %v3204_v7  ;;  %v8235_v20 = vpack.c.bf16 %v3210_v40, %v3208_v14  ;;  %v6783_v8 = vld [vmem:[#allocation18 + $0x2a4] ss:$8 sps:$4 sm:$0xff]   ;;  %v6781_v22 = vld [vmem:[#allocation18 + $0x2a0] ss:$8 sps:$4 sm:$0xff]   ;;  %v6789_v24 = vld [vmem:[#allocation18 + $0x2b4] ss:$8 sps:$4 sm:$0xff]  }
 0x987   :  { %v3213_v21 = vpack.c.bf16 %v3207_v48, %v3205_v15  ;;  %v8237_v27 = vpack.c.bf16 %v3211_v18, %v3209_v17  ;;  %v6784_v9 = vld [vmem:[#allocation18 + $0x3a0] ss:$8 sps:$4 sm:$0xff]   ;;  %v6792_v10 = vld [vmem:[#allocation18 + $0x3b4] ss:$8 sps:$4 sm:$0xff]   ;;  %v6787_v34 = vld [vmem:[#allocation18 + $0x2b0] ss:$8 sps:$4 sm:$0xff]  }
 0x988   :  { %v6790_v11 = vld [vmem:[#allocation18 + $0x3b0] ss:$8 sps:$4 sm:$0xff]   ;;  %v6795_v44 = vld [vmem:[#allocation18 + $0x2c4] ss:$8 sps:$4 sm:$0xff]   ;;  %v6793_v23 = vld [vmem:[#allocation18 + $0x2c0] ss:$8 sps:$4 sm:$0xff]  }
 0x989   :  { %3440 = vmatprep.mubr.bf16.mxu0 %v3213_v21  ;;  %3694 = vmatprep.mubr.bf16.mxu1 %v3213_v21  ;;  %v6798_v12 = vld [vmem:[#allocation18 + $0x3c4] ss:$8 sps:$4 sm:$0xff]   ;;  %v6796_v7 = vld [vmem:[#allocation18 + $0x3c0] ss:$8 sps:$4 sm:$0xff]   ;;  %v6801_v28 = vld [vmem:[#allocation18 + $0x2d4] ss:$8 sps:$4 sm:$0xff]  }
 0x98a   :  { %3441 = vmatmul.mubr.bf16.vlgmr.msra.gmra.mrb[36].mxu0 %v8233_v19  ;;  %3695 = vmatmul.mubr.bf16.vlgmr.msra.gmra.mrb[32].mxu1 %v8233_v19  ;;  %v6804_v14 = vld [vmem:[#allocation18 + $0x3d4] ss:$8 sps:$4 sm:$0xff]   ;;  %v6799_v40 = vld [vmem:[#allocation18 + $0x2d0] ss:$8 sps:$4 sm:$0xff]   ;;  %v6807_v48 = vld [vmem:[#allocation18 + $0x2e4] ss:$8 sps:$4 sm:$0xff]  }
 0x98b   :  { %3917 = vmatpush1.bf16.msra.mxu0 %v6721_v25  ;;  %4171 = vmatpush1.bf16.msra.mxu1 %v6724_v26  ;;  %v6802_v15 = vld [vmem:[#allocation18 + $0x3d0] ss:$8 sps:$4 sm:$0xff]   ;;  %v6810_v17 = vld [vmem:[#allocation18 + $0x3e4] ss:$8 sps:$4 sm:$0xff]   ;;  %v6805_v18 = vld [vmem:[#allocation18 + $0x2e0] ss:$8 sps:$4 sm:$0xff]  }
 0x98c   :  { %3450 = vmatprep.mubr.bf16.mxu0 %v8237_v27  ;;  %3704 = vmatprep.mubr.bf16.mxu1 %v8237_v27  ;;  %v6813_v25 = vld [vmem:[#allocation18 + $0x2f4] ss:$8 sps:$4 sm:$0xff]  }
 0x98d   :  { %3918 = vmatprep.subr.bf16.mxu0 %v6729_v30  ;;  %4172 = vmatprep.subr.bf16.mxu1 %v6732_v31  ;;  %v6816_v26 = vld [vmem:[#allocation18 + $0x3f4] ss:$8 sps:$4 sm:$0xff]   ;;  %v6811_v30 = vld [vmem:[#allocation18 + $0x2f0] ss:$8 sps:$4 sm:$0xff]  }
 0x98e   :  { %v6814_v31 = vld [vmem:[#allocation18 + $0x3f0] ss:$8 sps:$4 sm:$0xff]  }
 0x98f   :  { %3919 = vmatpush1.bf16.msra.mxu0 %v6727_v32  ;;  %4173 = vmatpush1.bf16.msra.mxu1 %v6730_v33 }
 0x990   :  { %3920 = vmatprep.subr.bf16.mxu0 %v6735_v29  ;;  %4174 = vmatprep.subr.bf16.mxu1 %v6738_v38 }
 0x992   :  { %3451 = vmatmul.mubr.bf16.gmra.mrb[40].mxu0 %v8235_v20  ;;  %3705 = vmatmul.mubr.bf16.gmra.mrb[36].mxu1 %v8235_v20 }
 0x993   :  { %3921 = vmatpush1.bf16.msra.mxu0 %v6733_v39  ;;  %4175 = vmatpush1.bf16.msra.mxu1 %v6736_v42 }
 0x994   :  { %3948 = vmatprep.mubr.bf16.mxu0 %v3213_v21  ;;  %4202 = vmatprep.mubr.bf16.mxu1 %v3213_v21  ;;  %v6808_v21 = vld [vmem:[#allocation18 + $0x3e0] ss:$8 sps:$4 sm:$0xff]  }
 0x995   :  { %3922 = vmatprep.subr.bf16.mxu0 %v6741_v43  ;;  %4176 = vmatprep.subr.bf16.mxu1 %v6744_v45 }
 0x997   :  { %3923 = vmatpush1.bf16.msra.mxu0 %v6739_v46  ;;  %4177 = vmatpush1.bf16.msra.mxu1 %v6742_v47 }
 0x998   :  { %3924 = vmatprep.subr.bf16.mxu0 %v6747_v49  ;;  %4178 = vmatprep.subr.bf16.mxu1 %v6750_v50 }
 0x99b   :  { %3925 = vmatpush1.bf16.msra.mxu0 %v6745_v51  ;;  %4179 = vmatpush1.bf16.msra.mxu1 %v6748_v52 }
 0x99c   :  { %3926 = vmatprep.subr.bf16.mxu0 %v6753_v53  ;;  %4180 = vmatprep.subr.bf16.mxu1 %v6756_v54 }
 0x99f   :  { %3927 = vmatpush1.bf16.msra.mxu0 %v6751_v55  ;;  %4181 = vmatpush1.bf16.msra.mxu1 %v6754_v56 }
 0x9a0   :  { %3928 = vmatprep.subr.bf16.mxu0 %v6759_v57  ;;  %4182 = vmatprep.subr.bf16.mxu1 %v6762_v58 }
 0x9a3   :  { %3929 = vmatpush1.bf16.msra.mxu0 %v6757_v59  ;;  %4183 = vmatpush1.bf16.msra.mxu1 %v6760_v60 }
 0x9a4   :  { %3930 = vmatprep.subr.bf16.mxu0 %v6765_v61  ;;  %4184 = vmatprep.subr.bf16.mxu1 %v6768_v62 }
 0x9a7   :  { %3931 = vmatpush1.bf16.msra.mxu0 %v6763_v63  ;;  %4185 = vmatpush1.bf16.msra.mxu1 %v6766_v1 }
 0x9a8   :  { %3932 = vmatprep.subr.bf16.mxu0 %v6771_v2  ;;  %4186 = vmatprep.subr.bf16.mxu1 %v6774_v3 }
 0x9ab   :  { %3933 = vmatpush1.bf16.msra.mxu0 %v6769_v4  ;;  %4187 = vmatpush1.bf16.msra.mxu1 %v6772_v5 }
 0x9ac   :  { %3934 = vmatprep.subr.bf16.mxu0 %v6777_v6  ;;  %4188 = vmatprep.subr.bf16.mxu1 %v6780_v35 }
 0x9af   :  { %3935 = vmatpush1.bf16.msra.mxu0 %v6775_v37  ;;  %4189 = vmatpush1.bf16.msra.mxu1 %v6778_v36 }
 0x9b0   :  { %3936 = vmatprep.subr.bf16.mxu0 %v6783_v8  ;;  %4190 = vmatprep.subr.bf16.mxu1 %v6786_v41 }
 0x9b3   :  { %3937 = vmatpush1.bf16.msra.mxu0 %v6781_v22  ;;  %4191 = vmatpush1.bf16.msra.mxu1 %v6784_v9 }
 0x9b4   :  { %3938 = vmatprep.subr.bf16.mxu0 %v6789_v24  ;;  %4192 = vmatprep.subr.bf16.mxu1 %v6792_v10 }
 0x9b7   :  { %3939 = vmatpush1.bf16.msra.mxu0 %v6787_v34  ;;  %4193 = vmatpush1.bf16.msra.mxu1 %v6790_v11 }
 0x9b8   :  { %3940 = vmatprep.subr.bf16.mxu0 %v6795_v44  ;;  %4194 = vmatprep.subr.bf16.mxu1 %v6798_v12 }
 0x9bb   :  { %3941 = vmatpush1.bf16.msra.mxu0 %v6793_v23  ;;  %4195 = vmatpush1.bf16.msra.mxu1 %v6796_v7  ;;  %v6817_v7 = vld [vmem:[#allocation17] sm:$0xff]  }
 0x9bc   :  { %3942 = vmatprep.subr.bf16.mxu0 %v6801_v28  ;;  %4196 = vmatprep.subr.bf16.mxu1 %v6804_v14  ;;  %v6818_v28 = vld [vmem:[#allocation17 + $0x8] sm:$0xff]   ;;  %v6819_v14 = vld [vmem:[#allocation17 + $0x10] sm:$0xff]  }
 0x9bf   :  { %3943 = vmatpush1.bf16.msra.mxu0 %v6799_v40  ;;  %4197 = vmatpush1.bf16.msra.mxu1 %v6802_v15  ;;  %v6820_v40 = vld [vmem:[#allocation17 + $0x18] sm:$0xff]   ;;  %v4468_v15 = vld [vmem:[%s8550_s17 + $0x80] sm:$0xff] }
 0x9c0   :  { %3944 = vmatprep.subr.bf16.mxu0 %v6807_v48  ;;  %4198 = vmatprep.subr.bf16.mxu1 %v6810_v17  ;;  %v4469_v48 = vld [vmem:[%s8550_s17 + $0x88] sm:$0xff] }
 0x9c1   :  { %v6146_v17 = vpack.c.bf16 %v4469_v48, %v4468_v15 }
 0x9c3   :  { %3945 = vmatpush1.bf16.msra.mxu0 %v6805_v18  ;;  %4199 = vmatpush1.bf16.msra.mxu1 %v6808_v21  ;;  %v4452_v18 = vld [vmem:[%s8550_s17] sm:$0xff]  ;;  %v4453_v21 = vld [vmem:[%s8550_s17 + $0x8] sm:$0xff] }
 0x9c4   :  { %3946 = vmatprep.subr.bf16.mxu0 %v6813_v25  ;;  %4200 = vmatprep.subr.bf16.mxu1 %v6816_v26  ;;  %v4470_v25 = vld [vmem:[%s8550_s17 + $0x90] sm:$0xff]  ;;  %v4471_v26 = vld [vmem:[%s8550_s17 + $0x98] sm:$0xff] }
 0x9c7   :  { %3947 = vmatpush1.bf16.msra.mxu0 %v6811_v30  ;;  %4201 = vmatpush1.bf16.msra.mxu1 %v6814_v31  ;;  %v6150_v30 = vpack.c.bf16 %v4471_v26, %v4470_v25  ;;  %v4454_v31 = vld [vmem:[%s8550_s17 + $0x10] sm:$0xff] }
 0x9c8   :  { %6147 = vmatprep.subr.bf16.mxu1 %v6146_v17 }
 0x9ca   :  { %3949 = vmatmul.mubr.bf16.vlgmr.msra.gmra.mrb[44].mxu0 %v8233_v19  ;;  %4203 = vmatmul.mubr.bf16.vlgmr.msra.gmra.mrb[40].mxu1 %v8233_v19 }
 0x9cb   :  { %3958 = vmatprep.mubr.bf16.mxu0 %v8237_v27  ;;  %4212 = vmatprep.mubr.bf16.mxu1 %v8237_v27 }
 0x9d2   :  { %3959 = vmatmul.mubr.bf16.gmra.mrb[48].mxu0 %v8235_v20  ;;  %4213 = vmatmul.mubr.bf16.gmra.mrb[44].mxu1 %v8235_v20 }
 0x9d3   :  { %4343 = vmatprep.mubr.bf16.mxu0 %v7179_v0 }
 0xa5d   :  { %v3442_v32 = vpop.f32.mrb[36].mxu0  ;;  %v3696_v33 = vpop.f32.mrb[32].mxu1 }
 0xa5e   :  { %v3444_v29 = vpop.f32.mrb[37].mxu0  ;;  %v3698_v38 = vpop.f32.mrb[33].mxu1 }
 0xa5f   :  { %v3446_v39 = vpop.f32.mrb[38].mxu0  ;;  %v3700_v42 = vpop.f32.mrb[34].mxu1 }
 0xa60   :  { %v4263_v43 = vpack.c.bf16 %v3446_v39, %v3442_v32  ;;  %v4267_v45 = vpack.c.bf16 %v3700_v42, %v3696_v33  ;;  %v3448_v46 = vpop.f32.mrb[39].mxu0  ;;  %v3702_v19 = vpop.f32.mrb[35].mxu1  ;;  %v4455_v32 = vld [vmem:[%s8550_s17 + $0x18] sm:$0xff]  ;;  %v4456_v42 = vld [vmem:[%s8550_s17 + $0x20] sm:$0xff] }
 0xa61   :  { %v4264_v47 = vpack.c.bf16 %v3448_v46, %v3444_v29  ;;  %v4268_v49 = vpack.c.bf16 %v3702_v19, %v3698_v38  ;;  %v6152_v33 = vpack.c.bf16 %v4455_v32, %v4454_v31  ;;  %v4472_v29 = vld [vmem:[%s8550_s17 + $0xa0] sm:$0xff]  ;;  %v4473_v38 = vld [vmem:[%s8550_s17 + $0xa8] sm:$0xff]  ;;  %v4474_v46 = vld [vmem:[%s8550_s17 + $0xb0] sm:$0xff] }
 0xa62   :  { %v6154_v39 = vpack.c.bf16 %v4473_v38, %v4472_v29  ;;  %v4475_v19 = vld [vmem:[%s8550_s17 + $0xb8] sm:$0xff] }
 0xa63   :  { %4311 = vmatprep.subr.bf16.mxu0 %v4264_v47  ;;  %v6158_v47 = vpack.c.bf16 %v4475_v19, %v4474_v46 }
 0xa64   :  { %4312 = vmatpush1.bf16.msra.mxu0 %v4263_v43  ;;  %v4457_v43 = vld [vmem:[%s8550_s17 + $0x28] sm:$0xff] }
 0xa65   :  { %v3452_v27 = vpop.f32.mrb[40].mxu0  ;;  %v3706_v50 = vpop.f32.mrb[36].mxu1 }
 0xa66   :  { %v3454_v51 = vpop.f32.mrb[41].mxu0  ;;  %v3708_v20 = vpop.f32.mrb[37].mxu1 }
 0xa67   :  { %v3456_v52 = vpop.f32.mrb[42].mxu0  ;;  %v3710_v53 = vpop.f32.mrb[38].mxu1 }
 0xa68   :  { %v4265_v54 = vpack.c.bf16 %v3456_v52, %v3452_v27  ;;  %v4269_v55 = vpack.c.bf16 %v3710_v53, %v3706_v50  ;;  %v3458_v56 = vpop.f32.mrb[43].mxu0  ;;  %v3712_v57 = vpop.f32.mrb[39].mxu1  ;;  %v4459_v27 = vld [vmem:[%s8550_s17 + $0x38] sm:$0xff]  ;;  %v4460_v53 = vld [vmem:[%s8550_s17 + $0x40] sm:$0xff] }
 0xa69   :  { %v4266_v58 = vpack.c.bf16 %v3458_v56, %v3454_v51  ;;  %v4270_v59 = vpack.c.bf16 %v3712_v57, %v3708_v20  ;;  %v4476_v51 = vld [vmem:[%s8550_s17 + $0xc0] sm:$0xff]  ;;  %v4477_v20 = vld [vmem:[%s8550_s17 + $0xc8] sm:$0xff]  ;;  %v4478_v56 = vld [vmem:[%s8550_s17 + $0xd0] sm:$0xff] }
 0xa6a   :  { %v6162_v52 = vpack.c.bf16 %v4477_v20, %v4476_v51  ;;  %v4479_v57 = vld [vmem:[%s8550_s17 + $0xd8] sm:$0xff] }
 0xa6b   :  { %4313 = vmatprep.subr.bf16.mxu0 %v4266_v58  ;;  %v6166_v58 = vpack.c.bf16 %v4479_v57, %v4478_v56 }
 0xa6c   :  { %4314 = vmatpush1.bf16.msra.mxu0 %v4265_v54  ;;  %v4461_v54 = vld [vmem:[%s8550_s17 + $0x48] sm:$0xff] }
 0xa6d   :  { %4315 = vmatprep.subr.bf16.mxu0 %v4268_v49  ;;  %v4458_v49 = vld [vmem:[%s8550_s17 + $0x30] sm:$0xff] }
 0xa6e   :  { %v6160_v50 = vpack.c.bf16 %v4459_v27, %v4458_v49 }
 0xa70   :  { %4316 = vmatpush1.bf16.msra.mxu0 %v4267_v45  ;;  %v6156_v45 = vpack.c.bf16 %v4457_v43, %v4456_v42 }
 0xa71   :  { %4317 = vmatprep.subr.bf16.mxu0 %v4270_v59  ;;  %v4462_v59 = vld [vmem:[%s8550_s17 + $0x50] sm:$0xff] }
 0xa74   :  { %4318 = vmatpush1.bf16.msra.mxu0 %v4269_v55  ;;  %v6164_v55 = vpack.c.bf16 %v4461_v54, %v4460_v53 }
 0xa9d   :  { %v3950_v60 = vpop.f32.mrb[44].mxu0  ;;  %v4204_v61 = vpop.f32.mrb[40].mxu1 }
 0xa9e   :  { %v3952_v62 = vpop.f32.mrb[45].mxu0  ;;  %v4206_v63 = vpop.f32.mrb[41].mxu1 }
 0xa9f   :  { %v3954_v1 = vpop.f32.mrb[46].mxu0  ;;  %v4208_v2 = vpop.f32.mrb[42].mxu1 }
 0xaa0   :  { %v4271_v3 = vpack.c.bf16 %v3954_v1, %v3950_v60  ;;  %v4275_v4 = vpack.c.bf16 %v4208_v2, %v4204_v61  ;;  %v3956_v5 = vpop.f32.mrb[47].mxu0  ;;  %v4210_v6 = vpop.f32.mrb[43].mxu1  ;;  %v4463_v60 = vld [vmem:[%s8550_s17 + $0x58] sm:$0xff]  ;;  %v4464_v2 = vld [vmem:[%s8550_s17 + $0x60] sm:$0xff] }
 0xaa1   :  { %v4272_v35 = vpack.c.bf16 %v3956_v5, %v3952_v62  ;;  %v4276_v37 = vpack.c.bf16 %v4210_v6, %v4206_v63  ;;  %v6168_v61 = vpack.c.bf16 %v4463_v60, %v4462_v59  ;;  %v4480_v62 = vld [vmem:[%s8550_s17 + $0xe0] sm:$0xff]  ;;  %v4481_v63 = vld [vmem:[%s8550_s17 + $0xe8] sm:$0xff]  ;;  %v4482_v5 = vld [vmem:[%s8550_s17 + $0xf0] sm:$0xff] }
 0xaa2   :  { %v6170_v1 = vpack.c.bf16 %v4481_v63, %v4480_v62  ;;  %v4483_v6 = vld [vmem:[%s8550_s17 + $0xf8] sm:$0xff] }
 0xaa3   :  { %4319 = vmatprep.subr.bf16.mxu0 %v4272_v35  ;;  %v6174_v35 = vpack.c.bf16 %v4483_v6, %v4482_v5 }
 0xaa4   :  { %4320 = vmatpush1.bf16.msra.mxu0 %v4271_v3  ;;  %v4465_v3 = vld [vmem:[%s8550_s17 + $0x68] sm:$0xff] }
 0xaa5   :  { %v3960_v36 = vpop.f32.mrb[48].mxu0  ;;  %v4214_v8 = vpop.f32.mrb[44].mxu1 }
 0xaa6   :  { %v3962_v41 = vpop.f32.mrb[49].mxu0  ;;  %v4216_v22 = vpop.f32.mrb[45].mxu1 }
 0xaa7   :  { %v3964_v9 = vpop.f32.mrb[50].mxu0  ;;  %v4218_v24 = vpop.f32.mrb[46].mxu1 }
 0xaa8   :  { %v4273_v10 = vpack.c.bf16 %v3964_v9, %v3960_v36  ;;  %v4277_v34 = vpack.c.bf16 %v4218_v24, %v4214_v8  ;;  %v3966_v11 = vpop.f32.mrb[51].mxu0  ;;  %v4220_v44 = vpop.f32.mrb[47].mxu1  ;;  %v4467_v36 = vld [vmem:[%s8550_s17 + $0x78] sm:$0xff] }
 0xaa9   :  { %v4274_v12 = vpack.c.bf16 %v3966_v11, %v3962_v41  ;;  %v4278_v23 = vpack.c.bf16 %v4220_v44, %v4216_v22 }
 0xaab   :  { %4321 = vmatprep.subr.bf16.mxu0 %v4274_v12 }
 0xaac   :  { %4322 = vmatpush1.bf16.msra.mxu0 %v4273_v10 }
 0xaad   :  { %4323 = vmatprep.subr.bf16.mxu0 %v4276_v37  ;;  %v4466_v37 = vld [vmem:[%s8550_s17 + $0x70] sm:$0xff] }
 0xaae   :  { %v6176_v8 = vpack.c.bf16 %v4467_v36, %v4466_v37 }
 0xab0   :  { %4324 = vmatpush1.bf16.msra.mxu0 %v4275_v4  ;;  %v6172_v4 = vpack.c.bf16 %v4465_v3, %v4464_v2 }
 0xab1   :  { %4325 = vmatprep.subr.bf16.mxu0 %v4278_v23 }
 0xab4   :  { %4326 = vmatpush1.bf16.msra.mxu0 %v4277_v34 }
 0xab5   :  { %6179 = vmatprep.subr.bf16.mxu0 %v6146_v17 }
 0xab7   :  { %4344 = vmatmul.mubr.bf16.vlgmr.msra.gmra.mrb[52].mxu0 %v6817_v7 }
 0xab8   :  { %4353 = vmatprep.mubr.bf16.mxu0 %v7179_v0 }
 0xabf   :  { %4354 = vmatmul.mubr.bf16.gmra.mrb[56].mxu0 %v6818_v28 }
 0xac0   :  { %4363 = vmatprep.mubr.bf16.mxu0 %v7179_v0 }
 0xac7   :  { %4364 = vmatmul.mubr.bf16.gmra.mrb[60].mxu0 %v6819_v14 }
 0xac8   :  { %4373 = vmatprep.mubr.bf16.mxu0 %v7179_v0  ;;  %v6148_v0 = vpack.c.bf16 %v4453_v21, %v4452_v18 }
 0xaca   :  { %6149 = vmatpush3.bf16.msra.mxu1 %v6148_v0  ;;  %6181 = vmatpush3.bf16.msra.mxu0 %v6148_v0 }
 0xacb   :  { %6151 = vmatprep.subr.bf16.mxu1 %v6150_v30  ;;  %6183 = vmatprep.subr.bf16.mxu0 %v6150_v30 }
 0xace   :  { %6153 = vmatpush3.bf16.msra.mxu1 %v6152_v33  ;;  %6185 = vmatpush3.bf16.msra.mxu0 %v6152_v33 }
 0xacf   :  { %4374 = vmatmul.mubr.bf16.gmra.mrb[64].mxu0 %v6820_v40  ;;  %6155 = vmatprep.subr.bf16.mxu1 %v6154_v39 }
 0xad0   :  { %6187 = vmatprep.subr.bf16.mxu0 %v6154_v39 }
 0xad2   :  { %6157 = vmatpush3.bf16.msra.mxu1 %v6156_v45  ;;  %6189 = vmatpush3.bf16.msra.mxu0 %v6156_v45 }
 0xad3   :  { %6159 = vmatprep.subr.bf16.mxu1 %v6158_v47  ;;  %6191 = vmatprep.subr.bf16.mxu0 %v6158_v47 }
 0xad6   :  { %6161 = vmatpush3.bf16.msra.mxu1 %v6160_v50  ;;  %6193 = vmatpush3.bf16.msra.mxu0 %v6160_v50 }
 0xad7   :  { %6163 = vmatprep.subr.bf16.mxu1 %v6162_v52  ;;  %6195 = vmatprep.subr.bf16.mxu0 %v6162_v52 }
 0xada   :  { %6165 = vmatpush3.bf16.msra.mxu1 %v6164_v55  ;;  %6197 = vmatpush3.bf16.msra.mxu0 %v6164_v55 }
 0xadb   :  { %6167 = vmatprep.subr.bf16.mxu1 %v6166_v58  ;;  %6199 = vmatprep.subr.bf16.mxu0 %v6166_v58 }
 0xade   :  { %6169 = vmatpush3.bf16.msra.mxu1 %v6168_v61  ;;  %6201 = vmatpush3.bf16.msra.mxu0 %v6168_v61 }
 0xadf   :  { %6171 = vmatprep.subr.bf16.mxu1 %v6170_v1  ;;  %6203 = vmatprep.subr.bf16.mxu0 %v6170_v1 }
 0xae2   :  { %6173 = vmatpush3.bf16.msra.mxu1 %v6172_v4  ;;  %6205 = vmatpush3.bf16.msra.mxu0 %v6172_v4 }
 0xae3   :  { %6175 = vmatprep.subr.bf16.mxu1 %v6174_v35  ;;  %6207 = vmatprep.subr.bf16.mxu0 %v6174_v35 }
 0xae6   :  { %6177 = vmatpush3.bf16.msra.mxu1 %v6176_v8  ;;  %6209 = vmatpush3.bf16.msra.mxu0 %v6176_v8 }
 0xb8a   :  { %v8351_v41 = vpop.f32.mrb[52].mxu0 }
 0xb8b   :  { %v8353_v22 = vpop.f32.mrb[53].mxu0  ;;  %v4410_v24 = vmul.f32 %v8351_v41, %v8351_v41 }
 0xb8c   :  { %v8355_v9 = vpop.f32.mrb[54].mxu0  ;;  %v4411_v44 = vmul.f32 %v8353_v22, %v8353_v22 }
 0xb8d   :  { %v4384_v10 = vadd.f32 %v8355_v9, %v8351_v41  ;;  %v4412_v34 = vmul.f32 %v8355_v9, %v8355_v9  ;;  %v8363_v11 = vpop.f32.mrb[55].mxu0 }
 0xb8e   :  { %v4397_v12 = vadd.f32 %v8363_v11, %v8353_v22  ;;  %v4413_v23 = vmul.f32 %v8363_v11, %v8363_v11 }
 0xb8f   :  { %v4426_v7 = vadd.f32 %v4412_v34, %v4410_v24 }
 0xb90   :  { %v4439_v28 = vadd.f32 %v4413_v23, %v4411_v44 }
 0xb92   :  { %v8371_v14 = vpop.f32.mrb[56].mxu0 }
 0xb93   :  { %v4385_v40 = vadd.f32 %v4384_v10, %v8371_v14  ;;  %v4414_v15 = vmul.f32 %v8371_v14, %v8371_v14  ;;  %v8376_v48 = vpop.f32.mrb[57].mxu0 }
 0xb94   :  { %v4398_v17 = vadd.f32 %v4397_v12, %v8376_v48  ;;  %v4415_v18 = vmul.f32 %v8376_v48, %v8376_v48  ;;  %v8381_v21 = vpop.f32.mrb[58].mxu0 }
 0xb95   :  { %v4427_v0 = vadd.f32 %v4426_v7, %v4414_v15  ;;  %v4386_v25 = vadd.f32 %v4385_v40, %v8381_v21  ;;  %v4416_v26 = vmul.f32 %v8381_v21, %v8381_v21  ;;  %v8386_v30 = vpop.f32.mrb[59].mxu0 }
 0xb96   :  { %v4440_v31 = vadd.f32 %v4439_v28, %v4415_v18  ;;  %v4399_v32 = vadd.f32 %v4398_v17, %v8386_v30  ;;  %v4417_v33 = vmul.f32 %v8386_v30, %v8386_v30 }
 0xb97   :  { %v4428_v29 = vadd.f32 %v4427_v0, %v4416_v26 }
 0xb98   :  { %v4441_v38 = vadd.f32 %v4440_v31, %v4417_v33 }
 0xb9a   :  { %v8391_v39 = vpop.f32.mrb[60].mxu0 }
 0xb9b   :  { %v4387_v42 = vadd.f32 %v4386_v25, %v8391_v39  ;;  %v4418_v43 = vmul.f32 %v8391_v39, %v8391_v39  ;;  %v8396_v45 = vpop.f32.mrb[61].mxu0 }
 0xb9c   :  { %v4400_v46 = vadd.f32 %v4399_v32, %v8396_v45  ;;  %v4419_v19 = vmul.f32 %v8396_v45, %v8396_v45  ;;  %v8401_v47 = vpop.f32.mrb[62].mxu0 }
 0xb9d   :  { %v4429_v49 = vadd.f32 %v4428_v29, %v4418_v43  ;;  %v4388_v27 = vadd.f32 %v4387_v42, %v8401_v47  ;;  %v4420_v50 = vmul.f32 %v8401_v47, %v8401_v47  ;;  %v8406_v51 = vpop.f32.mrb[63].mxu0 }
 0xb9e   :  { %v4442_v20 = vadd.f32 %v4441_v38, %v4419_v19  ;;  %v4401_v52 = vadd.f32 %v4400_v46, %v8406_v51  ;;  %v4421_v53 = vmul.f32 %v8406_v51, %v8406_v51  ;;  %v4635_v46 = vld [vmem:[#allocation20 + $0x8] sm:$0xff]  ;;  %v4634_v19 = vld [vmem:[#allocation20] sm:$0xff] }
 0xb9f   :  { %v4430_v54 = vadd.f32 %v4429_v49, %v4420_v50  ;;  %4640 = vmatprep.subr.mxu1 %v4635_v46 }
 0xba0   :  { %v4443_v55 = vadd.f32 %v4442_v20, %v4421_v53 }
 0xba2   :  { %v8411_v56 = vpop.f32.mrb[64].mxu0 }
 0xba3   :  { %v4389_v57 = vadd.f32 %v4388_v27, %v8411_v56  ;;  %v4422_v58 = vmul.f32 %v8411_v56, %v8411_v56  ;;  %v8416_v59 = vpop.f32.mrb[65].mxu0 }
 0xba4   :  { %v4402_v60 = vadd.f32 %v4401_v52, %v8416_v59  ;;  %v4423_v61 = vmul.f32 %v8416_v59, %v8416_v59  ;;  %v8421_v62 = vpop.f32.mrb[66].mxu0 }
 0xba5   :  { %v4431_v63 = vadd.f32 %v4430_v54, %v4422_v58  ;;  %v4390_v1 = vadd.f32 %v4389_v57, %v8421_v62  ;;  %v4424_v2 = vmul.f32 %v8421_v62, %v8421_v62  ;;  %v8426_v3 = vpop.f32.mrb[67].mxu0 }
 0xba6   :  { %v4444_v4 = vadd.f32 %v4443_v55, %v4423_v61  ;;  %v4403_v5 = vadd.f32 %v4402_v60, %v8426_v3  ;;  %v4425_v6 = vmul.f32 %v8426_v3, %v8426_v3  ;;  %v4627_v60 = vld [vmem:[%s8552_s19] sm:$0x1] }
 0xba7   :  { %v4391_v35 = vrot.slane %v4390_v1, 4  ;;  %v4432_v37 = vadd.f32 %v4431_v63, %v4424_v2  ;;  %v4631_v2 = vld [vmem:[%s8553_s20] sm:$0x1] }
 0xba8   :  { %v4404_v36 = vrot.slane %v4403_v5, 4  ;;  %v4445_v8 = vadd.f32 %v4444_v4, %v4425_v6 }
 0xba9   :  { %v4392_v24 = vadd.f32 %v4391_v35, %v4390_v1  ;;  %v4433_v10 = vrot.slane %v4432_v37, 4  ;;  %v6821_v1 = vld [vmem:[%s8555_s22 + $0x40] sm:$0xff]   ;;  %v6823_v35 = vld [vmem:[%s8555_s22 + $0x48] sm:$0xff]  }
 0xbaa   :  { %v4405_v34 = vadd.f32 %v4404_v36, %v4403_v5  ;;  %v4446_v44 = vrot.slane %v4445_v8, 4  ;;  %v6822_v5 = vld [vmem:[%s8555_s22] sm:$0xff]   ;;  %v6826_v36 = vld [vmem:[%s8555_s22 + $0x10] sm:$0xff]  }
 0xbab   :  { %v4393_v12 = vrot.slane %v4392_v24, 2  ;;  %v4434_v23 = vadd.f32 %v4433_v10, %v4432_v37  ;;  %v6824_v37 = vld [vmem:[%s8555_s22 + $0x8] sm:$0xff]   ;;  %v6829_v10 = vld [vmem:[%s8555_s22 + $0x60] sm:$0xff]  }
 0xbac   :  { %v4406_v7 = vrot.slane %v4405_v34, 2  ;;  %v4447_v28 = vadd.f32 %v4446_v44, %v4445_v8  ;;  %v6827_v8 = vld [vmem:[%s8555_s22 + $0x58] sm:$0xff]   ;;  %v6831_v44 = vld [vmem:[%s8555_s22 + $0x68] sm:$0xff]  }
 0xbad   :  { %v4394_v40 = vadd.f32 %v4393_v12, %v4392_v24  ;;  %v4435_v15 = vrot.slane %v4434_v23, 2  ;;  %v6828_v24 = vld [vmem:[%s8555_s22 + $0x18] sm:$0xff]   ;;  %v6832_v12 = vld [vmem:[%s8555_s22 + $0x28] sm:$0xff]  }
 0xbae   :  { %v4407_v17 = vadd.f32 %v4406_v7, %v4405_v34  ;;  %v4448_v18 = vrot.slane %v4447_v28, 2  ;;  %v6830_v34 = vld [vmem:[%s8555_s22 + $0x20] sm:$0xff]   ;;  %v6834_v7 = vld [vmem:[%s8555_s22 + $0x30] sm:$0xff]  }
 0xbaf   :  { %v4395_v0 = vrot.slane %v4394_v40, 1  ;;  %v4436_v25 = vadd.f32 %v4435_v15, %v4434_v23  ;;  %v6833_v23 = vld [vmem:[%s8555_s22 + $0x70] sm:$0xff]  }
 0xbb0   :  { %v4408_v26 = vrot.slane %v4407_v17, 1  ;;  %v4449_v31 = vadd.f32 %v4448_v18, %v4447_v28  ;;  %v6835_v28 = vld [vmem:[%s8555_s22 + $0x78] sm:$0xff]  }
 0xbb1   :  { %v4437_v32 = vrot.slane %v4436_v25, 1  ;;  %v4396_v38 = vadd.f32 %v4395_v0, %v4394_v40  ;;  %v6836_v40 = vld [vmem:[%s8555_s22 + $0x38] sm:$0xff]  }
 0xbb2   :  { %v4409_v33 = vadd.f32 %v4408_v26, %v4407_v17  ;;  %v4450_v29 = vrot.slane %v4449_v31, 1 }
 0xbb3   :  { %v4438_v43 = vadd.f32 %v4437_v32, %v4436_v25 }
 0xbb4   :  { %4548 = vmatprep.mubr.f32.mxu1 %v4409_v33  ;;  %v4451_v42 = vadd.f32 %v4450_v29, %v4449_v31 }
 0xbb5   :  { %4549 = vmatmul.mubr.f32.vlgmr.msra.gmra.mrb[30].mxu1 %v4396_v38 }
 0xbb6   :  { %4618 = vmatprep.mubr.f32.mxu0 %v4451_v42  ;;  %4704 = vmatprep.mubr.f32.mxu1 %v7180_v16 }
 0xbb7   :  { %4619 = vmatmul.mubr.f32.vlgmr.msra.gmra.mrb[34].mxu0 %v4438_v43  ;;  %4641 = vmatpush1.msra.mxu1 %v4634_v19 }
 0xbb8   :  { %4714 = vmatprep.subr.mxu1 %v4635_v46 }
 0xc88   :  { %v5892_v49 = vpop.f32.mrb[30].mxu1 }
 0xc89   :  { %v5893_v27 = vpop.f32.mrb[31].mxu1 }
 0xc8a   :  { %v5894_v50 = vadd.f32 %v5893_v27, %v5892_v49  ;;  %v5927_v20 = vpop.f32.mrb[34].mxu0 }
 0xc8b   :  { %v5928_v52 = vpop.f32.mrb[35].mxu0 }
 0xc8c   :  { %v4624_v53 = vmul.f32 %v5894_v50, %v5894_v50  ;;  %v5929_v54 = vadd.f32 %v5928_v52, %v5927_v20 }
 0xc8e   :  { %v4625_v55 = vsub.f32 %v5929_v54, %v4624_v53 }
 0xc90   :  { %v4626_v57 = vmax.f32 %v4625_v55, 0.0 }
 0xc92   :  { %v4628_v58 = vadd.f32 1e-05, %v4626_v57 }
 0xc94   :  { %6845 = vrsqrt.f32 %v4628_v58 }
 0xc9e   :  { %v6846_v61 = vpop.eup %6845 }
 0xc9f   :  { %v4630_v63 = vmul.f32 %v6846_v61, %v4627_v60 }
 0xca1   :  { %5694 = vmatmul.mubr.msk.f32.vlgmr.msra.gmra.mrb[48].mxu1 %vm4636_vm4, %v4630_v63  ;;  %v4632_v4 = vmul.f32 %v5894_v50, %v4630_v63 }
 0xca2   :  { %4715 = vmatpush1.msra.mxu1 %v4634_v19  ;;  %4778 = vmatprep.mubr.f32.mxu1 %v7180_v16  ;;  %v6825_v16 = vld [vmem:[%s8555_s22 + $0x50] sm:$0xff]   ;;  %s7181_s22 = smov [#allocation23]  }
 0xca3   :  { %v4633_v6 = vsub.f32 %v4631_v2, %v4632_v4  ;;  %5930 = vmatprep.subr.bf16.mxu1 %v6821_v1  ;;  %s5175_s19 = sshll.u32 %s7181_s22, 4  ;;  %s5176_s19 = int_to_ptr.vmem [resolvable:$true] %s5175_s19 }
 0xca4   :  { %s7125_s16 = scalar_lea.vmem %s5176_s19, 896  ;;  %p7130_p13 = scmp.lt.s32.totalorder %s5176_s19, %s5176_s19 }
 0xca5   :  { %5695 = vmatmul.mubr.msk.f32.vlgmr.msra.gmra.mrb[50].mxu1 %vm4636_vm4, %v4633_v6  ;;  %p7126_p12 = scmp.ne.s32.totalorder %s5176_s19, %s7125_s16  ;;  %p7131_p0 = scmp.lt.s32.totalorder %s7125_s16, %s7125_s16 }
 0xca6   :  { %5931 = vmatpush3.bf16.msra.mxu1 %v6822_v5 }
 0xca7   :  { %5932 = vmatprep.subr.bf16.mxu1 %v6823_v35  ;;  %p7132_p1 = por %p7131_p0, %p7130_p13 }
 0xca9   :  { %p7133_p2 = pnand %p7132_p1, %p7126_p12 }
 0xcaa   :  { %5933 = vmatpush3.bf16.msra.mxu1 %v6824_v37 }
 0xcab   :  { %5934 = vmatprep.subr.bf16.mxu1 %v6825_v16 }
 0xcae   :  { %5935 = vmatpush3.bf16.msra.mxu1 %v6826_v36 }
 0xcaf   :  { %5936 = vmatprep.subr.bf16.mxu1 %v6827_v8 }
 0xcb2   :  { %5937 = vmatpush3.bf16.msra.mxu1 %v6828_v24 }
 0xcb3   :  { %5938 = vmatprep.subr.bf16.mxu1 %v6829_v10 }
 0xcb6   :  { %5939 = vmatpush3.bf16.msra.mxu1 %v6830_v34 }
 0xcb7   :  { %5940 = vmatprep.subr.bf16.mxu1 %v6831_v44 }
 0xcba   :  { %5941 = vmatpush3.bf16.msra.mxu1 %v6832_v12 }
 0xcbb   :  { %5942 = vmatprep.subr.bf16.mxu1 %v6833_v23 }
 0xcbe   :  { %5943 = vmatpush3.bf16.msra.mxu1 %v6834_v7 }
 0xcbf   :  { %5944 = vmatprep.subr.bf16.mxu1 %v6835_v28 }
 0xcc2   :  { %5945 = vmatpush3.bf16.msra.mxu1 %v6836_v40 }
 0xd74   :  { %v4706_v15 = vpop.f32.mrb[48].mxu1 }
 0xd75   :  { %v4788_v17 = vrot.slane %v4706_v15, %v7705_v13  ;;  %v4708_v18 = vpop.f32.mrb[49].mxu1 }
 0xd76   :  { %v4792_v0 = vrot.slane %v4708_v18, %v7705_v13 }
 0xd77   :  { %v4793_v25 = vmul.f32 %v4788_v17, %v8351_v41  ;;  %v4795_v26 = vmul.f32 %v4788_v17, %v8355_v9  ;;  %v4797_v31 = vmul.f32 %v4788_v17, %v8371_v14  ;;  %v4799_v32 = vmul.f32 %v4788_v17, %v8381_v21 }
 0xd78   :  { %v4780_v33 = vpop.f32.mrb[50].mxu1  ;;  %v4794_v29 = vmul.f32 %v4792_v0, %v8353_v22  ;;  %v4796_v38 = vmul.f32 %v4792_v0, %v8363_v11  ;;  %v4798_v42 = vmul.f32 %v4792_v0, %v8376_v48  ;;  %v4800_v43 = vmul.f32 %v4792_v0, %v8386_v30 }
 0xd79   :  { %v4812_v46 = vrot.slane %v4780_v33, %v7705_v13  ;;  %v4782_v19 = vpop.f32.mrb[51].mxu1  ;;  %v4802_v41 = vmul.f32 %v4792_v0, %v8396_v45  ;;  %v4804_v9 = vmul.f32 %v4792_v0, %v8406_v51  ;;  %v4801_v14 = vmul.f32 %v4788_v17, %v8391_v39 }
 0xd7a   :  { %v4816_v21 = vrot.slane %v4782_v19, %v7705_v13  ;;  %v4803_v49 = vmul.f32 %v4788_v17, %v8401_v47  ;;  %v4806_v22 = vmul.f32 %v4792_v0, %v8416_v59  ;;  %v4808_v11 = vmul.f32 %v4792_v0, %v8426_v3 }
 0xd7b   :  { %v4817_v48 = vadd.f32 %v4812_v46, %v4793_v25  ;;  %v4819_v27 = vadd.f32 %v4812_v46, %v4795_v26  ;;  %v4821_v30 = vadd.f32 %v4812_v46, %v4797_v31  ;;  %v4823_v50 = vadd.f32 %v4812_v46, %v4799_v32 }
 0xd7c   :  { %v4818_v20 = vadd.f32 %v4816_v21, %v4794_v29  ;;  %v4820_v52 = vadd.f32 %v4816_v21, %v4796_v38  ;;  %v4822_v53 = vadd.f32 %v4816_v21, %v4798_v42  ;;  %v4824_v45 = vadd.f32 %v4816_v21, %v4800_v43 }
 0xd7d   :  { %v4833_v54 = vmax.f32 %v4817_v48, 0.0  ;;  %v4835_v51 = vmax.f32 %v4819_v27, 0.0  ;;  %v4837_v55 = vmax.f32 %v4821_v30, 0.0  ;;  %v4839_v39 = vmax.f32 %v4823_v50, 0.0 }
 0xd7e   :  { %v4834_v57 = vmax.f32 %v4818_v20, 0.0  ;;  %v4836_v13 = vmax.f32 %v4820_v52, 0.0  ;;  %v4838_v58 = vmax.f32 %v4822_v53, 0.0  ;;  %v4840_v47 = vmax.f32 %v4824_v45, 0.0  ;;  %v6838_v45 = vld [vmem:[#allocation21 + $0x8] sm:$0xff]  }
 0xd7f   :  { %v4849_v60 = vpack.c.bf16 %v4835_v51, %v4833_v54  ;;  %v4851_v59 = vpack.c.bf16 %v4839_v39, %v4837_v55  ;;  %v4826_v61 = vadd.f32 %v4816_v21, %v4802_v41  ;;  %v4828_v3 = vadd.f32 %v4816_v21, %v4804_v9  ;;  %v6839_v54 = vld [vmem:[#allocation21 + $0x10] sm:$0xff]   ;;  %v6840_v51 = vld [vmem:[#allocation21 + $0x18] ss:$0 sps:$4 sm:$0xff]  }
 0xd80   :  { %v4850_v63 = vpack.c.bf16 %v4836_v13, %v4834_v57  ;;  %v4852_v1 = vpack.c.bf16 %v4840_v47, %v4838_v58  ;;  %v4825_v2 = vadd.f32 %v4812_v46, %v4801_v14  ;;  %v4827_v4 = vadd.f32 %v4812_v46, %v4803_v49 }
 0xd81   :  { %v4842_v5 = vmax.f32 %v4826_v61, 0.0  ;;  %v4844_v6 = vmax.f32 %v4828_v3, 0.0  ;;  %v4830_v35 = vadd.f32 %v4816_v21, %v4806_v22  ;;  %v4832_v37 = vadd.f32 %v4816_v21, %v4808_v11 }
 0xd82   :  { %5017 = vmatprep.mubr.bf16.mxu1 %v4850_v63  ;;  %v4841_v16 = vmax.f32 %v4825_v2, 0.0  ;;  %v4843_v36 = vmax.f32 %v4827_v4, 0.0  ;;  %v4805_v8 = vmul.f32 %v4788_v17, %v8411_v56  ;;  %v4807_v24 = vmul.f32 %v4788_v17, %v8421_v62  ;;  %v6837_v56 = vld [vmem:[#allocation21] sm:$0xff]  }
 0xd83   :  { %5018 = vmatmul.mubr.bf16.vlgmr.msra.gmra.mrb[52].mxu1 %v4849_v60  ;;  %v4854_v10 = vpack.c.bf16 %v4844_v6, %v4842_v5  ;;  %v4846_v34 = vmax.f32 %v4830_v35, 0.0  ;;  %v4848_v44 = vmax.f32 %v4832_v37, 0.0  ;;  %5986 = vmatprep.mubr.msk.bf16.mxu0 %vm2733_vm2, %v6837_v56 }
 0xd84   :  { %5025 = vmatprep.mubr.bf16.mxu1 %v4852_v1  ;;  %v4853_v12 = vpack.c.bf16 %v4843_v36, %v4841_v16  ;;  %v4829_v23 = vadd.f32 %v4812_v46, %v4805_v8  ;;  %v4831_v7 = vadd.f32 %v4812_v46, %v4807_v24 }
 0xd85   :  { %v4856_v28 = vpack.c.bf16 %v4848_v44, %v4846_v34 }
 0xd86   :  { %v4845_v40 = vmax.f32 %v4829_v23, 0.0  ;;  %v4847_v15 = vmax.f32 %v4831_v7, 0.0 }
 0xd88   :  { %v4855_v18 = vpack.c.bf16 %v4847_v15, %v4845_v40 }
 0xd8b   :  { %5026 = vmatmul.mubr.bf16.gmra.mrb[56].mxu1 %v4851_v59 }
 0xd8c   :  { %5033 = vmatprep.mubr.bf16.mxu1 %v4854_v10 }
 0xd93   :  { %5034 = vmatmul.mubr.bf16.gmra.mrb[60].mxu1 %v4853_v12 }
 0xd94   :  { %5041 = vmatprep.mubr.bf16.mxu1 %v4856_v28 }
 0xd9b   :  { %5042 = vmatmul.mubr.bf16.gmra.mrb[64].mxu1 %v4855_v18 }
 0xe56   :  { %v5946_v62 = vpop.f32.mrb[52].mxu1 }
 0xe57   :  { %v5947_v17 = vpop.f32.mrb[53].mxu1 }
 0xe58   :  { %v5948_v0 = vadd.f32 %v5947_v17, %v5946_v62  ;;  %v5949_v25 = vpop.f32.mrb[54].mxu1 }
 0xe59   :  { %v5950_v26 = vpop.f32.mrb[55].mxu1 }
 0xe5a   :  { %v5951_v31 = vadd.f32 %v5950_v26, %v5949_v25 }
 0xe5c   :  { %v5050_v32 = vpack.c.bf16 %v5951_v31, %v5948_v0 }
 0xe5e   :  { %v5952_v33 = vpop.f32.mrb[56].mxu1  ;;  %5978 = vmatprep.subr.bf16.mxu0 %v5050_v32 }
 0xe5f   :  { %v5953_v29 = vpop.f32.mrb[57].mxu1  ;;  %5979 = vmatpush3.bf16.msra.mxu0 %v5050_v32 }
 0xe60   :  { %v5954_v38 = vadd.f32 %v5953_v29, %v5952_v33  ;;  %v5955_v42 = vpop.f32.mrb[58].mxu1 }
 0xe61   :  { %v5956_v43 = vpop.f32.mrb[59].mxu1 }
 0xe62   :  { %v5957_v46 = vadd.f32 %v5956_v43, %v5955_v42 }
 0xe64   :  { %v5051_v19 = vpack.c.bf16 %v5957_v46, %v5954_v38 }
 0xe66   :  { %v5958_v41 = vpop.f32.mrb[60].mxu1  ;;  %5980 = vmatprep.subr.bf16.mxu0 %v5051_v19 }
 0xe67   :  { %v5959_v9 = vpop.f32.mrb[61].mxu1  ;;  %5981 = vmatpush3.bf16.msra.mxu0 %v5051_v19 }
 0xe68   :  { %v5960_v14 = vadd.f32 %v5959_v9, %v5958_v41  ;;  %v5961_v21 = vpop.f32.mrb[62].mxu1 }
 0xe69   :  { %v5962_v49 = vpop.f32.mrb[63].mxu1 }
 0xe6a   :  { %v5963_v22 = vadd.f32 %v5962_v49, %v5961_v21 }
 0xe6c   :  { %v5052_v11 = vpack.c.bf16 %v5963_v22, %v5960_v14 }
 0xe6e   :  { %v5964_v48 = vpop.f32.mrb[64].mxu1  ;;  %5982 = vmatprep.subr.bf16.mxu0 %v5052_v11 }
 0xe6f   :  { %v5965_v27 = vpop.f32.mrb[65].mxu1  ;;  %5983 = vmatpush3.bf16.msra.mxu0 %v5052_v11 }
 0xe70   :  { %v5966_v30 = vadd.f32 %v5965_v27, %v5964_v48  ;;  %v5967_v50 = vpop.f32.mrb[66].mxu1 }
 0xe71   :  { %v5968_v20 = vpop.f32.mrb[67].mxu1 }
 0xe72   :  { %v5969_v52 = vadd.f32 %v5968_v20, %v5967_v50 }
 0xe74   :  { %v5053_v53 = vpack.c.bf16 %v5969_v52, %v5966_v30 }
 0xe76   :  { %5984 = vmatprep.subr.bf16.mxu0 %v5053_v53 }
 0xe77   :  { %5985 = vmatpush3.bf16.msra.mxu0 %v5053_v53 }
 0xe7a   :  { %5987 = vmatmul.mubr.msk.bf16.vlgmr.msra.gmra.mrb[68].mxu0 %vm2733_vm2, %v6838_v45 }
 0xe7b   :  { %5990 = vmatprep.mubr.msk.bf16.mxu0 %vm2733_vm2, %v6839_v54 }
 0xe82   :  { %5991 = vmatmul.mubr.msk.bf16.gmra.mrb[72].mxu0 %vm2733_vm2, %v6840_v51 }
 0xf4d   :  { %v5988_v55 = vpop.f32.mrb[68].mxu0 }
 0xf4e   :  { %6847 = vtanh.f32 %v5988_v55  ;;  %v5125_v39 = vpop.f32.mrb[69].mxu0 }
 0xf4f   :  { %6849 = vtanh.f32 %v5125_v39  ;;  %v5989_v57 = vpop.f32.mrb[70].mxu0 }
 0xf50   :  { %6851 = vtanh.f32 %v5989_v57  ;;  %v5128_v13 = vpop.f32.mrb[71].mxu0 }
 0xf51   :  { %6853 = vtanh.f32 %v5128_v13 }
 0xf55   :  { %v5992_v58 = vpop.f32.mrb[72].mxu0 }
 0xf56   :  { %6855 = vtanh.f32 %v5992_v58  ;;  %v5141_v47 = vpop.f32.mrb[73].mxu0 }
 0xf57   :  { %6857 = vtanh.f32 %v5141_v47  ;;  %v5993_v60 = vpop.f32.mrb[74].mxu0 }
 0xf58   :  { %v6848_v59 = vpop.eup %6847  ;;  %v5144_v61 = vpop.f32.mrb[75].mxu0 }
 0xf59   :  { %v6850_v3 = vpop.eup %6849  ;;  %6859 = vtanh.f32 %v5144_v61  ;;  %5165 = vst.msk [vmem:[#allocation23 + $0x10] sm:$0xff] %vm5162_vm5, %v6848_v59 }
 0xf5a   :  { %v6852_v63 = vpop.eup %6851  ;;  %5163 = vst.msk [vmem:[#allocation23] sm:$0xff] %vm5162_vm5, %v6850_v3 }
 0xf5b   :  { %v6854_v1 = vpop.eup %6853  ;;  %5166 = vst.msk [vmem:[#allocation23 + $0x18] sm:$0xff] %vm5162_vm5, %v6852_v63 }
 0xf5c   :  { %5164 = vst.msk [vmem:[#allocation23 + $0x8] sm:$0xff] %vm5162_vm5, %v6854_v1 }
 0xf60   :  { %v6856_v2 = vpop.eup %6855 }
 0xf61   :  { %v6858_v4 = vpop.eup %6857  ;;  %5169 = vst.msk [vmem:[#allocation23 + $0x30] sm:$0xff] %vm5162_vm5, %v6856_v2 }
 0xf62   :  { %5167 = vst.msk [vmem:[#allocation23 + $0x20] sm:$0xff] %vm5162_vm5, %v6858_v4 }
 0xf63   :  { %v6860_v5 = vpop.eup %6859 }
 0xf64   :  { %5168 = vst.msk [vmem:[#allocation23 + $0x28] sm:$0xff] %vm5162_vm5, %v6860_v5 }
 0xf65   :  { %7136 = shalt.err (!%p7133_p2)
}
 0xf66   :  { %s8581_s20 = sld [smem:[#allocation40_spill]] }
 0xf6c   :  { %s7137_s1 = scalar_lea.hbm %s8581_s20, 896 }
 0xf6d   :  { %p7138_p3 = scmp.ne.s32.totalorder %s8581_s20, %s7137_s1  ;;  %p7141_p4 = scmp.lt.u32.totalorder %s7137_s1, %s8581_s20 }
 0xf6f   :  { %p7143_p5 = pnand %p7141_p4, %p7138_p3 }
 0xf71   :  { %7146 = shalt.err (!%p7143_p5)
}
 0xf72   :  { %5181 = dma.vmem_to_hbm [thread:$0]  %s5176_s19, 896, %s8581_s20, [#allocation5], %s7169_s24, %s7169_s24, %s7170_s5  }
 0xf73   :  { %7161 = dma.done.wait [#allocation5], 896  }
 0xf74   :  { %7162 = vsyncadd [#allocation5], 4294966400 }
 0xf75   :  { %5185 = vsyncpa [#allocation4], 1 }
 0xf76   :  { %5186 = vsyncpa [#allocation7], 1 }
 0xf77   :  { %5187 = vsyncpa [#allocation10], 1 }
 0xf78   :  { %5188 = vsyncpa [#allocation13], 1 }
 0xf79   :  { %5189 = vsyncpa [#allocation16], 1 }
 0xf7a   :  { %5190 = vsyncpa [#allocation19], 1 }
 0xf7b   :  { %5191 = vsyncpa [#allocation22], 1 }
 0xf7c   :  { %5192 = vsyncpa [#allocation5], 1 }

</bundles_post_ra>
